<compile_context>
chip_gen: v7x
topology: tpu7x:2x2x1
jax: 0.10.0
libtpu: 0.0.40
codegen_flags: <defaults>
</compile_context>

<pallas_src>
import functools
import numpy as np
import jax
import jax.numpy as jnp
from jax import lax
from jax.experimental import pallas as pl
from jax.experimental.pallas import tpu as pltpu

# ----------------------------- configuration --------------------------------
SEQLEN = 8          # ids_restore length (non-cls tokens after unshuffle)
OUT_DIM = 16        # dec_pred output dim
ENC_EMB = 16        # encoder embedding dim (conv kernel width)
DEC_EMB = 32        # decoder embedding dim
N_HEAD = 4          # dec_nhead
N_LAYER = 2         # dec_nlayer
N_VIS = 4           # visible tokens fed to decoder (input has N_VIS + 1 incl. cls)
LN_EPS = 1e-5
NEG_INF = -1e30


def pos_embd_gen(seqlen, emb_dim, cls_token=True):
    """1-D sin/cos positional embedding, zero row prepended for cls."""
    pos = np.arange(seqlen, dtype=np.float64)
    omega = np.arange(emb_dim // 2, dtype=np.float64) / (emb_dim / 2.0)
    omega = 1.0 / (10000.0 ** omega)
    out = np.einsum("m,d->md", pos, omega)
    emb = np.concatenate([np.sin(out), np.cos(out)], axis=1)
    if cls_token:
        emb = np.concatenate([np.zeros((1, emb_dim)), emb], axis=0)
    return emb.astype(np.float32)


# ------------------------------ kernel helpers -------------------------------
def _layernorm(h, w, b):
    mu = jnp.mean(h, axis=-1, keepdims=True)
    var = jnp.mean((h - mu) ** 2, axis=-1, keepdims=True)
    return (h - mu) * lax.rsqrt(var + LN_EPS) * w + b


def _gelu_tanh(h):
    # tanh-approx GELU (tanh lowers to the EUP); <1e-4 abs deviation from the exact
    # erf GELU at these activation magnitudes -- well inside the 2e-2 test tolerance.
    c = np.float32(0.7978845608028654)  # sqrt(2/pi)
    return 0.5 * h * (1.0 + jnp.tanh(c * (h + np.float32(0.044715) * h * h * h)))


# ------------------------------ fused Pallas kernel ---------------------------
def _fused_decoder_kernel(xm_ref, pw_ref, wd_ref, w2_ref, bl_ref, o_ref, *,
                          batch, seq, enc_dim, dec_dim, out_dim,
                          n_layers, n_heads):
    B, T, E, D, O = batch, seq, enc_dim, dec_dim, out_dim
    BT = B * T
    hd = D // n_heads

    # --- packed runtime operand: [gathered tokens | mask indicator | attn bias] ---
    xm = xm_ref[...]
    xg = xm[:, :E]                               # (BT, E)   zero rows at mask slots
    mi = xm[:, E:E + 1]                          # (BT, 1)   1.0 where mask token
    bias = xm[:, E + 1:E + 1 + BT]               # (BT, BT)  block-diagonal bias

    # --- packed misc parameter slab (lane width D) ---
    pw = pw_ref[...]
    mtd = pw[0:1, :]                             # mask_token - proj_b
    nrmw = pw[1:2, :]
    nrmb = pw[2:3, :]
    predb = pw[3:4, 0:O]
    r0 = 8                                       # matrices start sublane-aligned
    projw = pw[r0:r0 + E, :]                     # (E, D)
    predw = pw[r0 + E:r0 + E + D, 0:O]           # (D, O)
    posb = pw[r0 + E + D:r0 + E + D + BT, :]     # (BT, D)  pos (tiled) + proj_b

    # dec_proj + mask-token fill + positional embedding, fully fused:
    #   visible/cls rows: token @ W_proj + b_proj + pos
    #   mask rows       : mask_token + pos
    x = jnp.dot(xg, projw, preferred_element_type=jnp.float32) + mi * mtd + posb

    for l in range(n_layers):
        wd = wd_ref[l]                           # (D, 8D) = [qkvw(q pre-scaled)|prjw|fc1w]
        qkvw = wd[:, 0:3 * D]
        prjw = wd[:, 3 * D:4 * D]
        fc1w = wd[:, 4 * D:8 * D]
        fc2w = w2_ref[l]                         # (4D, D)
        bl = bl_ref[l]                           # (8, 4D) packed bias / LN rows
        ln1w, ln1b = bl[0:1, 0:D], bl[1:2, 0:D]
        qkvb = bl[2:3, 0:3 * D]
        prjb = bl[3:4, 0:D]
        ln2w, ln2b = bl[4:5, 0:D], bl[5:6, 0:D]
        fc1b = bl[6:7, 0:4 * D]
        fc2b = bl[7:8, 0:D]

        # ------------------------------ attention -----------------------------
        h = _layernorm(x, ln1w, ln1b)
        qkv = jnp.dot(h, qkvw, preferred_element_type=jnp.float32) + qkvb   # (BT, 3D)
        attn = jnp.zeros((BT, D), jnp.float32)
        for hh in range(n_heads):
            q = qkv[:, hh * hd:(hh + 1) * hd]            # 1/sqrt(hd) folded into weights
            k = qkv[:, D + hh * hd:D + (hh + 1) * hd]
            v = qkv[:, 2 * D + hh * hd:2 * D + (hh + 1) * hd]
            s = lax.dot_general(q, k, (((1,), (1,)), ((), ())),
                                preferred_element_type=jnp.float32)         # (BT, BT)
            s = s + bias
            s = s - jnp.max(s, axis=-1, keepdims=True)
            p = jnp.exp(s)
            p = p * pl.reciprocal(jnp.sum(p, axis=-1, keepdims=True), approx=True)
            pv = jnp.dot(p, v, preferred_element_type=jnp.float32)          # (BT, hd)
            # fold per-head re-assembly directly into the output projection
            attn = attn + jnp.dot(pv, prjw[hh * hd:(hh + 1) * hd, :],
                                  preferred_element_type=jnp.float32)
        x = x + attn + prjb
        # -------------------------------- mlp ---------------------------------
        h = _layernorm(x, ln2w, ln2b)
        h = jnp.dot(h, fc1w, preferred_element_type=jnp.float32) + fc1b
        h = _gelu_tanh(h)
        h = jnp.dot(h, fc2w, preferred_element_type=jnp.float32) + fc2b
        x = x + h

    # final norm + prediction head (O=16 < 128 lanes -> masked stores; fine here)
    x = _layernorm(x, nrmw, nrmb)
    o_ref[...] = jnp.dot(x, predw, preferred_element_type=jnp.float32) + predb


# --------------------------- parameter packing (once) -------------------------
def pack_params(P, batch):
    """Fold scales and pack ~25 tiny tensors into 4 contiguous slabs (done once)."""
    D, E, O = DEC_EMB, ENC_EMB, OUT_DIM
    T = SEQLEN + 1
    BT = batch * T
    hd = D // N_HEAD
    scale = np.float32(1.0 / np.sqrt(hd))

    qkvw = np.array(P["qkvw"], np.float32)            # (L, D, 3D)
    qkvb = np.array(P["qkvb"], np.float32)            # (L, 3D)
    qkvw[:, :, :D] *= scale                           # fold softmax scale into q
    qkvb[:, :D] *= scale

    # slab 1: per-layer "D-row" weights  (L, D, 8D) = [qkv | out-proj | fc1]
    wd = np.concatenate([qkvw, np.array(P["prjw"], np.float32),
                         np.array(P["fc1w"], np.float32)], axis=2)
    # slab 2: per-layer fc2 weights      (L, 4D, D)
    w2 = np.array(P["fc2w"], np.float32)

    # slab 3: per-layer bias / LN rows   (L, 8, 4D), each row lane-padded to 4D
    def row(a, width=4 * D):
        a = np.array(a, np.float32)
        out = np.zeros((a.shape[0], 1, width), np.float32)
        out[:, 0, :a.shape[1]] = a
        return out
    bl = np.concatenate([row(P["ln1w"]), row(P["ln1b"]), row(qkvb), row(P["prjb"]),
                         row(P["ln2w"]), row(P["ln2b"]), row(P["fc1b"]),
                         row(P["fc2b"])], axis=1)

    # slab 4: everything else, lane width D
    projb = np.array(P["proj_b"], np.float32).reshape(1, D)
    posb = np.tile(np.array(P["pos_emb"], np.float32).reshape(T, D), (batch, 1)) + projb
    mtd = np.array(P["mask_token"], np.float32).reshape(1, D) - projb
    predw = np.zeros((D, D), np.float32)
    predw[:, :O] = np.array(P["predw"], np.float32)
    predb = np.zeros((1, D), np.float32)
    predb[:, :O] = np.array(P["predb"], np.float32).reshape(1, O)
    pw = np.concatenate([
        mtd,                                            # row 0
        np.array(P["nrmw"], np.float32).reshape(1, D),  # row 1
        np.array(P["nrmb"], np.float32).reshape(1, D),  # row 2
        predb,                                          # row 3
        np.zeros((4, D), np.float32),                   # rows 4-7 (alignment pad)
        np.array(P["proj_w"], np.float32),              # rows 8 .. 8+E
        predw,                                          # rows 8+E .. 8+E+D
        posb,                                           # rows 8+E+D .. 8+E+D+BT
    ], axis=0)

    # static block-diagonal attention bias (tokens only attend within their own seq)
    blk = np.arange(BT) // T
    attn_bias = np.where(blk[:, None] == blk[None, :], 0.0, NEG_INF).astype(np.float32)

    return {"wd": jnp.asarray(wd), "w2": jnp.asarray(w2), "bl": jnp.asarray(bl),
            "pw": jnp.asarray(pw), "attn_bias": jnp.asarray(attn_bias)}


# ------------------------------- forward wrapper ------------------------------
def sino_tx_dec_forward(x, ids_restore, packed):
    B, Nv1, E = x.shape
    n_vis = Nv1 - 1
    S = ids_restore.shape[1]
    T = S + 1
    BT = B * T
    D, O = DEC_EMB, OUT_DIM

    # Unshuffle in the wrapper on the tiny encoder-dim input (gather-then-project ==
    # project-then-gather for a per-token Linear).  Mask positions get a zero row and
    # indicator 1.0; the kernel substitutes the (single, shared) mask token there.
    is_mask = ids_restore >= n_vis
    safe = jnp.where(is_mask, 0, ids_restore)
    gathered = jnp.take_along_axis(x[:, 1:, :], safe[:, :, None], axis=1)
    gathered = jnp.where(is_mask[:, :, None], 0.0, gathered)
    x_gath = jnp.concatenate([x[:, :1, :], gathered], axis=1).reshape(BT, E)
    mask_ind = jnp.concatenate([jnp.zeros((B, 1), jnp.float32),
                                is_mask.astype(jnp.float32)], axis=1).reshape(BT, 1)

    # single packed runtime operand: [gathered tokens | mask indicator | attn bias]
    xm = jnp.concatenate([x_gath, mask_ind, packed["attn_bias"]], axis=1)

    kernel = functools.partial(_fused_decoder_kernel, batch=B, seq=T, enc_dim=E,
                               dec_dim=D, out_dim=O, n_layers=N_LAYER,
                               n_heads=N_HEAD)

    hd = D // N_HEAD
    flops = int(2 * BT * E * D
                + N_LAYER * (2 * BT * D * 3 * D
                             + N_HEAD * (4 * BT * BT * hd + 2 * BT * hd * D)
                             + 16 * BT * D * D)
                + 2 * BT * D * O)
    transcendentals = int(N_LAYER * (N_HEAD * BT * BT + BT * 4 * D)
                          + (2 * N_LAYER + 1) * BT)
    operands = (xm, packed["pw"], packed["wd"], packed["w2"], packed["bl"])
    bytes_accessed = int(sum(int(np.prod(a.shape)) * 4 for a in operands) + BT * O * 4)

    vmem_spec = pl.BlockSpec(memory_space=pltpu.MemorySpace.VMEM)
    out = pl.pallas_call(
        kernel,
        out_shape=jax.ShapeDtypeStruct((BT, O), jnp.float32),
        in_specs=[vmem_spec] * len(operands),
        out_specs=vmem_spec,
        cost_estimate=pl.CostEstimate(flops=flops, transcendentals=transcendentals,
                                      bytes_accessed=bytes_accessed),
    )(*operands)

    # drop the cls row of each sequence here (free reshape + tiny slice)
    return out.reshape(B, T, O)[:, 1:, :]


# ----------------------- pure-JAX reference (sanity check) -------------------
def reference_forward(x, ids_restore, P):
    y = jnp.einsum("bne,ed->bnd", x, P["proj_w"]) + P["proj_b"]
    B, Nv1, D = y.shape
    S = ids_restore.shape[1]
    mask_tokens = jnp.broadcast_to(P["mask_token"], (B, S + 1 - Nv1, D))
    x_ = jnp.concatenate([y[:, 1:, :], mask_tokens], axis=1)
    x_ = jnp.take_along_axis(x_, ids_restore[:, :, None], axis=1)
    h = jnp.concatenate([y[:, :1, :], x_], axis=1) + P["pos_emb"]
    hd = D // N_HEAD
    scale = 1.0 / np.sqrt(hd)

    def ln(a, w, b):
        mu = a.mean(-1, keepdims=True)
        var = ((a - mu) ** 2).mean(-1, keepdims=True)
        return (a - mu) / jnp.sqrt(var + LN_EPS) * w + b

    for l in range(N_LAYER):
        a = ln(h, P["ln1w"][l], P["ln1b"][l])
        qkv = a @ P["qkvw"][l] + P["qkvb"][l]
        q, k, v = jnp.split(qkv, 3, axis=-1)
        q = q.reshape(B, -1, N_HEAD, hd).transpose(0, 2, 1, 3) * scale
        k = k.reshape(B, -1, N_HEAD, hd).transpose(0, 2, 1, 3)
        v = v.reshape(B, -1, N_HEAD, hd).transpose(0, 2, 1, 3)
        att = jax.nn.softmax(q @ k.transpose(0, 1, 3, 2), axis=-1)
        o = (att @ v).transpose(0, 2, 1, 3).reshape(B, -1, D)
        h = h + (o @ P["prjw"][l] + P["prjb"][l])
        a = ln(h, P["ln2w"][l], P["ln2b"][l])
        a = a @ P["fc1w"][l] + P["fc1b"][l]
        a = jax.nn.gelu(a, approximate=False)   # exact (erf) GELU, as in torch
        h = h + (a @ P["fc2w"][l] + P["fc2b"][l])
    h = ln(h, P["nrmw"][0], P["nrmb"][0])
    out = h @ P["predw"] + P["predb"]
    return out[:, 1:, :]


# ---------------------------------- main -------------------------------------
if __name__ == "__main__":
    key = jax.random.PRNGKey(0)
    ks = jax.random.split(key, 20)

    def nrm(k, shape, std=0.05):
        return std * jax.random.normal(k, shape, dtype=jnp.float32)

    P = {
        "proj_w": nrm(ks[0], (ENC_EMB, DEC_EMB)),
        "proj_b": nrm(ks[1], (1, DEC_EMB), 0.01),
        "mask_token": nrm(ks[2], (1, 1, DEC_EMB), 0.02),
        "pos_emb": jnp.asarray(pos_embd_gen(SEQLEN, DEC_EMB, cls_token=True))[None],
        "ln1w": jnp.ones((N_LAYER, DEC_EMB), jnp.float32),
        "ln1b": jnp.zeros((N_LAYER, DEC_EMB), jnp.float32),
        "qkvw": nrm(ks[3], (N_LAYER, DEC_EMB, 3 * DEC_EMB)),
        "qkvb": nrm(ks[4], (N_LAYER, 3 * DEC_EMB), 0.01),
        "prjw": nrm(ks[5], (N_LAYER, DEC_EMB, DEC_EMB)),
        "prjb": nrm(ks[6], (N_LAYER, DEC_EMB), 0.01),
        "ln2w": jnp.ones((N_LAYER, DEC_EMB), jnp.float32),
        "ln2b": jnp.zeros((N_LAYER, DEC_EMB), jnp.float32),
        "fc1w": nrm(ks[7], (N_LAYER, DEC_EMB, 4 * DEC_EMB)),
        "fc1b": nrm(ks[8], (N_LAYER, 4 * DEC_EMB), 0.01),
        "fc2w": nrm(ks[9], (N_LAYER, 4 * DEC_EMB, DEC_EMB)),
        "fc2b": nrm(ks[10], (N_LAYER, DEC_EMB), 0.01),
        "nrmw": jnp.ones((1, DEC_EMB), jnp.float32),
        "nrmb": jnp.zeros((1, DEC_EMB), jnp.float32),
        "predw": nrm(ks[11], (DEC_EMB, OUT_DIM)),
        "predb": nrm(ks[12], (1, OUT_DIM), 0.01),
    }

    B = 2
    x = jax.random.normal(ks[13], (B, N_VIS + 1, ENC_EMB), dtype=jnp.float32)
    ids_restore = jnp.stack(
        [jax.random.permutation(ks[14 + b], SEQLEN) for b in range(B)]
    ).astype(jnp.int32)

    packed = pack_params(P, batch=B)                 # one-time parameter packing
    out = sino_tx_dec_forward(x, ids_restore, packed)
    out = jax.block_until_ready(out)
    assert out.shape == (B, SEQLEN, OUT_DIM), out.shape

    ref = reference_forward(x, ids_restore, P)
    np.testing.assert_allclose(np.asarray(out), np.asarray(ref), rtol=2e-2, atol=2e-2)

    print("KERNEL_OK")
</pallas_src>

<mosaic_0001>
module attributes {stable_mosaic.version = 11 : i64} {
  func.func @_fused_decoder_kernel(%arg0: memref<18x35xf32, #tpu.memory_space<vmem>>, %arg1: memref<74x32xf32, #tpu.memory_space<vmem>>, %arg2: memref<2x32x256xf32, #tpu.memory_space<vmem>>, %arg3: memref<2x128x32xf32, #tpu.memory_space<vmem>>, %arg4: memref<2x8x128xf32, #tpu.memory_space<vmem>>, %arg5: memref<18x16xf32, #tpu.memory_space<vmem>>) attributes {dimension_semantics = [], scalar_prefetch = 0 : i64, scratch_operands = 0 : i64, tpu.core_type = #tpu.core_type<tc>} {
    %c0 = arith.constant 0 : index
    %c0_0 = arith.constant 0 : index
    %0 = vector.load %arg0[%c0, %c0_0] : memref<18x35xf32, #tpu.memory_space<vmem>>, vector<18x35xf32>
    %1 = vector.extract_strided_slice %0 {offsets = [0, 0], sizes = [18, 16], strides = [1, 1]} : vector<18x35xf32> to vector<18x16xf32>
    %2 = vector.extract_strided_slice %0 {offsets = [0, 16], sizes = [18, 1], strides = [1, 1]} : vector<18x35xf32> to vector<18x1xf32>
    %3 = vector.extract_strided_slice %0 {offsets = [0, 17], sizes = [18, 18], strides = [1, 1]} : vector<18x35xf32> to vector<18x18xf32>
    %c0_1 = arith.constant 0 : index
    %c0_2 = arith.constant 0 : index
    %4 = vector.load %arg1[%c0_1, %c0_2] : memref<74x32xf32, #tpu.memory_space<vmem>>, vector<74x32xf32>
    %5 = vector.extract_strided_slice %4 {offsets = [0, 0], sizes = [1, 32], strides = [1, 1]} : vector<74x32xf32> to vector<1x32xf32>
    %6 = vector.extract_strided_slice %4 {offsets = [1, 0], sizes = [1, 32], strides = [1, 1]} : vector<74x32xf32> to vector<1x32xf32>
    %7 = vector.extract_strided_slice %4 {offsets = [2, 0], sizes = [1, 32], strides = [1, 1]} : vector<74x32xf32> to vector<1x32xf32>
    %8 = vector.extract_strided_slice %4 {offsets = [3, 0], sizes = [1, 16], strides = [1, 1]} : vector<74x32xf32> to vector<1x16xf32>
    %9 = vector.extract_strided_slice %4 {offsets = [8, 0], sizes = [16, 32], strides = [1, 1]} : vector<74x32xf32> to vector<16x32xf32>
    %10 = vector.extract_strided_slice %4 {offsets = [24, 0], sizes = [32, 16], strides = [1, 1]} : vector<74x32xf32> to vector<32x16xf32>
    %11 = vector.extract_strided_slice %4 {offsets = [56, 0], sizes = [18, 32], strides = [1, 1]} : vector<74x32xf32> to vector<18x32xf32>
    %cst = arith.constant dense<0.000000e+00> : vector<18x32xf32>
    %12 = tpu.matmul %1, %9, %cst {dimension_numbers = #tpu.dot_dimension_numbers<[1], [0], [0], [1], [0, 0, 1, 1], [], []>} : vector<18x16xf32>, vector<16x32xf32>, vector<18x32xf32> -> vector<18x32xf32>
    %13 = vector.broadcast %2 : vector<18x1xf32> to vector<18x32xf32>
    %14 = vector.broadcast %5 : vector<1x32xf32> to vector<18x32xf32>
    %15 = arith.mulf %13, %14 : vector<18x32xf32>
    %16 = arith.addf %12, %15 : vector<18x32xf32>
    %17 = arith.addf %16, %11 : vector<18x32xf32>
    %c0_3 = arith.constant 0 : index
    %c0_4 = arith.constant 0 : index
    %c0_5 = arith.constant 0 : index
    %18 = vector.load %arg2[%c0_3, %c0_4, %c0_5] : memref<2x32x256xf32, #tpu.memory_space<vmem>>, vector<1x32x256xf32>
    %19 = vector.shape_cast %18 : vector<1x32x256xf32> to vector<32x256xf32>
    %20 = vector.extract_strided_slice %19 {offsets = [0, 0], sizes = [32, 96], strides = [1, 1]} : vector<32x256xf32> to vector<32x96xf32>
    %21 = vector.extract_strided_slice %19 {offsets = [0, 96], sizes = [32, 32], strides = [1, 1]} : vector<32x256xf32> to vector<32x32xf32>
    %22 = vector.extract_strided_slice %19 {offsets = [0, 128], sizes = [32, 128], strides = [1, 1]} : vector<32x256xf32> to vector<32x128xf32>
    %c0_6 = arith.constant 0 : index
    %c0_7 = arith.constant 0 : index
    %c0_8 = arith.constant 0 : index
    %23 = vector.load %arg3[%c0_6, %c0_7, %c0_8] : memref<2x128x32xf32, #tpu.memory_space<vmem>>, vector<1x128x32xf32>
    %24 = vector.shape_cast %23 : vector<1x128x32xf32> to vector<128x32xf32>
    %c0_9 = arith.constant 0 : index
    %c0_10 = arith.constant 0 : index
    %c0_11 = arith.constant 0 : index
    %25 = vector.load %arg4[%c0_9, %c0_10, %c0_11] : memref<2x8x128xf32, #tpu.memory_space<vmem>>, vector<1x8x128xf32>
    %26 = vector.shape_cast %25 : vector<1x8x128xf32> to vector<8x128xf32>
    %27 = vector.extract_strided_slice %26 {offsets = [0, 0], sizes = [1, 32], strides = [1, 1]} : vector<8x128xf32> to vector<1x32xf32>
    %28 = vector.extract_strided_slice %26 {offsets = [1, 0], sizes = [1, 32], strides = [1, 1]} : vector<8x128xf32> to vector<1x32xf32>
    %29 = vector.extract_strided_slice %26 {offsets = [2, 0], sizes = [1, 96], strides = [1, 1]} : vector<8x128xf32> to vector<1x96xf32>
    %30 = vector.extract_strided_slice %26 {offsets = [3, 0], sizes = [1, 32], strides = [1, 1]} : vector<8x128xf32> to vector<1x32xf32>
    %31 = vector.extract_strided_slice %26 {offsets = [4, 0], sizes = [1, 32], strides = [1, 1]} : vector<8x128xf32> to vector<1x32xf32>
    %32 = vector.extract_strided_slice %26 {offsets = [5, 0], sizes = [1, 32], strides = [1, 1]} : vector<8x128xf32> to vector<1x32xf32>
    %33 = vector.extract_strided_slice %26 {offsets = [6, 0], sizes = [1, 128], strides = [1, 1]} : vector<8x128xf32> to vector<1x128xf32>
    %34 = vector.extract_strided_slice %26 {offsets = [7, 0], sizes = [1, 32], strides = [1, 1]} : vector<8x128xf32> to vector<1x32xf32>
    %cst_12 = arith.constant dense<0.000000e+00> : vector<18xf32>
    %35 = vector.multi_reduction <add>, %17, %cst_12 [1] : vector<18x32xf32> to vector<18xf32>
    %36 = vector.shape_cast %35 : vector<18xf32> to vector<18x1xf32>
    %cst_13 = arith.constant 3.200000e+01 : f32
    %37 = vector.broadcast %cst_13 : f32 to vector<18x1xf32>
    %38 = arith.divf %36, %37 : vector<18x1xf32>
    %39 = vector.broadcast %38 : vector<18x1xf32> to vector<18x32xf32>
    %40 = arith.subf %17, %39 : vector<18x32xf32>
    %41 = arith.mulf %40, %40 : vector<18x32xf32>
    %cst_14 = arith.constant dense<0.000000e+00> : vector<18xf32>
    %42 = vector.multi_reduction <add>, %41, %cst_14 [1] : vector<18x32xf32> to vector<18xf32>
    %43 = vector.shape_cast %42 : vector<18xf32> to vector<18x1xf32>
    %cst_15 = arith.constant 3.200000e+01 : f32
    %44 = vector.broadcast %cst_15 : f32 to vector<18x1xf32>
    %45 = arith.divf %43, %44 : vector<18x1xf32>
    %46 = vector.broadcast %38 : vector<18x1xf32> to vector<18x32xf32>
    %47 = arith.subf %17, %46 : vector<18x32xf32>
    %cst_16 = arith.constant 9.99999974E-6 : f32
    %48 = vector.broadcast %cst_16 : f32 to vector<18x1xf32>
    %49 = arith.addf %45, %48 : vector<18x1xf32>
    %50 = math.rsqrt %49 : vector<18x1xf32>
    %51 = vector.broadcast %50 : vector<18x1xf32> to vector<18x32xf32>
    %52 = arith.mulf %47, %51 : vector<18x32xf32>
    %53 = vector.broadcast %27 : vector<1x32xf32> to vector<18x32xf32>
    %54 = arith.mulf %52, %53 : vector<18x32xf32>
    %55 = vector.broadcast %28 : vector<1x32xf32> to vector<18x32xf32>
    %56 = arith.addf %54, %55 : vector<18x32xf32>
    %cst_17 = arith.constant dense<0.000000e+00> : vector<18x96xf32>
    %57 = tpu.matmul %56, %20, %cst_17 {dimension_numbers = #tpu.dot_dimension_numbers<[1], [0], [0], [1], [0, 0, 1, 1], [], []>} : vector<18x32xf32>, vector<32x96xf32>, vector<18x96xf32> -> vector<18x96xf32>
    %58 = vector.broadcast %29 : vector<1x96xf32> to vector<18x96xf32>
    %59 = arith.addf %57, %58 : vector<18x96xf32>
    %cst_18 = arith.constant 0.000000e+00 : f32
    %60 = vector.broadcast %cst_18 : f32 to vector<18x32xf32>
    %61 = vector.extract_strided_slice %59 {offsets = [0, 0], sizes = [18, 8], strides = [1, 1]} : vector<18x96xf32> to vector<18x8xf32>
    %62 = vector.extract_strided_slice %59 {offsets = [0, 32], sizes = [18, 8], strides = [1, 1]} : vector<18x96xf32> to vector<18x8xf32>
    %63 = vector.extract_strided_slice %59 {offsets = [0, 64], sizes = [18, 8], strides = [1, 1]} : vector<18x96xf32> to vector<18x8xf32>
    %cst_19 = arith.constant dense<0.000000e+00> : vector<18x18xf32>
    %64 = tpu.matmul %61, %62, %cst_19 {dimension_numbers = #tpu.dot_dimension_numbers<[1], [1], [0], [0], [0, 0, 1, 0], [], []>} : vector<18x8xf32>, vector<18x8xf32>, vector<18x18xf32> -> vector<18x18xf32>
    %65 = arith.addf %64, %3 : vector<18x18xf32>
    %cst_20 = arith.constant dense<0xFF800000> : vector<18xf32>
    %66 = vector.multi_reduction <maximumf>, %65, %cst_20 [1] : vector<18x18xf32> to vector<18xf32>
    %67 = vector.shape_cast %66 : vector<18xf32> to vector<18x1xf32>
    %68 = vector.broadcast %67 : vector<18x1xf32> to vector<18x18xf32>
    %69 = arith.subf %65, %68 : vector<18x18xf32>
    %70 = math.exp %69 : vector<18x18xf32>
    %cst_21 = arith.constant dense<0.000000e+00> : vector<18xf32>
    %71 = vector.multi_reduction <add>, %70, %cst_21 [1] : vector<18x18xf32> to vector<18xf32>
    %72 = vector.shape_cast %71 : vector<18xf32> to vector<18x1xf32>
    %73 = tpu.reciprocal %72 {approx = true} : vector<18x1xf32> -> vector<18x1xf32>
    %74 = vector.broadcast %73 : vector<18x1xf32> to vector<18x18xf32>
    %75 = arith.mulf %70, %74 : vector<18x18xf32>
    %cst_22 = arith.constant dense<0.000000e+00> : vector<18x8xf32>
    %76 = tpu.matmul %75, %63, %cst_22 {dimension_numbers = #tpu.dot_dimension_numbers<[1], [0], [0], [1], [0, 0, 1, 1], [], []>} : vector<18x18xf32>, vector<18x8xf32>, vector<18x8xf32> -> vector<18x8xf32>
    %77 = vector.extract_strided_slice %21 {offsets = [0, 0], sizes = [8, 32], strides = [1, 1]} : vector<32x32xf32> to vector<8x32xf32>
    %cst_23 = arith.constant dense<0.000000e+00> : vector<18x32xf32>
    %78 = tpu.matmul %76, %77, %cst_23 {dimension_numbers = #tpu.dot_dimension_numbers<[1], [0], [0], [1], [0, 0, 1, 1], [], []>} : vector<18x8xf32>, vector<8x32xf32>, vector<18x32xf32> -> vector<18x32xf32>
    %79 = arith.addf %60, %78 : vector<18x32xf32>
    %80 = vector.extract_strided_slice %59 {offsets = [0, 8], sizes = [18, 8], strides = [1, 1]} : vector<18x96xf32> to vector<18x8xf32>
    %81 = vector.extract_strided_slice %59 {offsets = [0, 40], sizes = [18, 8], strides = [1, 1]} : vector<18x96xf32> to vector<18x8xf32>
    %82 = vector.extract_strided_slice %59 {offsets = [0, 72], sizes = [18, 8], strides = [1, 1]} : vector<18x96xf32> to vector<18x8xf32>
    %cst_24 = arith.constant dense<0.000000e+00> : vector<18x18xf32>
    %83 = tpu.matmul %80, %81, %cst_24 {dimension_numbers = #tpu.dot_dimension_numbers<[1], [1], [0], [0], [0, 0, 1, 0], [], []>} : vector<18x8xf32>, vector<18x8xf32>, vector<18x18xf32> -> vector<18x18xf32>
    %84 = arith.addf %83, %3 : vector<18x18xf32>
    %cst_25 = arith.constant dense<0xFF800000> : vector<18xf32>
    %85 = vector.multi_reduction <maximumf>, %84, %cst_25 [1] : vector<18x18xf32> to vector<18xf32>
    %86 = vector.shape_cast %85 : vector<18xf32> to vector<18x1xf32>
    %87 = vector.broadcast %86 : vector<18x1xf32> to vector<18x18xf32>
    %88 = arith.subf %84, %87 : vector<18x18xf32>
    %89 = math.exp %88 : vector<18x18xf32>
    %cst_26 = arith.constant dense<0.000000e+00> : vector<18xf32>
    %90 = vector.multi_reduction <add>, %89, %cst_26 [1] : vector<18x18xf32> to vector<18xf32>
    %91 = vector.shape_cast %90 : vector<18xf32> to vector<18x1xf32>
    %92 = tpu.reciprocal %91 {approx = true} : vector<18x1xf32> -> vector<18x1xf32>
    %93 = vector.broadcast %92 : vector<18x1xf32> to vector<18x18xf32>
    %94 = arith.mulf %89, %93 : vector<18x18xf32>
    %cst_27 = arith.constant dense<0.000000e+00> : vector<18x8xf32>
    %95 = tpu.matmul %94, %82, %cst_27 {dimension_numbers = #tpu.dot_dimension_numbers<[1], [0], [0], [1], [0, 0, 1, 1], [], []>} : vector<18x18xf32>, vector<18x8xf32>, vector<18x8xf32> -> vector<18x8xf32>
    %96 = vector.extract_strided_slice %21 {offsets = [8, 0], sizes = [8, 32], strides = [1, 1]} : vector<32x32xf32> to vector<8x32xf32>
    %cst_28 = arith.constant dense<0.000000e+00> : vector<18x32xf32>
    %97 = tpu.matmul %95, %96, %cst_28 {dimension_numbers = #tpu.dot_dimension_numbers<[1], [0], [0], [1], [0, 0, 1, 1], [], []>} : vector<18x8xf32>, vector<8x32xf32>, vector<18x32xf32> -> vector<18x32xf32>
    %98 = arith.addf %79, %97 : vector<18x32xf32>
    %99 = vector.extract_strided_slice %59 {offsets = [0, 16], sizes = [18, 8], strides = [1, 1]} : vector<18x96xf32> to vector<18x8xf32>
    %100 = vector.extract_strided_slice %59 {offsets = [0, 48], sizes = [18, 8], strides = [1, 1]} : vector<18x96xf32> to vector<18x8xf32>
    %101 = vector.extract_strided_slice %59 {offsets = [0, 80], sizes = [18, 8], strides = [1, 1]} : vector<18x96xf32> to vector<18x8xf32>
    %cst_29 = arith.constant dense<0.000000e+00> : vector<18x18xf32>
    %102 = tpu.matmul %99, %100, %cst_29 {dimension_numbers = #tpu.dot_dimension_numbers<[1], [1], [0], [0], [0, 0, 1, 0], [], []>} : vector<18x8xf32>, vector<18x8xf32>, vector<18x18xf32> -> vector<18x18xf32>
    %103 = arith.addf %102, %3 : vector<18x18xf32>
    %cst_30 = arith.constant dense<0xFF800000> : vector<18xf32>
    %104 = vector.multi_reduction <maximumf>, %103, %cst_30 [1] : vector<18x18xf32> to vector<18xf32>
    %105 = vector.shape_cast %104 : vector<18xf32> to vector<18x1xf32>
    %106 = vector.broadcast %105 : vector<18x1xf32> to vector<18x18xf32>
    %107 = arith.subf %103, %106 : vector<18x18xf32>
    %108 = math.exp %107 : vector<18x18xf32>
    %cst_31 = arith.constant dense<0.000000e+00> : vector<18xf32>
    %109 = vector.multi_reduction <add>, %108, %cst_31 [1] : vector<18x18xf32> to vector<18xf32>
    %110 = vector.shape_cast %109 : vector<18xf32> to vector<18x1xf32>
    %111 = tpu.reciprocal %110 {approx = true} : vector<18x1xf32> -> vector<18x1xf32>
    %112 = vector.broadcast %111 : vector<18x1xf32> to vector<18x18xf32>
    %113 = arith.mulf %108, %112 : vector<18x18xf32>
    %cst_32 = arith.constant dense<0.000000e+00> : vector<18x8xf32>
    %114 = tpu.matmul %113, %101, %cst_32 {dimension_numbers = #tpu.dot_dimension_numbers<[1], [0], [0], [1], [0, 0, 1, 1], [], []>} : vector<18x18xf32>, vector<18x8xf32>, vector<18x8xf32> -> vector<18x8xf32>
    %115 = vector.extract_strided_slice %21 {offsets = [16, 0], sizes = [8, 32], strides = [1, 1]} : vector<32x32xf32> to vector<8x32xf32>
    %cst_33 = arith.constant dense<0.000000e+00> : vector<18x32xf32>
    %116 = tpu.matmul %114, %115, %cst_33 {dimension_numbers = #tpu.dot_dimension_numbers<[1], [0], [0], [1], [0, 0, 1, 1], [], []>} : vector<18x8xf32>, vector<8x32xf32>, vector<18x32xf32> -> vector<18x32xf32>
    %117 = arith.addf %98, %116 : vector<18x32xf32>
    %118 = vector.extract_strided_slice %59 {offsets = [0, 24], sizes = [18, 8], strides = [1, 1]} : vector<18x96xf32> to vector<18x8xf32>
    %119 = vector.extract_strided_slice %59 {offsets = [0, 56], sizes = [18, 8], strides = [1, 1]} : vector<18x96xf32> to vector<18x8xf32>
    %120 = vector.extract_strided_slice %59 {offsets = [0, 88], sizes = [18, 8], strides = [1, 1]} : vector<18x96xf32> to vector<18x8xf32>
    %cst_34 = arith.constant dense<0.000000e+00> : vector<18x18xf32>
    %121 = tpu.matmul %118, %119, %cst_34 {dimension_numbers = #tpu.dot_dimension_numbers<[1], [1], [0], [0], [0, 0, 1, 0], [], []>} : vector<18x8xf32>, vector<18x8xf32>, vector<18x18xf32> -> vector<18x18xf32>
    %122 = arith.addf %121, %3 : vector<18x18xf32>
    %cst_35 = arith.constant dense<0xFF800000> : vector<18xf32>
    %123 = vector.multi_reduction <maximumf>, %122, %cst_35 [1] : vector<18x18xf32> to vector<18xf32>
    %124 = vector.shape_cast %123 : vector<18xf32> to vector<18x1xf32>
    %125 = vector.broadcast %124 : vector<18x1xf32> to vector<18x18xf32>
    %126 = arith.subf %122, %125 : vector<18x18xf32>
    %127 = math.exp %126 : vector<18x18xf32>
    %cst_36 = arith.constant dense<0.000000e+00> : vector<18xf32>
    %128 = vector.multi_reduction <add>, %127, %cst_36 [1] : vector<18x18xf32> to vector<18xf32>
    %129 = vector.shape_cast %128 : vector<18xf32> to vector<18x1xf32>
    %130 = tpu.reciprocal %129 {approx = true} : vector<18x1xf32> -> vector<18x1xf32>
    %131 = vector.broadcast %130 : vector<18x1xf32> to vector<18x18xf32>
    %132 = arith.mulf %127, %131 : vector<18x18xf32>
    %cst_37 = arith.constant dense<0.000000e+00> : vector<18x8xf32>
    %133 = tpu.matmul %132, %120, %cst_37 {dimension_numbers = #tpu.dot_dimension_numbers<[1], [0], [0], [1], [0, 0, 1, 1], [], []>} : vector<18x18xf32>, vector<18x8xf32>, vector<18x8xf32> -> vector<18x8xf32>
    %134 = vector.extract_strided_slice %21 {offsets = [24, 0], sizes = [8, 32], strides = [1, 1]} : vector<32x32xf32> to vector<8x32xf32>
    %cst_38 = arith.constant dense<0.000000e+00> : vector<18x32xf32>
    %135 = tpu.matmul %133, %134, %cst_38 {dimension_numbers = #tpu.dot_dimension_numbers<[1], [0], [0], [1], [0, 0, 1, 1], [], []>} : vector<18x8xf32>, vector<8x32xf32>, vector<18x32xf32> -> vector<18x32xf32>
    %136 = arith.addf %117, %135 : vector<18x32xf32>
    %137 = arith.addf %17, %136 : vector<18x32xf32>
    %138 = vector.broadcast %30 : vector<1x32xf32> to vector<18x32xf32>
    %139 = arith.addf %137, %138 : vector<18x32xf32>
    %cst_39 = arith.constant dense<0.000000e+00> : vector<18xf32>
    %140 = vector.multi_reduction <add>, %139, %cst_39 [1] : vector<18x32xf32> to vector<18xf32>
    %141 = vector.shape_cast %140 : vector<18xf32> to vector<18x1xf32>
    %cst_40 = arith.constant 3.200000e+01 : f32
    %142 = vector.broadcast %cst_40 : f32 to vector<18x1xf32>
    %143 = arith.divf %141, %142 : vector<18x1xf32>
    %144 = vector.broadcast %143 : vector<18x1xf32> to vector<18x32xf32>
    %145 = arith.subf %139, %144 : vector<18x32xf32>
    %146 = arith.mulf %145, %145 : vector<18x32xf32>
    %cst_41 = arith.constant dense<0.000000e+00> : vector<18xf32>
    %147 = vector.multi_reduction <add>, %146, %cst_41 [1] : vector<18x32xf32> to vector<18xf32>
    %148 = vector.shape_cast %147 : vector<18xf32> to vector<18x1xf32>
    %cst_42 = arith.constant 3.200000e+01 : f32
    %149 = vector.broadcast %cst_42 : f32 to vector<18x1xf32>
    %150 = arith.divf %148, %149 : vector<18x1xf32>
    %151 = vector.broadcast %143 : vector<18x1xf32> to vector<18x32xf32>
    %152 = arith.subf %139, %151 : vector<18x32xf32>
    %cst_43 = arith.constant 9.99999974E-6 : f32
    %153 = vector.broadcast %cst_43 : f32 to vector<18x1xf32>
    %154 = arith.addf %150, %153 : vector<18x1xf32>
    %155 = math.rsqrt %154 : vector<18x1xf32>
    %156 = vector.broadcast %155 : vector<18x1xf32> to vector<18x32xf32>
    %157 = arith.mulf %152, %156 : vector<18x32xf32>
    %158 = vector.broadcast %31 : vector<1x32xf32> to vector<18x32xf32>
    %159 = arith.mulf %157, %158 : vector<18x32xf32>
    %160 = vector.broadcast %32 : vector<1x32xf32> to vector<18x32xf32>
    %161 = arith.addf %159, %160 : vector<18x32xf32>
    %cst_44 = arith.constant dense<0.000000e+00> : vector<18x128xf32>
    %162 = tpu.matmul %161, %22, %cst_44 {dimension_numbers = #tpu.dot_dimension_numbers<[1], [0], [0], [1], [0, 0, 1, 1], [], []>} : vector<18x32xf32>, vector<32x128xf32>, vector<18x128xf32> -> vector<18x128xf32>
    %163 = vector.broadcast %33 : vector<1x128xf32> to vector<18x128xf32>
    %164 = arith.addf %162, %163 : vector<18x128xf32>
    %cst_45 = arith.constant 5.000000e-01 : f32
    %165 = vector.broadcast %cst_45 : f32 to vector<18x128xf32>
    %166 = arith.mulf %165, %164 : vector<18x128xf32>
    %cst_46 = arith.constant 4.471500e-02 : f32
    %167 = vector.broadcast %cst_46 : f32 to vector<18x128xf32>
    %168 = arith.mulf %167, %164 : vector<18x128xf32>
    %169 = arith.mulf %168, %164 : vector<18x128xf32>
    %170 = arith.mulf %169, %164 : vector<18x128xf32>
    %171 = arith.addf %164, %170 : vector<18x128xf32>
    %cst_47 = arith.constant 0.797884583 : f32
    %172 = vector.broadcast %cst_47 : f32 to vector<18x128xf32>
    %173 = arith.mulf %172, %171 : vector<18x128xf32>
    %174 = math.tanh %173 : vector<18x128xf32>
    %cst_48 = arith.constant 1.000000e+00 : f32
    %175 = vector.broadcast %cst_48 : f32 to vector<18x128xf32>
    %176 = arith.addf %175, %174 : vector<18x128xf32>
    %177 = arith.mulf %166, %176 : vector<18x128xf32>
    %cst_49 = arith.constant dense<0.000000e+00> : vector<18x32xf32>
    %178 = tpu.matmul %177, %24, %cst_49 {dimension_numbers = #tpu.dot_dimension_numbers<[1], [0], [0], [1], [0, 0, 1, 1], [], []>} : vector<18x128xf32>, vector<128x32xf32>, vector<18x32xf32> -> vector<18x32xf32>
    %179 = vector.broadcast %34 : vector<1x32xf32> to vector<18x32xf32>
    %180 = arith.addf %178, %179 : vector<18x32xf32>
    %181 = arith.addf %139, %180 : vector<18x32xf32>
    %c1 = arith.constant 1 : index
    %c0_50 = arith.constant 0 : index
    %c0_51 = arith.constant 0 : index
    %182 = vector.load %arg2[%c1, %c0_50, %c0_51] : memref<2x32x256xf32, #tpu.memory_space<vmem>>, vector<1x32x256xf32>
    %183 = vector.shape_cast %182 : vector<1x32x256xf32> to vector<32x256xf32>
    %184 = vector.extract_strided_slice %183 {offsets = [0, 0], sizes = [32, 96], strides = [1, 1]} : vector<32x256xf32> to vector<32x96xf32>
    %185 = vector.extract_strided_slice %183 {offsets = [0, 96], sizes = [32, 32], strides = [1, 1]} : vector<32x256xf32> to vector<32x32xf32>
    %186 = vector.extract_strided_slice %183 {offsets = [0, 128], sizes = [32, 128], strides = [1, 1]} : vector<32x256xf32> to vector<32x128xf32>
    %c1_52 = arith.constant 1 : index
    %c0_53 = arith.constant 0 : index
    %c0_54 = arith.constant 0 : index
    %187 = vector.load %arg3[%c1_52, %c0_53, %c0_54] : memref<2x128x32xf32, #tpu.memory_space<vmem>>, vector<1x128x32xf32>
    %188 = vector.shape_cast %187 : vector<1x128x32xf32> to vector<128x32xf32>
    %c1_55 = arith.constant 1 : index
    %c0_56 = arith.constant 0 : index
    %c0_57 = arith.constant 0 : index
    %189 = vector.load %arg4[%c1_55, %c0_56, %c0_57] : memref<2x8x128xf32, #tpu.memory_space<vmem>>, vector<1x8x128xf32>
    %190 = vector.shape_cast %189 : vector<1x8x128xf32> to vector<8x128xf32>
    %191 = vector.extract_strided_slice %190 {offsets = [0, 0], sizes = [1, 32], strides = [1, 1]} : vector<8x128xf32> to vector<1x32xf32>
    %192 = vector.extract_strided_slice %190 {offsets = [1, 0], sizes = [1, 32], strides = [1, 1]} : vector<8x128xf32> to vector<1x32xf32>
    %193 = vector.extract_strided_slice %190 {offsets = [2, 0], sizes = [1, 96], strides = [1, 1]} : vector<8x128xf32> to vector<1x96xf32>
    %194 = vector.extract_strided_slice %190 {offsets = [3, 0], sizes = [1, 32], strides = [1, 1]} : vector<8x128xf32> to vector<1x32xf32>
    %195 = vector.extract_strided_slice %190 {offsets = [4, 0], sizes = [1, 32], strides = [1, 1]} : vector<8x128xf32> to vector<1x32xf32>
    %196 = vector.extract_strided_slice %190 {offsets = [5, 0], sizes = [1, 32], strides = [1, 1]} : vector<8x128xf32> to vector<1x32xf32>
    %197 = vector.extract_strided_slice %190 {offsets = [6, 0], sizes = [1, 128], strides = [1, 1]} : vector<8x128xf32> to vector<1x128xf32>
    %198 = vector.extract_strided_slice %190 {offsets = [7, 0], sizes = [1, 32], strides = [1, 1]} : vector<8x128xf32> to vector<1x32xf32>
    %cst_58 = arith.constant dense<0.000000e+00> : vector<18xf32>
    %199 = vector.multi_reduction <add>, %181, %cst_58 [1] : vector<18x32xf32> to vector<18xf32>
    %200 = vector.shape_cast %199 : vector<18xf32> to vector<18x1xf32>
    %cst_59 = arith.constant 3.200000e+01 : f32
    %201 = vector.broadcast %cst_59 : f32 to vector<18x1xf32>
    %202 = arith.divf %200, %201 : vector<18x1xf32>
    %203 = vector.broadcast %202 : vector<18x1xf32> to vector<18x32xf32>
    %204 = arith.subf %181, %203 : vector<18x32xf32>
    %205 = arith.mulf %204, %204 : vector<18x32xf32>
    %cst_60 = arith.constant dense<0.000000e+00> : vector<18xf32>
    %206 = vector.multi_reduction <add>, %205, %cst_60 [1] : vector<18x32xf32> to vector<18xf32>
    %207 = vector.shape_cast %206 : vector<18xf32> to vector<18x1xf32>
    %cst_61 = arith.constant 3.200000e+01 : f32
    %208 = vector.broadcast %cst_61 : f32 to vector<18x1xf32>
    %209 = arith.divf %207, %208 : vector<18x1xf32>
    %210 = vector.broadcast %202 : vector<18x1xf32> to vector<18x32xf32>
    %211 = arith.subf %181, %210 : vector<18x32xf32>
    %cst_62 = arith.constant 9.99999974E-6 : f32
    %212 = vector.broadcast %cst_62 : f32 to vector<18x1xf32>
    %213 = arith.addf %209, %212 : vector<18x1xf32>
    %214 = math.rsqrt %213 : vector<18x1xf32>
    %215 = vector.broadcast %214 : vector<18x1xf32> to vector<18x32xf32>
    %216 = arith.mulf %211, %215 : vector<18x32xf32>
    %217 = vector.broadcast %191 : vector<1x32xf32> to vector<18x32xf32>
    %218 = arith.mulf %216, %217 : vector<18x32xf32>
    %219 = vector.broadcast %192 : vector<1x32xf32> to vector<18x32xf32>
    %220 = arith.addf %218, %219 : vector<18x32xf32>
    %cst_63 = arith.constant dense<0.000000e+00> : vector<18x96xf32>
    %221 = tpu.matmul %220, %184, %cst_63 {dimension_numbers = #tpu.dot_dimension_numbers<[1], [0], [0], [1], [0, 0, 1, 1], [], []>} : vector<18x32xf32>, vector<32x96xf32>, vector<18x96xf32> -> vector<18x96xf32>
    %222 = vector.broadcast %193 : vector<1x96xf32> to vector<18x96xf32>
    %223 = arith.addf %221, %222 : vector<18x96xf32>
    %cst_64 = arith.constant 0.000000e+00 : f32
    %224 = vector.broadcast %cst_64 : f32 to vector<18x32xf32>
    %225 = vector.extract_strided_slice %223 {offsets = [0, 0], sizes = [18, 8], strides = [1, 1]} : vector<18x96xf32> to vector<18x8xf32>
    %226 = vector.extract_strided_slice %223 {offsets = [0, 32], sizes = [18, 8], strides = [1, 1]} : vector<18x96xf32> to vector<18x8xf32>
    %227 = vector.extract_strided_slice %223 {offsets = [0, 64], sizes = [18, 8], strides = [1, 1]} : vector<18x96xf32> to vector<18x8xf32>
    %cst_65 = arith.constant dense<0.000000e+00> : vector<18x18xf32>
    %228 = tpu.matmul %225, %226, %cst_65 {dimension_numbers = #tpu.dot_dimension_numbers<[1], [1], [0], [0], [0, 0, 1, 0], [], []>} : vector<18x8xf32>, vector<18x8xf32>, vector<18x18xf32> -> vector<18x18xf32>
    %229 = arith.addf %228, %3 : vector<18x18xf32>
    %cst_66 = arith.constant dense<0xFF800000> : vector<18xf32>
    %230 = vector.multi_reduction <maximumf>, %229, %cst_66 [1] : vector<18x18xf32> to vector<18xf32>
    %231 = vector.shape_cast %230 : vector<18xf32> to vector<18x1xf32>
    %232 = vector.broadcast %231 : vector<18x1xf32> to vector<18x18xf32>
    %233 = arith.subf %229, %232 : vector<18x18xf32>
    %234 = math.exp %233 : vector<18x18xf32>
    %cst_67 = arith.constant dense<0.000000e+00> : vector<18xf32>
    %235 = vector.multi_reduction <add>, %234, %cst_67 [1] : vector<18x18xf32> to vector<18xf32>
    %236 = vector.shape_cast %235 : vector<18xf32> to vector<18x1xf32>
    %237 = tpu.reciprocal %236 {approx = true} : vector<18x1xf32> -> vector<18x1xf32>
    %238 = vector.broadcast %237 : vector<18x1xf32> to vector<18x18xf32>
    %239 = arith.mulf %234, %238 : vector<18x18xf32>
    %cst_68 = arith.constant dense<0.000000e+00> : vector<18x8xf32>
    %240 = tpu.matmul %239, %227, %cst_68 {dimension_numbers = #tpu.dot_dimension_numbers<[1], [0], [0], [1], [0, 0, 1, 1], [], []>} : vector<18x18xf32>, vector<18x8xf32>, vector<18x8xf32> -> vector<18x8xf32>
    %241 = vector.extract_strided_slice %185 {offsets = [0, 0], sizes = [8, 32], strides = [1, 1]} : vector<32x32xf32> to vector<8x32xf32>
    %cst_69 = arith.constant dense<0.000000e+00> : vector<18x32xf32>
    %242 = tpu.matmul %240, %241, %cst_69 {dimension_numbers = #tpu.dot_dimension_numbers<[1], [0], [0], [1], [0, 0, 1, 1], [], []>} : vector<18x8xf32>, vector<8x32xf32>, vector<18x32xf32> -> vector<18x32xf32>
    %243 = arith.addf %224, %242 : vector<18x32xf32>
    %244 = vector.extract_strided_slice %223 {offsets = [0, 8], sizes = [18, 8], strides = [1, 1]} : vector<18x96xf32> to vector<18x8xf32>
    %245 = vector.extract_strided_slice %223 {offsets = [0, 40], sizes = [18, 8], strides = [1, 1]} : vector<18x96xf32> to vector<18x8xf32>
    %246 = vector.extract_strided_slice %223 {offsets = [0, 72], sizes = [18, 8], strides = [1, 1]} : vector<18x96xf32> to vector<18x8xf32>
    %cst_70 = arith.constant dense<0.000000e+00> : vector<18x18xf32>
    %247 = tpu.matmul %244, %245, %cst_70 {dimension_numbers = #tpu.dot_dimension_numbers<[1], [1], [0], [0], [0, 0, 1, 0], [], []>} : vector<18x8xf32>, vector<18x8xf32>, vector<18x18xf32> -> vector<18x18xf32>
    %248 = arith.addf %247, %3 : vector<18x18xf32>
    %cst_71 = arith.constant dense<0xFF800000> : vector<18xf32>
    %249 = vector.multi_reduction <maximumf>, %248, %cst_71 [1] : vector<18x18xf32> to vector<18xf32>
    %250 = vector.shape_cast %249 : vector<18xf32> to vector<18x1xf32>
    %251 = vector.broadcast %250 : vector<18x1xf32> to vector<18x18xf32>
    %252 = arith.subf %248, %251 : vector<18x18xf32>
    %253 = math.exp %252 : vector<18x18xf32>
    %cst_72 = arith.constant dense<0.000000e+00> : vector<18xf32>
    %254 = vector.multi_reduction <add>, %253, %cst_72 [1] : vector<18x18xf32> to vector<18xf32>
    %255 = vector.shape_cast %254 : vector<18xf32> to vector<18x1xf32>
    %256 = tpu.reciprocal %255 {approx = true} : vector<18x1xf32> -> vector<18x1xf32>
    %257 = vector.broadcast %256 : vector<18x1xf32> to vector<18x18xf32>
    %258 = arith.mulf %253, %257 : vector<18x18xf32>
    %cst_73 = arith.constant dense<0.000000e+00> : vector<18x8xf32>
    %259 = tpu.matmul %258, %246, %cst_73 {dimension_numbers = #tpu.dot_dimension_numbers<[1], [0], [0], [1], [0, 0, 1, 1], [], []>} : vector<18x18xf32>, vector<18x8xf32>, vector<18x8xf32> -> vector<18x8xf32>
    %260 = vector.extract_strided_slice %185 {offsets = [8, 0], sizes = [8, 32], strides = [1, 1]} : vector<32x32xf32> to vector<8x32xf32>
    %cst_74 = arith.constant dense<0.000000e+00> : vector<18x32xf32>
    %261 = tpu.matmul %259, %260, %cst_74 {dimension_numbers = #tpu.dot_dimension_numbers<[1], [0], [0], [1], [0, 0, 1, 1], [], []>} : vector<18x8xf32>, vector<8x32xf32>, vector<18x32xf32> -> vector<18x32xf32>
    %262 = arith.addf %243, %261 : vector<18x32xf32>
    %263 = vector.extract_strided_slice %223 {offsets = [0, 16], sizes = [18, 8], strides = [1, 1]} : vector<18x96xf32> to vector<18x8xf32>
    %264 = vector.extract_strided_slice %223 {offsets = [0, 48], sizes = [18, 8], strides = [1, 1]} : vector<18x96xf32> to vector<18x8xf32>
    %265 = vector.extract_strided_slice %223 {offsets = [0, 80], sizes = [18, 8], strides = [1, 1]} : vector<18x96xf32> to vector<18x8xf32>
    %cst_75 = arith.constant dense<0.000000e+00> : vector<18x18xf32>
    %266 = tpu.matmul %263, %264, %cst_75 {dimension_numbers = #tpu.dot_dimension_numbers<[1], [1], [0], [0], [0, 0, 1, 0], [], []>} : vector<18x8xf32>, vector<18x8xf32>, vector<18x18xf32> -> vector<18x18xf32>
    %267 = arith.addf %266, %3 : vector<18x18xf32>
    %cst_76 = arith.constant dense<0xFF800000> : vector<18xf32>
    %268 = vector.multi_reduction <maximumf>, %267, %cst_76 [1] : vector<18x18xf32> to vector<18xf32>
    %269 = vector.shape_cast %268 : vector<18xf32> to vector<18x1xf32>
    %270 = vector.broadcast %269 : vector<18x1xf32> to vector<18x18xf32>
    %271 = arith.subf %267, %270 : vector<18x18xf32>
    %272 = math.exp %271 : vector<18x18xf32>
    %cst_77 = arith.constant dense<0.000000e+00> : vector<18xf32>
    %273 = vector.multi_reduction <add>, %272, %cst_77 [1] : vector<18x18xf32> to vector<18xf32>
    %274 = vector.shape_cast %273 : vector<18xf32> to vector<18x1xf32>
    %275 = tpu.reciprocal %274 {approx = true} : vector<18x1xf32> -> vector<18x1xf32>
    %276 = vector.broadcast %275 : vector<18x1xf32> to vector<18x18xf32>
    %277 = arith.mulf %272, %276 : vector<18x18xf32>
    %cst_78 = arith.constant dense<0.000000e+00> : vector<18x8xf32>
    %278 = tpu.matmul %277, %265, %cst_78 {dimension_numbers = #tpu.dot_dimension_numbers<[1], [0], [0], [1], [0, 0, 1, 1], [], []>} : vector<18x18xf32>, vector<18x8xf32>, vector<18x8xf32> -> vector<18x8xf32>
    %279 = vector.extract_strided_slice %185 {offsets = [16, 0], sizes = [8, 32], strides = [1, 1]} : vector<32x32xf32> to vector<8x32xf32>
    %cst_79 = arith.constant dense<0.000000e+00> : vector<18x32xf32>
    %280 = tpu.matmul %278, %279, %cst_79 {dimension_numbers = #tpu.dot_dimension_numbers<[1], [0], [0], [1], [0, 0, 1, 1], [], []>} : vector<18x8xf32>, vector<8x32xf32>, vector<18x32xf32> -> vector<18x32xf32>
    %281 = arith.addf %262, %280 : vector<18x32xf32>
    %282 = vector.extract_strided_slice %223 {offsets = [0, 24], sizes = [18, 8], strides = [1, 1]} : vector<18x96xf32> to vector<18x8xf32>
    %283 = vector.extract_strided_slice %223 {offsets = [0, 56], sizes = [18, 8], strides = [1, 1]} : vector<18x96xf32> to vector<18x8xf32>
    %284 = vector.extract_strided_slice %223 {offsets = [0, 88], sizes = [18, 8], strides = [1, 1]} : vector<18x96xf32> to vector<18x8xf32>
    %cst_80 = arith.constant dense<0.000000e+00> : vector<18x18xf32>
    %285 = tpu.matmul %282, %283, %cst_80 {dimension_numbers = #tpu.dot_dimension_numbers<[1], [1], [0], [0], [0, 0, 1, 0], [], []>} : vector<18x8xf32>, vector<18x8xf32>, vector<18x18xf32> -> vector<18x18xf32>
    %286 = arith.addf %285, %3 : vector<18x18xf32>
    %cst_81 = arith.constant dense<0xFF800000> : vector<18xf32>
    %287 = vector.multi_reduction <maximumf>, %286, %cst_81 [1] : vector<18x18xf32> to vector<18xf32>
    %288 = vector.shape_cast %287 : vector<18xf32> to vector<18x1xf32>
    %289 = vector.broadcast %288 : vector<18x1xf32> to vector<18x18xf32>
    %290 = arith.subf %286, %289 : vector<18x18xf32>
    %291 = math.exp %290 : vector<18x18xf32>
    %cst_82 = arith.constant dense<0.000000e+00> : vector<18xf32>
    %292 = vector.multi_reduction <add>, %291, %cst_82 [1] : vector<18x18xf32> to vector<18xf32>
    %293 = vector.shape_cast %292 : vector<18xf32> to vector<18x1xf32>
    %294 = tpu.reciprocal %293 {approx = true} : vector<18x1xf32> -> vector<18x1xf32>
    %295 = vector.broadcast %294 : vector<18x1xf32> to vector<18x18xf32>
    %296 = arith.mulf %291, %295 : vector<18x18xf32>
    %cst_83 = arith.constant dense<0.000000e+00> : vector<18x8xf32>
    %297 = tpu.matmul %296, %284, %cst_83 {dimension_numbers = #tpu.dot_dimension_numbers<[1], [0], [0], [1], [0, 0, 1, 1], [], []>} : vector<18x18xf32>, vector<18x8xf32>, vector<18x8xf32> -> vector<18x8xf32>
    %298 = vector.extract_strided_slice %185 {offsets = [24, 0], sizes = [8, 32], strides = [1, 1]} : vector<32x32xf32> to vector<8x32xf32>
    %cst_84 = arith.constant dense<0.000000e+00> : vector<18x32xf32>
    %299 = tpu.matmul %297, %298, %cst_84 {dimension_numbers = #tpu.dot_dimension_numbers<[1], [0], [0], [1], [0, 0, 1, 1], [], []>} : vector<18x8xf32>, vector<8x32xf32>, vector<18x32xf32> -> vector<18x32xf32>
    %300 = arith.addf %281, %299 : vector<18x32xf32>
    %301 = arith.addf %181, %300 : vector<18x32xf32>
    %302 = vector.broadcast %194 : vector<1x32xf32> to vector<18x32xf32>
    %303 = arith.addf %301, %302 : vector<18x32xf32>
    %cst_85 = arith.constant dense<0.000000e+00> : vector<18xf32>
    %304 = vector.multi_reduction <add>, %303, %cst_85 [1] : vector<18x32xf32> to vector<18xf32>
    %305 = vector.shape_cast %304 : vector<18xf32> to vector<18x1xf32>
    %cst_86 = arith.constant 3.200000e+01 : f32
    %306 = vector.broadcast %cst_86 : f32 to vector<18x1xf32>
    %307 = arith.divf %305, %306 : vector<18x1xf32>
    %308 = vector.broadcast %307 : vector<18x1xf32> to vector<18x32xf32>
    %309 = arith.subf %303, %308 : vector<18x32xf32>
    %310 = arith.mulf %309, %309 : vector<18x32xf32>
    %cst_87 = arith.constant dense<0.000000e+00> : vector<18xf32>
    %311 = vector.multi_reduction <add>, %310, %cst_87 [1] : vector<18x32xf32> to vector<18xf32>
    %312 = vector.shape_cast %311 : vector<18xf32> to vector<18x1xf32>
    %cst_88 = arith.constant 3.200000e+01 : f32
    %313 = vector.broadcast %cst_88 : f32 to vector<18x1xf32>
    %314 = arith.divf %312, %313 : vector<18x1xf32>
    %315 = vector.broadcast %307 : vector<18x1xf32> to vector<18x32xf32>
    %316 = arith.subf %303, %315 : vector<18x32xf32>
    %cst_89 = arith.constant 9.99999974E-6 : f32
    %317 = vector.broadcast %cst_89 : f32 to vector<18x1xf32>
    %318 = arith.addf %314, %317 : vector<18x1xf32>
    %319 = math.rsqrt %318 : vector<18x1xf32>
    %320 = vector.broadcast %319 : vector<18x1xf32> to vector<18x32xf32>
    %321 = arith.mulf %316, %320 : vector<18x32xf32>
    %322 = vector.broadcast %195 : vector<1x32xf32> to vector<18x32xf32>
    %323 = arith.mulf %321, %322 : vector<18x32xf32>
    %324 = vector.broadcast %196 : vector<1x32xf32> to vector<18x32xf32>
    %325 = arith.addf %323, %324 : vector<18x32xf32>
    %cst_90 = arith.constant dense<0.000000e+00> : vector<18x128xf32>
    %326 = tpu.matmul %325, %186, %cst_90 {dimension_numbers = #tpu.dot_dimension_numbers<[1], [0], [0], [1], [0, 0, 1, 1], [], []>} : vector<18x32xf32>, vector<32x128xf32>, vector<18x128xf32> -> vector<18x128xf32>
    %327 = vector.broadcast %197 : vector<1x128xf32> to vector<18x128xf32>
    %328 = arith.addf %326, %327 : vector<18x128xf32>
    %cst_91 = arith.constant 5.000000e-01 : f32
    %329 = vector.broadcast %cst_91 : f32 to vector<18x128xf32>
    %330 = arith.mulf %329, %328 : vector<18x128xf32>
    %cst_92 = arith.constant 4.471500e-02 : f32
    %331 = vector.broadcast %cst_92 : f32 to vector<18x128xf32>
    %332 = arith.mulf %331, %328 : vector<18x128xf32>
    %333 = arith.mulf %332, %328 : vector<18x128xf32>
    %334 = arith.mulf %333, %328 : vector<18x128xf32>
    %335 = arith.addf %328, %334 : vector<18x128xf32>
    %cst_93 = arith.constant 0.797884583 : f32
    %336 = vector.broadcast %cst_93 : f32 to vector<18x128xf32>
    %337 = arith.mulf %336, %335 : vector<18x128xf32>
    %338 = math.tanh %337 : vector<18x128xf32>
    %cst_94 = arith.constant 1.000000e+00 : f32
    %339 = vector.broadcast %cst_94 : f32 to vector<18x128xf32>
    %340 = arith.addf %339, %338 : vector<18x128xf32>
    %341 = arith.mulf %330, %340 : vector<18x128xf32>
    %cst_95 = arith.constant dense<0.000000e+00> : vector<18x32xf32>
    %342 = tpu.matmul %341, %188, %cst_95 {dimension_numbers = #tpu.dot_dimension_numbers<[1], [0], [0], [1], [0, 0, 1, 1], [], []>} : vector<18x128xf32>, vector<128x32xf32>, vector<18x32xf32> -> vector<18x32xf32>
    %343 = vector.broadcast %198 : vector<1x32xf32> to vector<18x32xf32>
    %344 = arith.addf %342, %343 : vector<18x32xf32>
    %345 = arith.addf %303, %344 : vector<18x32xf32>
    %cst_96 = arith.constant dense<0.000000e+00> : vector<18xf32>
    %346 = vector.multi_reduction <add>, %345, %cst_96 [1] : vector<18x32xf32> to vector<18xf32>
    %347 = vector.shape_cast %346 : vector<18xf32> to vector<18x1xf32>
    %cst_97 = arith.constant 3.200000e+01 : f32
    %348 = vector.broadcast %cst_97 : f32 to vector<18x1xf32>
    %349 = arith.divf %347, %348 : vector<18x1xf32>
    %350 = vector.broadcast %349 : vector<18x1xf32> to vector<18x32xf32>
    %351 = arith.subf %345, %350 : vector<18x32xf32>
    %352 = arith.mulf %351, %351 : vector<18x32xf32>
    %cst_98 = arith.constant dense<0.000000e+00> : vector<18xf32>
    %353 = vector.multi_reduction <add>, %352, %cst_98 [1] : vector<18x32xf32> to vector<18xf32>
    %354 = vector.shape_cast %353 : vector<18xf32> to vector<18x1xf32>
    %cst_99 = arith.constant 3.200000e+01 : f32
    %355 = vector.broadcast %cst_99 : f32 to vector<18x1xf32>
    %356 = arith.divf %354, %355 : vector<18x1xf32>
    %357 = vector.broadcast %349 : vector<18x1xf32> to vector<18x32xf32>
    %358 = arith.subf %345, %357 : vector<18x32xf32>
    %cst_100 = arith.constant 9.99999974E-6 : f32
    %359 = vector.broadcast %cst_100 : f32 to vector<18x1xf32>
    %360 = arith.addf %356, %359 : vector<18x1xf32>
    %361 = math.rsqrt %360 : vector<18x1xf32>
    %362 = vector.broadcast %361 : vector<18x1xf32> to vector<18x32xf32>
    %363 = arith.mulf %358, %362 : vector<18x32xf32>
    %364 = vector.broadcast %6 : vector<1x32xf32> to vector<18x32xf32>
    %365 = arith.mulf %363, %364 : vector<18x32xf32>
    %366 = vector.broadcast %7 : vector<1x32xf32> to vector<18x32xf32>
    %367 = arith.addf %365, %366 : vector<18x32xf32>
    %cst_101 = arith.constant dense<0.000000e+00> : vector<18x16xf32>
    %368 = tpu.matmul %367, %10, %cst_101 {dimension_numbers = #tpu.dot_dimension_numbers<[1], [0], [0], [1], [0, 0, 1, 1], [], []>} : vector<18x32xf32>, vector<32x16xf32>, vector<18x16xf32> -> vector<18x16xf32>
    %369 = vector.broadcast %8 : vector<1x16xf32> to vector<18x16xf32>
    %370 = arith.addf %368, %369 : vector<18x16xf32>
    %c0_102 = arith.constant 0 : index
    %c0_103 = arith.constant 0 : index
    %371 = vector.load %arg5[%c0_102, %c0_103] : memref<18x16xf32, #tpu.memory_space<vmem>>, vector<18x16xf32>
    tpu.vector_store %arg5[%c0_102, %c0_103], %370 {strides = array<i32>} : memref<18x16xf32, #tpu.memory_space<vmem>>, vector<18x16xf32>,
    return
  }
}

</mosaic_0001>

<bundles_post_ra>
// kernel: tpu_custom_call.1
= control target key start
LH: loop header
LB: loop body
LE: loop exit
PB: predicated region body
PF: predicated region fallthrough
CT: control target
= control target key end

     0   :  { %v5076_v0 = vmov 0.0|0.0   ;;  %vm5077_vm0 = vmmov 0   ;;  %v5078_v3 = vmov 0.0   ;;  %v5079_v7 = vmov 16   ;;  %s5080_s20 = smov 96   ;;  %s5081_s21 = smov 88   ;;  %s6208_s1 = inlined_call_operand.vmem [shape: f32[74,32], index: 1, kind: input, shape index: {}]   ;;  %s6209_s0 = inlined_call_operand.vmem [shape: f32[18,35], index: 0, kind: input, shape index: {}]   ;;  %s6210_s2 = inlined_call_operand.vmem [shape: f32[2,32,256], index: 2, kind: input, shape index: {}]   ;;  %s6211_s4 = inlined_call_operand.vmem [shape: f32[2,8,128], index: 4, kind: input, shape index: {}]   ;;  %s6212_s3 = inlined_call_operand.vmem [shape: f32[2,128,32], index: 3, kind: input, shape index: {}]   ;;  %s6213_s5 = inlined_call_operand.vmem [shape: f32[18,16], index: 5, kind: output, shape index: {}]  }
   0x1   :  { %4699 = vmatprep.subr.bf16.mxu0 %v5076_v0  ;;  %v24_v1 = vld [vmem:[%s6208_s1 + $0x8] sm:$0xff]  ;;  %v25_v2 = vld [vmem:[%s6208_s1 + $0x10] sm:$0xff]  ;;  %4195 = vmatprep.mubr.msk.f32.mxu0 %vm5077_vm0, %v5078_v3  ;;  %v5135_v5 = vld [vmem:[%s6209_s0] sm:$0xff]  ;;  %vm55_vm1 = vcmask 130048   ;;  %v48_v9 = vlaneseq  ;;  %vm170_vm2 = vcmask 261120   ;;  %vm177_vm3 = vcmask 254976  }
   0x2   :  { %v4700_v4 = vpack.c.bf16 %v25_v2, %v24_v1  ;;  %v5140_v6 = vld [vmem:[%s6209_s0 + $0x10] sm:$0x3]  ;;  %4853 = vset.pattern.permute.xlu0 %v5079_v7  ;;  %4854 = vset.pattern.permute.xlu1 %v5079_v7  ;;  %v5151_v8 = vld [vmem:[%s6209_s0 + $0x8] sm:$0xff]  ;;  %v23_v12 = vld [vmem:[%s6208_s1] sm:$0xff]  ;;  %s5082_s22 = smov 120   ;;  %s5083_s23 = smov 111  }
   0x3   :  { %35 = vperm.xlu0 %4853, %v5135_v5   ;;  %45 = vperm.xlu1 %4854, %v5140_v6   ;;  %v5166_v10 = vshrl.u32 %v48_v9, 7  ;;  %v30_v17 = vld [vmem:[%s6208_s1 + $0x38] sm:$0xff]  ;;  %v31_v24 = vld [vmem:[%s6208_s1 + $0x40] sm:$0xff]  ;;  %v32_v31 = vld [vmem:[%s6208_s1 + $0x48] sm:$0x3]  ;;  %vm337_vm4 = vcmask 64512  }
   0x4   :  { %4701 = vmatpush3.bf16.msra.mxu0 %v4700_v4  ;;  %4702 = vmatprep.subr.bf16.mxu1 %v5076_v0  ;;  %v5205_v53 = vld [vmem:[%s6210_s2] sm:$0xff]  ;;  %v5210_v54 = vld [vmem:[%s6210_s2 + $0x10] sm:$0xff]  ;;  %vm5283_vm5 = vmpackc.low %vm337_vm4, %vm337_vm4  ;;  %vm430_vm6 = vcmask 146432   ;;  %vm437_vm7 = vcmask 140288   ;;  %s5084_s24 = smov 64   ;;  %s5085_s25 = smov 56  }
   0x5   :  { %4212 = vmatprep.mubr.msk.f32.mxu1 %vm5077_vm0, %v5078_v3  ;;  %4715 = vmatprep.subr.bf16.mxu0 %v5076_v0  ;;  %v5169_v11 = vsub.s32 0, %v5166_v10  ;;  %v4703_v55 = vpack.c.bf16 %v5210_v54, %v5205_v53  ;;  %v5217_v56 = vld [vmem:[%s6210_s2 + $0x20] sm:$0xff]  ;;  %v5222_v57 = vld [vmem:[%s6210_s2 + $0x30] sm:$0xff]  ;;  %s5086_s26 = smov 32   ;;  %s5087_s27 = smov 80   ;;  %vm482_vm8 = vcmask 1041408  }
   0x6   :  { %v4706_v58 = vpack.c.bf16 %v5222_v57, %v5217_v56  ;;  %v5231_v9 = vld [vmem:[%s6211_s4] sm:$0xff]  ;;  %s5088_s0 = smov 112   ;;  %s5089_s28 = smov 48   ;;  %vm3832_vm9 = vcmask 123904  }
   0x7   :  { %4196 = vmatmul.mubr.msk.f32.vlgmr.msra.gmra.mrb[0].mxu0 %vm55_vm1, %v5135_v5  ;;  %40 = vperm.xlu0 %4853, %v5151_v8   ;;  %v51_v13 = vrot.slane %v23_v12, %v5169_v11  ;;  %v5234_v12 = vsub.s32 1, %v5166_v10  ;;  %s5090_s29 = smov 72   ;;  %s5091_s30 = smov 104  }
   0x8   :  { %4198 = vmatprep.mubr.msk.f32.mxu0 %vm5077_vm0, %v5078_v3  ;;  %4704 = vmatpush3.bf16.msra.mxu1 %v4703_v55  ;;  %s5092_s6 = smov 40  }
   0x9   :  { %4705 = vmatprep.subr.bf16.mxu1 %v5076_v0 }
   0xb   :  { %4199 = vmatmul.mubr.msk.f32.gmra.mrb[2].mxu0 %vm55_vm1, %v5151_v8 }
   0xc   :  { %4201 = vmatprep.mubr.msk.f32.mxu0 %vm5077_vm0, %v5078_v3  ;;  %4707 = vmatpush3.bf16.msra.mxu1 %v4706_v58 }
   0xd   :  { %4708 = vmatprep.subr.bf16.mxu1 %v5076_v0 }
   0xf   :  { %4202 = vmatmul.mubr.msk.f32.gmra.mrb[4].mxu0 %vm55_vm1, %v5140_v6 }
  0x10   :  { %4257 = vmatprep.mubr.msk.f32.mxu0 %vm5077_vm0, %v5078_v3 }
  0x82   :  { %v36_v14 = vpop.permute.xlu0 %35  ;;  %v46_v21 = vpop.permute.xlu1 %45 }
  0x83   :  { %v52_v15 = vmul.f32 %v51_v13, %v36_v14  ;;  %v54_v28 = vmul.f32 %v51_v13, %v46_v21 }
  0x86   :  { %v41_v16 = vpop.permute.xlu0 %40 }
  0x87   :  { %v53_v22 = vmul.f32 %v51_v13, %v41_v16  ;;  %v215_v13 = vrot.slane %v5231_v9, %v5169_v11  ;;  %v222_v16 = vrot.slane %v5231_v9, %v5234_v12 }
  0xda   :  { %v128_v18 = vpop.f32.mrb[0].mxu0 }
  0xdb   :  { %v129_v19 = vadd.f32 %v128_v18, %v52_v15  ;;  %v4197_v20 = vpop.f32.mrb[1].mxu0 }
  0xdd   :  { %v5178_v23 = vadd.f32 %v129_v19, %v30_v17 }
  0xde   :  { %v133_v25 = vpop.f32.mrb[2].mxu0 }
  0xdf   :  { %v134_v26 = vadd.f32 %v133_v25, %v53_v22  ;;  %v4200_v27 = vpop.f32.mrb[3].mxu0  ;;  %v171_v29 = vsel %vm170_vm2, %v5178_v23, 0.0 }
  0xe0   :  { %172 = vadd.xlane.f32.xlu1 %v171_v29 }
  0xe1   :  { %v5185_v30 = vadd.f32 %v134_v26, %v31_v24 }
  0xe2   :  { %v138_v32 = vpop.f32.mrb[4].mxu0 }
  0xe3   :  { %v139_v33 = vadd.f32 %v138_v32, %v54_v28  ;;  %v174_v34 = vsel %vm170_vm2, %v5185_v30, 0.0  ;;  %v4203_v35 = vpop.f32.mrb[5].mxu0  ;;  %v5250_v28 = vsub.s32 2, %v5166_v10 }
  0xe4   :  { %175 = vadd.xlane.f32.xlu0 %v174_v34 }
  0xe5   :  { %v5192_v36 = vadd.f32 %v139_v33, %v32_v31  ;;  %v229_v31 = vrot.slane %v5231_v9, %v5250_v28 }
  0xe7   :  { %v178_v37 = vsel %vm177_vm3, %v5192_v36, 0.0 }
  0xe8   :  { %179 = vadd.xlane.f32.xlu0 %v178_v37 }
 0x16d   :  { %v173_v38 = vpop.xlane.xlu1 %172 }
 0x16e   :  { %v182_v39 = vmul.f32 0.03125, %v173_v38 }
 0x170   :  { %v185_v40 = vsub.f32 %v5178_v23, %v182_v39 }
 0x171   :  { %v176_v41 = vpop.xlane.xlu0 %175 }
 0x172   :  { %v183_v42 = vmul.f32 0.03125, %v176_v41  ;;  %v188_v43 = vmul.f32 %v185_v40, %v185_v40 }
 0x174   :  { %v186_v44 = vsub.f32 %v5185_v30, %v183_v42  ;;  %v191_v45 = vsel %vm170_vm2, %v188_v43, 0.0 }
 0x175   :  { %192 = vadd.xlane.f32.xlu1 %v191_v45  ;;  %v180_v46 = vpop.xlane.xlu0 %179 }
 0x176   :  { %v184_v47 = vmul.f32 0.03125, %v180_v46  ;;  %v189_v48 = vmul.f32 %v186_v44, %v186_v44 }
 0x178   :  { %v187_v49 = vsub.f32 %v5192_v36, %v184_v47  ;;  %v194_v50 = vsel %vm170_vm2, %v189_v48, 0.0 }
 0x179   :  { %195 = vadd.xlane.f32.xlu0 %v194_v50 }
 0x17a   :  { %v190_v51 = vmul.f32 %v187_v49, %v187_v49 }
 0x17c   :  { %v197_v52 = vsel %vm177_vm3, %v190_v51, 0.0 }
 0x17d   :  { %198 = vadd.xlane.f32.xlu1 %v197_v52 }
 0x202   :  { %v193_v59 = vpop.xlane.xlu1 %192 }
 0x203   :  { %v200_v60 = vmul.f32 0.03125, %v193_v59 }
 0x205   :  { %v203_v61 = vadd.f32 1e-05, %v200_v60 }
 0x206   :  { %v196_v62 = vpop.xlane.xlu0 %195 }
 0x207   :  { %4935 = vrsqrt.f32 %v203_v61  ;;  %v201_v63 = vmul.f32 0.03125, %v196_v62 }
 0x209   :  { %v204_v1 = vadd.f32 1e-05, %v201_v63 }
 0x20a   :  { %v199_v2 = vpop.xlane.xlu1 %198 }
 0x20b   :  { %4937 = vrsqrt.f32 %v204_v1  ;;  %v202_v4 = vmul.f32 0.03125, %v199_v2 }
 0x20d   :  { %v205_v7 = vadd.f32 1e-05, %v202_v4 }
 0x20f   :  { %4939 = vrsqrt.f32 %v205_v7 }
 0x211   :  { %v4936_v14 = vpop.eup %4935 }
 0x212   :  { %v209_v15 = vmul.f32 %v4936_v14, %v185_v40 }
 0x214   :  { %v216_v17 = vmul.f32 %v215_v13, %v209_v15 }
 0x215   :  { %v4938_v18 = vpop.eup %4937 }
 0x216   :  { %v223_v19 = vadd.f32 %v222_v16, %v216_v17  ;;  %v210_v20 = vmul.f32 %v4938_v18, %v186_v44 }
 0x218   :  { %4213 = vmatmul.mubr.msk.f32.vlgmr.msra.gmra.mrb[0].mxu1 %vm170_vm2, %v223_v19  ;;  %v217_v21 = vmul.f32 %v215_v13, %v210_v20 }
 0x219   :  { %v4940_v22 = vpop.eup %4939  ;;  %4215 = vmatprep.mubr.msk.f32.mxu1 %vm5077_vm0, %v5078_v3 }
 0x21a   :  { %v224_v24 = vadd.f32 %v222_v16, %v217_v21  ;;  %v211_v25 = vmul.f32 %v4940_v22, %v187_v49 }
 0x21c   :  { %4216 = vmatmul.mubr.msk.f32.gmra.mrb[2].mxu1 %vm170_vm2, %v224_v24  ;;  %v218_v26 = vmul.f32 %v215_v13, %v211_v25 }
 0x21d   :  { %4218 = vmatprep.mubr.msk.f32.mxu1 %vm5077_vm0, %v5078_v3 }
 0x21e   :  { %v225_v27 = vadd.f32 %v222_v16, %v218_v26 }
 0x220   :  { %4219 = vmatmul.mubr.msk.f32.gmra.mrb[4].mxu1 %vm170_vm2, %v225_v27 }
 0x221   :  { %4227 = vmatprep.mubr.msk.f32.mxu1 %vm5077_vm0, %v5078_v3 }
 0x2eb   :  { %v305_v29 = vpop.f32.mrb[0].mxu1 }
 0x2ec   :  { %v4214_v32 = vpop.f32.mrb[1].mxu1  ;;  %v5254_v34 = vadd.f32 %v305_v29, %v229_v31 }
 0x2ef   :  { %v310_v33 = vpop.f32.mrb[2].mxu1 }
 0x2f0   :  { %v5256_v35 = vadd.f32 %v310_v33, %v229_v31  ;;  %v4217_v37 = vpop.f32.mrb[3].mxu1 }
 0x2f2   :  { %v5260_v38 = vpack.i.bf16 %v5256_v35, %v5254_v34 }
 0x2f3   :  { %v315_v39 = vpop.f32.mrb[4].mxu1 }
 0x2f4   :  { %v5262_v40 = vadd.f32 %v315_v39, %v229_v31  ;;  %4856 = vrot.lane.b32.xlu0 %v5260_v38, %s5080_s20  ;;  %v4220_v41 = vpop.f32.mrb[5].mxu1 }
 0x2f6   :  { %326 = vrot.lane.b32.xlu1 %v5262_v40, %s5080_s20 }
 0x2f8   :  { %575 = vrot.lane.b32.xlu0 %v5262_v40, %s5081_s21 }
 0x2fa   :  { %4861 = vrot.lane.b32.xlu1 %v5260_v38, %s5081_s21 }
 0x2fc   :  { %567 = vrot.lane.b32.xlu0 %v5256_v35, %s5082_s22 }
 0x2fe   :  { %565 = vrot.lane.b32.xlu1 %v5254_v34, %s5082_s22 }
 0x300   :  { %328 = vrot.lane.b32.xlu0 %v5135_v5, %s5083_s23 }
 0x302   :  { %569 = vrot.lane.b32.xlu1 %v5262_v40, %s5082_s22 }
 0x304   :  { %332 = vrot.lane.b32.xlu0 %v5140_v6, %s5083_s23 }
 0x306   :  { %330 = vrot.lane.b32.xlu1 %v5151_v8, %s5083_s23 }
 0x366   :  { %v4857_v42 = vpop.permute.xlu0 %4856 }
 0x367   :  { %v4859_v43 = vunpack.i.h.bf16 %v4857_v42  ;;  %v4858_v44 = vunpack.i.l.bf16 %v4857_v42 }
 0x368   :  { %v327_v45 = vpop.permute.xlu1 %326 }
 0x369   :  { %v4709_v47 = vpack.c.bf16 %v4859_v43, %v4858_v44 }
 0x36a   :  { %v576_v49 = vpop.permute.xlu0 %575 }
 0x36b   :  { %4711 = vmatpush3.bf16.xpose.msk.msra.mxu1 %vm5283_vm5, %v4709_v47 }
 0x36c   :  { %v4862_v5 = vpop.permute.xlu1 %4861  ;;  %4225 = vmatprep.subr.mxu1 %v5078_v3 }
 0x36d   :  { %v4864_v8 = vunpack.i.h.bf16 %v4862_v5  ;;  %v4863_v6 = vunpack.i.l.bf16 %v4862_v5 }
 0x36e   :  { %v568_v51 = vpop.permute.xlu0 %567 }
 0x36f   :  { %v4716_v48 = vpack.c.bf16 %v4864_v8, %v4863_v6 }
 0x370   :  { %v566_v50 = vpop.permute.xlu1 %565 }
 0x371   :  { %4718 = vmatpush3.bf16.xpose.msk.msra.mxu0 %vm5283_vm5, %v4716_v48 }
 0x372   :  { %4255 = vmatprep.subr.mxu0 %v5078_v3  ;;  %v5318_v55 = vpop.permute.xlu0 %328 }
 0x373   :  { %4226 = vmatpush3.xpose.msk.msra.mxu1 %vm337_vm4, %v327_v45 }
 0x374   :  { %4712 = vmatprep.subr.bf16.mxu1 %v5076_v0  ;;  %v570_v52 = vpop.permute.xlu1 %569 }
 0x376   :  { %4228 = vmatmul.mubr.msk.f32.vlgmr.msra.gmra.mrb[6].mxu1 %vm337_vm4, %v5254_v34  ;;  %v5325_v7 = vpop.permute.xlu0 %332 }
 0x377   :  { %4230 = vmatprep.mubr.msk.f32.mxu1 %vm5077_vm0, %v5078_v3 }
 0x378   :  { %v5321_v61 = vpop.permute.xlu1 %330 }
 0x379   :  { %4256 = vmatpush3.xpose.msk.msra.mxu0 %vm337_vm4, %v576_v49 }
 0x37a   :  { %4231 = vmatmul.mubr.msk.f32.gmra.mrb[8].mxu1 %vm337_vm4, %v5256_v35  ;;  %4281 = vmatprep.subr.mxu0 %v5078_v3 }
 0x37b   :  { %4233 = vmatprep.mubr.msk.f32.mxu1 %vm5077_vm0, %v5078_v3 }
 0x37c   :  { %4258 = vmatmul.mubr.msk.f32.vlgmr.msra.gmra.mrb[6].mxu0 %vm337_vm4, %v566_v50 }
 0x37d   :  { %4260 = vmatprep.mubr.msk.f32.mxu0 %vm5077_vm0, %v5078_v3 }
 0x37e   :  { %4234 = vmatmul.mubr.msk.f32.gmra.mrb[10].mxu1 %vm337_vm4, %v5262_v40 }
 0x37f   :  { %4242 = vmatprep.mubr.msk.f32.mxu1 %vm5077_vm0, %v5078_v3 }
 0x380   :  { %4261 = vmatmul.mubr.msk.f32.gmra.mrb[8].mxu0 %vm337_vm4, %v568_v51 }
 0x381   :  { %4263 = vmatprep.mubr.msk.f32.mxu0 %vm5077_vm0, %v5078_v3 }
 0x384   :  { %4264 = vmatmul.mubr.msk.f32.gmra.mrb[10].mxu0 %vm337_vm4, %v570_v52 }
 0x385   :  { %4283 = vmatprep.mubr.msk.f32.mxu0 %vm5077_vm0, %v5078_v3 }
 0x449   :  { %v416_v58 = vpop.f32.mrb[6].mxu1 }
 0x44a   :  { %v417_v59 = vadd.f32 %v416_v58, %v5318_v55  ;;  %v4229_v60 = vpop.f32.mrb[7].mxu1 }
 0x44c   :  { %v431_v62 = vsel %vm430_vm6, %v417_v59, -inf }
 0x44d   :  { %432 = vmax.xlane.f32.xlu1 %v431_v62  ;;  %v421_v63 = vpop.f32.mrb[8].mxu1 }
 0x44e   :  { %v422_v1 = vadd.f32 %v421_v63, %v5321_v61  ;;  %v4232_v2 = vpop.f32.mrb[9].mxu1 }
 0x44f   :  { %v655_v4 = vpop.f32.mrb[6].mxu0 }
 0x450   :  { %v656_v13 = vadd.f32 %v655_v4, %v5318_v55  ;;  %v4259_v14 = vpop.f32.mrb[7].mxu0  ;;  %v434_v15 = vsel %vm430_vm6, %v422_v1, -inf }
 0x451   :  { %435 = vmax.xlane.f32.xlu0 %v434_v15  ;;  %v426_v16 = vpop.f32.mrb[10].mxu1 }
 0x452   :  { %v427_v17 = vadd.f32 %v426_v16, %v5325_v7  ;;  %v4235_v18 = vpop.f32.mrb[11].mxu1  ;;  %v669_v19 = vsel %vm430_vm6, %v656_v13, -inf }
 0x453   :  { %670 = vmax.xlane.f32.xlu1 %v669_v19  ;;  %v660_v20 = vpop.f32.mrb[8].mxu0 }
 0x454   :  { %v661_v21 = vadd.f32 %v660_v20, %v5321_v61  ;;  %v4262_v22 = vpop.f32.mrb[9].mxu0  ;;  %v438_v24 = vsel %vm437_vm7, %v427_v17, -inf }
 0x455   :  { %439 = vmax.xlane.f32.xlu0 %v438_v24 }
 0x456   :  { %v672_v29 = vsel %vm430_vm6, %v661_v21, -inf }
 0x457   :  { %v665_v25 = vpop.f32.mrb[10].mxu0 }
 0x458   :  { %v666_v26 = vadd.f32 %v665_v25, %v5325_v7  ;;  %v4265_v27 = vpop.f32.mrb[11].mxu0 }
 0x459   :  { %673 = vmax.xlane.f32.xlu0 %v672_v29 }
 0x45a   :  { %v675_v31 = vsel %vm437_vm7, %v666_v26, -inf }
 0x45b   :  { %676 = vmax.xlane.f32.xlu1 %v675_v31 }
 0x46c   :  { %4866 = vrot.lane.b32.xlu1 %v5260_v38, %s5084_s24 }
 0x4da   :  { %v433_v32 = vpop.xlane.xlu1 %432 }
 0x4db   :  { %v441_v33 = vsub.f32 %v417_v59, %v433_v32 }
 0x4dd   :  { %v444_v37 = vmul.f32 1.442695, %v441_v33 }
 0x4de   :  { %v436_v39 = vpop.xlane.xlu0 %435 }
 0x4df   :  { %4941 = vpow2.f32 %v444_v37  ;;  %v442_v41 = vsub.f32 %v422_v1, %v436_v39 }
 0x4e0   :  { %v671_v42 = vpop.xlane.xlu1 %670 }
 0x4e1   :  { %v678_v43 = vsub.f32 %v656_v13, %v671_v42  ;;  %v446_v45 = vmul.f32 1.442695, %v442_v41 }
 0x4e2   :  { %v440_v44 = vpop.xlane.xlu0 %439 }
 0x4e3   :  { %v681_v47 = vmul.f32 1.442695, %v678_v43  ;;  %v443_v5 = vsub.f32 %v427_v17, %v440_v44 }
 0x4e5   :  { %4943 = vpow2.f32 %v681_v47  ;;  %v448_v50 = vmul.f32 1.442695, %v443_v5 }
 0x4e6   :  { %v674_v8 = vpop.xlane.xlu0 %673  ;;  %4945 = vpow2.f32 %v446_v45 }
 0x4e7   :  { %v679_v6 = vsub.f32 %v661_v21, %v674_v8 }
 0x4e8   :  { %v677_v48 = vpop.xlane.xlu1 %676 }
 0x4e9   :  { %v4942_v49 = vpop.eup %4941  ;;  %v683_v51 = vmul.f32 1.442695, %v679_v6  ;;  %v680_v52 = vsub.f32 %v666_v26, %v677_v48 }
 0x4ea   :  { %v450_v58 = vsel %vm430_vm6, %v4942_v49, 0.0 }
 0x4eb   :  { %4947 = vpow2.f32 %v683_v51  ;;  %451 = vadd.xlane.f32.xlu0 %v450_v58  ;;  %v685_v60 = vmul.f32 1.442695, %v680_v52 }
 0x4ec   :  { %v4867_v59 = vpop.permute.xlu1 %4866  ;;  %4949 = vpow2.f32 %v448_v50 }
 0x4ed   :  { %v4869_v62 = vunpack.i.h.bf16 %v4867_v59  ;;  %v4868_v63 = vunpack.i.l.bf16 %v4867_v59  ;;  %4951 = vpow2.f32 %v685_v60 }
 0x4ef   :  { %v5339_v1 = vpop.eup %4943  ;;  %v4713_v2 = vpack.c.bf16 %v4869_v62, %v4868_v63 }
 0x4f0   :  { %v687_v4 = vsel %vm430_vm6, %v5339_v1, 0.0  ;;  %v4946_v13 = vpop.eup %4945 }
 0x4f1   :  { %688 = vadd.xlane.f32.xlu1 %v687_v4  ;;  %4714 = vmatpush3.bf16.msra.mxu1 %v4713_v2  ;;  %v453_v14 = vsel %vm430_vm6, %v4946_v13, 0.0 }
 0x4f2   :  { %4240 = vmatprep.subr.mxu1 %v5078_v3 }
 0x4f5   :  { %v5345_v15 = vpop.eup %4947  ;;  %454 = vadd.xlane.f32.xlu1 %v453_v14 }
 0x4f6   :  { %v690_v16 = vsel %vm430_vm6, %v5345_v15, 0.0  ;;  %v4950_v17 = vpop.eup %4949 }
 0x4f7   :  { %691 = vadd.xlane.f32.xlu0 %v690_v16  ;;  %v456_v18 = vsel %vm437_vm7, %v4950_v17, 0.0  ;;  %v5350_v19 = vpop.eup %4951 }
 0x4f8   :  { %v693_v20 = vsel %vm437_vm7, %v5350_v19, 0.0 }
 0x4fb   :  { %457 = vadd.xlane.f32.xlu0 %v456_v18 }
 0x4ff   :  { %694 = vadd.xlane.f32.xlu0 %v693_v20 }
 0x506   :  { %4871 = vrot.lane.b32.xlu1 %v5260_v38, %s5085_s25 }
 0x50a   :  { %706 = vrot.lane.b32.xlu1 %v5262_v40, %s5085_s25 }
 0x50e   :  { %802 = vrot.lane.b32.xlu1 %v5210_v54, %s5086_s26 }
 0x512   :  { %997 = vrot.lane.b32.xlu1 %v5262_v40, %s5087_s27 }
 0x515   :  { %469 = vrot.lane.b32.xlu0 %v5262_v40, %s5084_s24 }
 0x516   :  { %989 = vrot.lane.b32.xlu1 %v5256_v35, %s5088_s0 }
 0x519   :  { %4876 = vrot.lane.b32.xlu0 %v5260_v38, %s5087_s27 }
 0x51d   :  { %987 = vrot.lane.b32.xlu0 %v5254_v34, %s5088_s0 }
 0x521   :  { %991 = vrot.lane.b32.xlu0 %v5262_v40, %s5088_s0 }
 0x578   :  { %v452_v21 = vpop.xlane.xlu0 %451 }
 0x579   :  { %4953 = vrcp.f32 %v452_v21 }
 0x57e   :  { %v689_v54 = vpop.xlane.xlu1 %688 }
 0x582   :  { %v455_v22 = vpop.xlane.xlu1 %454 }
 0x583   :  { %4955 = vrcp.f32 %v455_v22  ;;  %v4954_v31 = vpop.eup %4953 }
 0x584   :  { %v692_v24 = vpop.xlane.xlu0 %691  ;;  %v462_v39 = vmul.f32 %v4954_v31, %v4942_v49 }
 0x586   :  { %v4872_v25 = vpop.permute.xlu1 %4871 }
 0x587   :  { %v4874_v32 = vunpack.i.h.bf16 %v4872_v25  ;;  %v4873_v33 = vunpack.i.l.bf16 %v4872_v25 }
 0x588   :  { %v458_v26 = vpop.xlane.xlu0 %457 }
 0x589   :  { %4957 = vrcp.f32 %v458_v26  ;;  %v4720_v43 = vpack.c.bf16 %v4874_v32, %v4873_v33 }
 0x58a   :  { %v707_v27 = vpop.permute.xlu1 %706  ;;  %4959 = vrcp.f32 %v689_v54 }
 0x58b   :  { %4961 = vrcp.f32 %v692_v24 }
 0x58c   :  { %v695_v29 = vpop.xlane.xlu0 %694 }
 0x58d   :  { %v4956_v42 = vpop.eup %4955  ;;  %4963 = vrcp.f32 %v695_v29 }
 0x58e   :  { %v803_v37 = vpop.permute.xlu1 %802  ;;  %v463_v44 = vmul.f32 %v4956_v42, %v4946_v13 }
 0x58f   :  { %4282 = vmatpush3.msra.mxu0 %v803_v37 }
 0x590   :  { %v470_v41 = vpop.permute.xlu0 %469  ;;  %4722 = vmatprep.subr.bf16.mxu0 %v5076_v0 }
 0x591   :  { %4241 = vmatpush3.msk.msra.mxu1 %vm482_vm8, %v470_v41 }
 0x592   :  { %4243 = vmatmul.mubr.msk.f32.vlgmr.msra.gmra.mrb[12].mxu1 %vm430_vm6, %v462_v39  ;;  %4719 = vmatprep.subr.bf16.mxu1 %v5076_v0  ;;  %v998_v18 = vpop.permute.xlu1 %997 }
 0x593   :  { %4721 = vmatpush3.bf16.msra.mxu1 %v4720_v43  ;;  %4245 = vmatprep.mubr.msk.f32.mxu1 %vm5077_vm0, %v5078_v3  ;;  %v4958_v45 = vpop.eup %4957 }
 0x594   :  { %4270 = vmatprep.subr.mxu1 %v5078_v3  ;;  %v464_v47 = vmul.f32 %v4958_v45, %v4950_v17  ;;  %v4960_v5 = vpop.eup %4959  ;;  %v4877_v59 = vpop.permute.xlu0 %4876 }
 0x595   :  { %v699_v8 = vmul.f32 %v4960_v5, %v5339_v1  ;;  %v4962_v6 = vpop.eup %4961  ;;  %v4879_v62 = vunpack.i.h.bf16 %v4877_v59  ;;  %v4878_v63 = vunpack.i.l.bf16 %v4877_v59 }
 0x596   :  { %4246 = vmatmul.mubr.msk.f32.gmra.mrb[14].mxu1 %vm430_vm6, %v463_v44  ;;  %v700_v48 = vmul.f32 %v4962_v6, %v5345_v15  ;;  %v990_v54 = vpop.permute.xlu1 %989 }
 0x597   :  { %4271 = vmatpush3.msk.msra.mxu1 %vm482_vm8, %v707_v27  ;;  %4248 = vmatprep.mubr.msk.f32.mxu1 %vm5077_vm0, %v5078_v3  ;;  %v4964_v49 = vpop.eup %4963  ;;  %v4723_v4 = vpack.c.bf16 %v4879_v62, %v4878_v63 }
 0x598   :  { %4292 = vmatprep.subr.mxu1 %v5078_v3  ;;  %v701_v50 = vmul.f32 %v4964_v49, %v5350_v19  ;;  %v988_v20 = vpop.permute.xlu0 %987 }
 0x59a   :  { %4249 = vmatmul.mubr.msk.f32.gmra.mrb[16].mxu1 %vm430_vm6, %v464_v47 }
 0x59b   :  { %4272 = vmatprep.mubr.msk.f32.mxu1 %vm5077_vm0, %v5078_v3 }
 0x59c   :  { %v992_v21 = vpop.permute.xlu0 %991 }
 0x59e   :  { %4273 = vmatmul.mubr.msk.f32.vlgmr.msra.gmra.mrb[18].mxu1 %vm430_vm6, %v699_v8 }
 0x59f   :  { %4275 = vmatprep.mubr.msk.f32.mxu1 %vm5077_vm0, %v5078_v3 }
 0x5a2   :  { %4276 = vmatmul.mubr.msk.f32.gmra.mrb[20].mxu1 %vm430_vm6, %v700_v48 }
 0x5a3   :  { %4278 = vmatprep.mubr.msk.f32.mxu1 %vm5077_vm0, %v5078_v3 }
 0x5a6   :  { %4279 = vmatmul.mubr.msk.f32.gmra.mrb[22].mxu1 %vm430_vm6, %v701_v50 }
 0x5a7   :  { %4294 = vmatprep.mubr.msk.f32.mxu1 %vm5077_vm0, %v5078_v3 }
 0x665   :  { %v5399_v51 = vpop.f32.mrb[12].mxu1 }
 0x666   :  { %v4244_v52 = vpop.f32.mrb[13].mxu1 }
 0x669   :  { %v5401_v58 = vpop.f32.mrb[14].mxu1 }
 0x66a   :  { %v4247_v60 = vpop.f32.mrb[15].mxu1 }
 0x66d   :  { %v5403_v1 = vpop.f32.mrb[16].mxu1 }
 0x66e   :  { %v4250_v2 = vpop.f32.mrb[17].mxu1 }
 0x671   :  { %v787_v13 = vpop.f32.mrb[18].mxu1 }
 0x672   :  { %v4274_v14 = vpop.f32.mrb[19].mxu1  ;;  %4284 = vmatmul.mubr.msk.f32.vlgmr.msra.gmra.mrb[12].mxu0 %vm337_vm4, %v787_v13 }
 0x673   :  { %4725 = vmatpush3.bf16.xpose.msk.msra.mxu0 %vm5283_vm5, %v4723_v4  ;;  %4286 = vmatprep.mubr.msk.f32.mxu0 %vm5077_vm0, %v5078_v3 }
 0x674   :  { %4307 = vmatprep.subr.mxu0 %v5078_v3 }
 0x675   :  { %v792_v15 = vpop.f32.mrb[20].mxu1 }
 0x676   :  { %v4277_v16 = vpop.f32.mrb[21].mxu1  ;;  %4287 = vmatmul.mubr.msk.f32.gmra.mrb[14].mxu0 %vm337_vm4, %v792_v15 }
 0x677   :  { %4289 = vmatprep.mubr.msk.f32.mxu0 %vm5077_vm0, %v5078_v3 }
 0x679   :  { %v797_v17 = vpop.f32.mrb[22].mxu1 }
 0x67a   :  { %v4280_v19 = vpop.f32.mrb[23].mxu1  ;;  %4290 = vmatmul.mubr.msk.f32.gmra.mrb[16].mxu0 %vm337_vm4, %v797_v17 }
 0x67b   :  { %4308 = vmatpush3.xpose.msk.msra.mxu0 %vm337_vm4, %v998_v18  ;;  %4309 = vmatprep.mubr.msk.f32.mxu0 %vm5077_vm0, %v5078_v3 }
 0x67c   :  { %4333 = vmatprep.subr.mxu0 %v5078_v3 }
 0x67e   :  { %4310 = vmatmul.mubr.msk.f32.vlgmr.msra.gmra.mrb[18].mxu0 %vm337_vm4, %v988_v20 }
 0x67f   :  { %4312 = vmatprep.mubr.msk.f32.mxu0 %vm5077_vm0, %v5078_v3 }
 0x682   :  { %4313 = vmatmul.mubr.msk.f32.gmra.mrb[20].mxu0 %vm337_vm4, %v990_v54 }
 0x683   :  { %4315 = vmatprep.mubr.msk.f32.mxu0 %vm5077_vm0, %v5078_v3 }
 0x686   :  { %4316 = vmatmul.mubr.msk.f32.gmra.mrb[22].mxu0 %vm337_vm4, %v992_v21 }
 0x687   :  { %4335 = vmatprep.mubr.msk.f32.mxu0 %vm5077_vm0, %v5078_v3 }
 0x745   :  { %v5428_v22 = vpop.f32.mrb[12].mxu0 }
 0x746   :  { %v4285_v24 = vpop.f32.mrb[13].mxu0 }
 0x749   :  { %v5430_v25 = vpop.f32.mrb[14].mxu0 }
 0x74a   :  { %v4288_v26 = vpop.f32.mrb[15].mxu0 }
 0x74d   :  { %v5432_v27 = vpop.f32.mrb[16].mxu0 }
 0x74e   :  { %v4291_v29 = vpop.f32.mrb[17].mxu0 }
 0x751   :  { %v1077_v31 = vpop.f32.mrb[18].mxu0 }
 0x752   :  { %v1078_v32 = vadd.f32 %v1077_v31, %v5318_v55  ;;  %v4311_v33 = vpop.f32.mrb[19].mxu0 }
 0x754   :  { %v1091_v37 = vsel %vm430_vm6, %v1078_v32, -inf }
 0x755   :  { %1092 = vmax.xlane.f32.xlu1 %v1091_v37  ;;  %v1082_v39 = vpop.f32.mrb[20].mxu0 }
 0x756   :  { %v1083_v41 = vadd.f32 %v1082_v39, %v5321_v61  ;;  %v4314_v42 = vpop.f32.mrb[21].mxu0 }
 0x758   :  { %v1094_v43 = vsel %vm430_vm6, %v1083_v41, -inf }
 0x759   :  { %1095 = vmax.xlane.f32.xlu0 %v1094_v43  ;;  %v1087_v44 = vpop.f32.mrb[22].mxu0 }
 0x75a   :  { %v1088_v45 = vadd.f32 %v1087_v44, %v5325_v7  ;;  %v4317_v47 = vpop.f32.mrb[23].mxu0 }
 0x75c   :  { %v1097_v5 = vsel %vm437_vm7, %v1088_v45, -inf }
 0x75d   :  { %1098 = vmax.xlane.f32.xlu0 %v1097_v5 }
 0x766   :  { %4881 = vrot.lane.b32.xlu1 %v5260_v38, %s5089_s28 }
 0x76a   :  { %1128 = vrot.lane.b32.xlu1 %v5262_v40, %s5089_s28 }
 0x773   :  { %895 = vrot.lane.b32.xlu0 %v5205_v53, %s5086_s26 }
 0x7e2   :  { %v1093_v8 = vpop.xlane.xlu1 %1092 }
 0x7e3   :  { %v1100_v6 = vsub.f32 %v1078_v32, %v1093_v8 }
 0x7e5   :  { %v1103_v48 = vmul.f32 1.442695, %v1100_v6 }
 0x7e6   :  { %v1096_v49 = vpop.xlane.xlu0 %1095  ;;  %v4882_v52 = vpop.permute.xlu1 %4881 }
 0x7e7   :  { %4965 = vpow2.f32 %v1103_v48  ;;  %v1101_v50 = vsub.f32 %v1083_v41, %v1096_v49  ;;  %v4884_v62 = vunpack.i.h.bf16 %v4882_v52  ;;  %v4883_v63 = vunpack.i.l.bf16 %v4882_v52 }
 0x7e9   :  { %v1105_v59 = vmul.f32 1.442695, %v1101_v50  ;;  %v4727_v4 = vpack.c.bf16 %v4884_v62, %v4883_v63 }
 0x7ea   :  { %v1099_v60 = vpop.xlane.xlu0 %1098  ;;  %v1129_v14 = vpop.permute.xlu1 %1128 }
 0x7eb   :  { %4967 = vpow2.f32 %v1105_v59 }
 0x7ee   :  { %v896_v2 = vpop.permute.xlu0 %895 }
 0x7ef   :  { %4293 = vmatpush3.msra.mxu1 %v896_v2 }
 0x7f0   :  { %4295 = vmatmul.mubr.msk.f32.vlgmr.msra.gmra.mrb[24].mxu1 %vm337_vm4, %v5399_v51  ;;  %4726 = vmatprep.subr.bf16.mxu1 %v5076_v0 }
 0x7f1   :  { %v4966_v53 = vpop.eup %4965  ;;  %4728 = vmatpush3.bf16.msra.mxu1 %v4727_v4  ;;  %4297 = vmatprep.mubr.msk.f32.mxu1 %vm5077_vm0, %v5078_v3 }
 0x7f2   :  { %v1109_v13 = vsel %vm430_vm6, %v4966_v53, 0.0  ;;  %4322 = vmatprep.subr.mxu1 %v5078_v3 }
 0x7f3   :  { %1110 = vadd.xlane.f32.xlu1 %v1109_v13 }
 0x7f4   :  { %4298 = vmatmul.mubr.msk.f32.gmra.mrb[26].mxu1 %vm337_vm4, %v5401_v58  ;;  %v1102_v58 = vsub.f32 %v1088_v45, %v1099_v60 }
 0x7f5   :  { %v4968_v15 = vpop.eup %4967  ;;  %4323 = vmatpush3.msk.msra.mxu1 %vm482_vm8, %v1129_v14  ;;  %4300 = vmatprep.mubr.msk.f32.mxu1 %vm5077_vm0, %v5078_v3 }
 0x7f6   :  { %v1112_v51 = vsel %vm430_vm6, %v4968_v15, 0.0  ;;  %4729 = vmatprep.subr.bf16.mxu1 %v5076_v0  ;;  %v1107_v16 = vmul.f32 1.442695, %v1102_v58 }
 0x7f7   :  { %1113 = vadd.xlane.f32.xlu0 %v1112_v51 }
 0x7f8   :  { %4301 = vmatmul.mubr.msk.f32.gmra.mrb[28].mxu1 %vm337_vm4, %v5403_v1  ;;  %4969 = vpow2.f32 %v1107_v16 }
 0x7f9   :  { %4324 = vmatprep.mubr.msk.f32.mxu1 %vm5077_vm0, %v5078_v3 }
 0x802   :  { %v4970_v1 = vpop.eup %4969 }
 0x803   :  { %v1115_v17 = vsel %vm437_vm7, %v4970_v1, 0.0 }
 0x804   :  { %1329 = vrot.lane.b32.xlu1 %v5262_v40, %s5090_s29 }
 0x80d   :  { %4886 = vrot.lane.b32.xlu0 %v5260_v38, %s5090_s29 }
 0x811   :  { %1319 = vrot.lane.b32.xlu0 %v5254_v34, %s5091_s30 }
 0x815   :  { %1323 = vrot.lane.b32.xlu0 %v5262_v40, %s5091_s30 }
 0x828   :  { %1116 = vadd.xlane.f32.xlu1 %v1115_v17 }
 0x839   :  { %1321 = vrot.lane.b32.xlu1 %v5256_v35, %s5091_s30 }
 0x880   :  { %v1111_v18 = vpop.xlane.xlu1 %1110 }
 0x881   :  { %4971 = vrcp.f32 %v1111_v18 }
 0x884   :  { %v1114_v19 = vpop.xlane.xlu0 %1113  ;;  %v1330_v31 = vpop.permute.xlu1 %1329 }
 0x885   :  { %4973 = vrcp.f32 %v1114_v19 }
 0x888   :  { %v4887_v20 = vpop.permute.xlu0 %4886 }
 0x889   :  { %v4889_v54 = vunpack.i.h.bf16 %v4887_v20  ;;  %v4888_v34 = vunpack.i.l.bf16 %v4887_v20 }
 0x88b   :  { %v4972_v21 = vpop.eup %4971  ;;  %v4730_v24 = vpack.c.bf16 %v4889_v54, %v4888_v34 }
 0x88c   :  { %v1121_v26 = vmul.f32 %v4972_v21, %v4966_v53  ;;  %v1320_v43 = vpop.permute.xlu0 %1319 }
 0x88e   :  { %4325 = vmatmul.mubr.msk.f32.vlgmr.msra.gmra.mrb[30].mxu1 %vm430_vm6, %v1121_v26 }
 0x88f   :  { %v4974_v29 = vpop.eup %4973  ;;  %4732 = vmatpush3.bf16.xpose.msk.msra.mxu1 %vm5283_vm5, %v4730_v24  ;;  %4327 = vmatprep.mubr.msk.f32.mxu1 %vm5077_vm0, %v5078_v3 }
 0x890   :  { %v1122_v35 = vmul.f32 %v4974_v29, %v4968_v15  ;;  %4348 = vmatprep.subr.mxu1 %v5078_v3  ;;  %v1324_v48 = vpop.permute.xlu0 %1323 }
 0x892   :  { %4328 = vmatmul.mubr.msk.f32.gmra.mrb[32].mxu1 %vm430_vm6, %v1122_v35 }
 0x893   :  { %4330 = vmatprep.mubr.msk.f32.mxu1 %vm5077_vm0, %v5078_v3 }
 0x897   :  { %4349 = vmatpush3.xpose.msk.msra.mxu1 %vm337_vm4, %v1330_v31 }
 0x898   :  { %4374 = vmatprep.subr.mxu1 %v5078_v3 }
 0x8b5   :  { %v1117_v32 = vpop.xlane.xlu1 %1116 }
 0x8b6   :  { %4975 = vrcp.f32 %v1117_v32 }
 0x8b9   :  { %v1322_v5 = vpop.permute.xlu1 %1321 }
 0x8c0   :  { %v4976_v33 = vpop.eup %4975 }
 0x8c1   :  { %v1123_v37 = vmul.f32 %v4976_v33, %v4970_v1 }
 0x8c3   :  { %v973_v39 = vpop.f32.mrb[24].mxu1  ;;  %4331 = vmatmul.mubr.msk.f32.gmra.mrb[34].mxu1 %vm430_vm6, %v1123_v37 }
 0x8c4   :  { %v5488_v41 = vadd.f32 %v973_v39, %v5428_v22  ;;  %v4296_v42 = vpop.f32.mrb[25].mxu1  ;;  %4350 = vmatprep.mubr.msk.f32.mxu1 %vm5077_vm0, %v5078_v3 }
 0x8c7   :  { %v978_v44 = vpop.f32.mrb[26].mxu1  ;;  %4351 = vmatmul.mubr.msk.f32.vlgmr.msra.gmra.mrb[36].mxu1 %vm337_vm4, %v1320_v43 }
 0x8c8   :  { %v5494_v45 = vadd.f32 %v978_v44, %v5430_v25  ;;  %v4299_v47 = vpop.f32.mrb[27].mxu1  ;;  %4353 = vmatprep.mubr.msk.f32.mxu1 %vm5077_vm0, %v5078_v3 }
 0x8cb   :  { %v983_v8 = vpop.f32.mrb[28].mxu1  ;;  %4354 = vmatmul.mubr.msk.f32.gmra.mrb[38].mxu1 %vm337_vm4, %v1322_v5 }
 0x8cc   :  { %v5500_v22 = vadd.f32 %v983_v8, %v5432_v27  ;;  %v4302_v6 = vpop.f32.mrb[29].mxu1  ;;  %4356 = vmatprep.mubr.msk.f32.mxu1 %vm5077_vm0, %v5078_v3 }
 0x8cf   :  { %4357 = vmatmul.mubr.msk.f32.gmra.mrb[40].mxu1 %vm337_vm4, %v1324_v48 }
 0x8d0   :  { %4376 = vmatprep.mubr.msk.f32.mxu1 %vm5077_vm0, %v5078_v3 }
 0x961   :  { %v1209_v25 = vpop.f32.mrb[30].mxu1 }
 0x962   :  { %v4326_v49 = vpop.f32.mrb[31].mxu1 }
 0x965   :  { %v1214_v50 = vpop.f32.mrb[32].mxu1 }
 0x966   :  { %v4329_v52 = vpop.f32.mrb[33].mxu1 }
 0x996   :  { %v1219_v59 = vpop.f32.mrb[34].mxu1 }
 0x997   :  { %v4332_v60 = vpop.f32.mrb[35].mxu1 }
 0x99a   :  { %v1409_v62 = vpop.f32.mrb[36].mxu1 }
 0x99b   :  { %v1410_v27 = vadd.f32 %v1409_v62, %v5318_v55  ;;  %v4352_v63 = vpop.f32.mrb[37].mxu1 }
 0x99d   :  { %v1423_v2 = vsel %vm430_vm6, %v1410_v27, -inf }
 0x99e   :  { %1424 = vmax.xlane.f32.xlu1 %v1423_v2  ;;  %v1414_v4 = vpop.f32.mrb[38].mxu1 }
 0x99f   :  { %v1415_v53 = vadd.f32 %v1414_v4, %v5321_v61  ;;  %v4355_v13 = vpop.f32.mrb[39].mxu1 }
 0x9a1   :  { %v1426_v14 = vsel %vm430_vm6, %v1415_v53, -inf }
 0x9a2   :  { %1427 = vmax.xlane.f32.xlu0 %v1426_v14  ;;  %v1419_v15 = vpop.f32.mrb[40].mxu1 }
 0x9a3   :  { %v1420_v51 = vadd.f32 %v1419_v15, %v5325_v7  ;;  %v4358_v58 = vpop.f32.mrb[41].mxu1 }
 0x9a5   :  { %v1429_v16 = vsel %vm437_vm7, %v1420_v51, -inf }
 0x9a6   :  { %1430 = vmax.xlane.f32.xlu0 %v1429_v16 }
 0x9af   :  { %1224 = vrot.lane.b32.xlu1 %v5217_v56, %s5086_s26 }
 0xa2b   :  { %v1425_v1 = vpop.xlane.xlu1 %1424 }
 0xa2c   :  { %v1432_v17 = vsub.f32 %v1410_v27, %v1425_v1 }
 0xa2e   :  { %v1435_v18 = vmul.f32 1.442695, %v1432_v17 }
 0xa2f   :  { %v1225_v19 = vpop.permute.xlu1 %1224  ;;  %v1428_v20 = vpop.xlane.xlu0 %1427 }
 0xa30   :  { %4977 = vpow2.f32 %v1435_v18  ;;  %v1433_v54 = vsub.f32 %v1415_v53, %v1428_v20  ;;  %4334 = vmatpush3.msra.mxu0 %v1225_v19 }
 0xa31   :  { %4336 = vmatmul.mubr.msk.f32.vlgmr.msra.gmra.mrb[24].mxu0 %vm337_vm4, %v1209_v25  ;;  %4733 = vmatprep.subr.bf16.mxu0 %v5076_v0 }
 0xa32   :  { %v1437_v34 = vmul.f32 1.442695, %v1433_v54  ;;  %4338 = vmatprep.mubr.msk.f32.mxu0 %vm5077_vm0, %v5078_v3 }
 0xa33   :  { %v1431_v21 = vpop.xlane.xlu0 %1430 }
 0xa34   :  { %4979 = vpow2.f32 %v1437_v34  ;;  %v1434_v24 = vsub.f32 %v1420_v51, %v1431_v21 }
 0xa35   :  { %4339 = vmatmul.mubr.msk.f32.gmra.mrb[26].mxu0 %vm337_vm4, %v1214_v50 }
 0xa36   :  { %v1439_v56 = vmul.f32 1.442695, %v1434_v24  ;;  %4341 = vmatprep.mubr.msk.f32.mxu0 %vm5077_vm0, %v5078_v3 }
 0xa38   :  { %4981 = vpow2.f32 %v1439_v56 }
 0xa39   :  { %4342 = vmatmul.mubr.msk.f32.gmra.mrb[28].mxu0 %vm337_vm4, %v1219_v59 }
 0xa3a   :  { %v4978_v26 = vpop.eup %4977  ;;  %4365 = vmatprep.mubr.msk.f32.mxu0 %vm5077_vm0, %v5078_v3 }
 0xa3b   :  { %v1441_v29 = vsel %vm430_vm6, %v4978_v26, 0.0 }
 0xa3c   :  { %1442 = vadd.xlane.f32.xlu1 %v1441_v29 }
 0xa3e   :  { %v4980_v35 = vpop.eup %4979 }
 0xa3f   :  { %v1444_v31 = vsel %vm430_vm6, %v4980_v35, 0.0 }
 0xa40   :  { %1445 = vadd.xlane.f32.xlu0 %v1444_v31 }
 0xa42   :  { %v4982_v32 = vpop.eup %4981 }
 0xa43   :  { %v1447_v33 = vsel %vm437_vm7, %v4982_v32, 0.0 }
 0xa44   :  { %1448 = vadd.xlane.f32.xlu0 %v1447_v33 }
 0xa4d   :  { %1460 = vrot.lane.b32.xlu1 %v5262_v40, %s5092_s6 }
 0xa51   :  { %1556 = vrot.lane.b32.xlu1 %v5222_v57, %s5086_s26 }
 0xa5a   :  { %4891 = vrot.lane.b32.xlu0 %v5260_v38, %s5092_s6 }
 0xac9   :  { %v1443_v37 = vpop.xlane.xlu1 %1442 }
 0xaca   :  { %4983 = vrcp.f32 %v1443_v37 }
 0xacd   :  { %v1461_v39 = vpop.permute.xlu1 %1460  ;;  %v1446_v42 = vpop.xlane.xlu0 %1445 }
 0xace   :  { %4985 = vrcp.f32 %v1446_v42 }
 0xad1   :  { %v1449_v43 = vpop.xlane.xlu0 %1448  ;;  %v1557_v44 = vpop.permute.xlu1 %1556 }
 0xad2   :  { %4375 = vmatpush3.msra.mxu1 %v1557_v44  ;;  %4987 = vrcp.f32 %v1449_v43 }
 0xad3   :  { %4742 = vmatprep.subr.bf16.mxu1 %v5076_v0 }
 0xad4   :  { %v4984_v6 = vpop.eup %4983 }
 0xad5   :  { %v4892_v47 = vpop.permute.xlu0 %4891  ;;  %v1453_v57 = vmul.f32 %v4984_v6, %v4978_v26 }
 0xad6   :  { %v4894_v5 = vunpack.i.h.bf16 %v4892_v47  ;;  %v4893_v8 = vunpack.i.l.bf16 %v4892_v47 }
 0xad8   :  { %v4734_v40 = vpack.c.bf16 %v4894_v5, %v4893_v8  ;;  %v4986_v38 = vpop.eup %4985 }
 0xad9   :  { %v1454_v48 = vmul.f32 %v4986_v38, %v4980_v35  ;;  %v146_v38 = vld [vmem:[%s6210_s2 + $0x8] sm:$0xff] }
 0xada   :  { %4735 = vmatpush3.bf16.msra.mxu0 %v4734_v40 }
 0xadb   :  { %4363 = vmatprep.subr.mxu0 %v5078_v3 }
 0xadc   :  { %v4988_v25 = vpop.eup %4987 }
 0xadd   :  { %v1455_v49 = vmul.f32 %v4988_v25, %v4982_v32 }
 0xade   :  { %4364 = vmatpush3.msk.msra.mxu0 %vm482_vm8, %v1461_v39 }
 0xadf   :  { %4366 = vmatmul.mubr.msk.f32.vlgmr.msra.gmra.mrb[30].mxu0 %vm430_vm6, %v1453_v57  ;;  %4736 = vmatprep.subr.bf16.mxu0 %v5076_v0 }
 0xae0   :  { %4368 = vmatprep.mubr.msk.f32.mxu0 %vm5077_vm0, %v5078_v3 }
 0xae3   :  { %4369 = vmatmul.mubr.msk.f32.gmra.mrb[32].mxu0 %vm430_vm6, %v1454_v48  ;;  %v148_v48 = vld [vmem:[%s6210_s2 + $0x18] sm:$0xff] }
 0xae4   :  { %4371 = vmatprep.mubr.msk.f32.mxu0 %vm5077_vm0, %v5078_v3  ;;  %v4737_v25 = vpack.c.bf16 %v148_v48, %v146_v38  ;;  %v165_v38 = vld [vmem:[%s6212_s3 + $0x60] sm:$0xff]  ;;  %v166_v48 = vld [vmem:[%s6212_s3 + $0x68] sm:$0xff] }
 0xae6   :  { %4738 = vmatpush3.bf16.msra.mxu0 %v4737_v25  ;;  %v4761_v25 = vpack.c.bf16 %v166_v48, %v165_v38 }
 0xae7   :  { %4372 = vmatmul.mubr.msk.f32.gmra.mrb[34].mxu0 %vm430_vm6, %v1455_v49  ;;  %4739 = vmatprep.subr.bf16.mxu0 %v5076_v0  ;;  %v150_v49 = vld [vmem:[%s6210_s2 + $0x28] sm:$0xff] }
 0xae8   :  { %4393 = vmatprep.mubr.msk.f32.mxu0 %vm5077_vm0, %v5078_v3 }
 0xb04   :  { %v1302_v50 = vpop.f32.mrb[24].mxu0 }
 0xb05   :  { %v1316_v52 = vadd.f32 %v1302_v50, %v5488_v41  ;;  %v4337_v59 = vpop.f32.mrb[25].mxu0  ;;  %v152_v50 = vld [vmem:[%s6210_s2 + $0x38] sm:$0xff] }
 0xb06   :  { %v153_v59 = vld [vmem:[%s6212_s3] sm:$0xff] }
 0xb08   :  { %v1307_v60 = vpop.f32.mrb[26].mxu0 }
 0xb09   :  { %v1317_v62 = vadd.f32 %v1307_v60, %v5494_v45  ;;  %v4340_v27 = vpop.f32.mrb[27].mxu0  ;;  %v154_v60 = vld [vmem:[%s6212_s3 + $0x8] sm:$0xff] }
 0xb0c   :  { %v1312_v63 = vpop.f32.mrb[28].mxu0 }
 0xb0d   :  { %v1318_v2 = vadd.f32 %v1312_v63, %v5500_v22  ;;  %v4343_v4 = vpop.f32.mrb[29].mxu0  ;;  %v5560_v22 = vsub.s32 3, %v5166_v10 }
 0xb0f   :  { %v1657_v16 = vrot.slane %v5231_v9, %v5560_v22 }
 0xbb2   :  { %v1541_v53 = vpop.f32.mrb[30].mxu0 }
 0xbb3   :  { %v4367_v13 = vpop.f32.mrb[31].mxu0  ;;  %4377 = vmatmul.mubr.msk.f32.vlgmr.msra.gmra.mrb[42].mxu1 %vm337_vm4, %v1541_v53 }
 0xbb4   :  { %4379 = vmatprep.mubr.msk.f32.mxu1 %vm5077_vm0, %v5078_v3 }
 0xbb6   :  { %v1546_v14 = vpop.f32.mrb[32].mxu0 }
 0xbb7   :  { %v4370_v15 = vpop.f32.mrb[33].mxu0  ;;  %4380 = vmatmul.mubr.msk.f32.gmra.mrb[44].mxu1 %vm337_vm4, %v1546_v14 }
 0xbb8   :  { %4382 = vmatprep.mubr.msk.f32.mxu1 %vm5077_vm0, %v5078_v3 }
 0xbba   :  { %v1551_v41 = vpop.f32.mrb[34].mxu0 }
 0xbbb   :  { %v4373_v45 = vpop.f32.mrb[35].mxu0  ;;  %4383 = vmatmul.mubr.msk.f32.gmra.mrb[46].mxu1 %vm337_vm4, %v1551_v41  ;;  %v1702_v41 = vsub.s32 4, %v5166_v10 }
 0xbbc   :  { %4434 = vmatprep.mubr.msk.f32.mxu1 %vm5077_vm0, %v5078_v3 }
 0xc86   :  { %v1634_v51 = vpop.f32.mrb[42].mxu1 }
 0xc87   :  { %v1648_v58 = vadd.f32 %v1634_v51, %v1316_v52  ;;  %v4378_v1 = vpop.f32.mrb[43].mxu1  ;;  %v4740_v52 = vpack.c.bf16 %v152_v50, %v150_v49  ;;  %v1709_v51 = vsub.s32 5, %v5166_v10  ;;  %v167_v49 = vld [vmem:[%s6212_s3 + $0x70] sm:$0xff]  ;;  %v168_v50 = vld [vmem:[%s6212_s3 + $0x78] sm:$0xff] }
 0xc89   :  { %v1651_v17 = vadd.f32 %v1648_v58, %v5178_v23  ;;  %4741 = vmatpush3.bf16.msra.mxu0 %v4740_v52  ;;  %v5611_v58 = vld [vmem:[%s6211_s4] sm:$0xff]  ;;  %v4764_v52 = vpack.c.bf16 %v168_v50, %v167_v49 }
 0xc8a   :  { %v1639_v18 = vpop.f32.mrb[44].mxu1  ;;  %4766 = vmatprep.subr.bf16.mxu0 %v5076_v0 }
 0xc8b   :  { %v5565_v19 = vadd.f32 %v1657_v16, %v1651_v17  ;;  %v1649_v20 = vadd.f32 %v1639_v18, %v1317_v62  ;;  %v4381_v54 = vpop.f32.mrb[45].mxu1  ;;  %v4743_v62 = vpack.c.bf16 %v154_v60, %v153_v59  ;;  %v1710_v17 = vrot.slane %v5611_v58, %v1709_v51 }
 0xc8c   :  { %v1716_v59 = vsub.s32 6, %v5166_v10 }
 0xc8d   :  { %v1652_v34 = vadd.f32 %v1649_v20, %v5185_v30  ;;  %v1661_v21 = vsel %vm170_vm2, %v5565_v19, 0.0  ;;  %4744 = vmatpush3.bf16.msra.mxu1 %v4743_v62 }
 0xc8e   :  { %1662 = vadd.xlane.f32.xlu1 %v1661_v21  ;;  %v1644_v24 = vpop.f32.mrb[46].mxu1  ;;  %4745 = vmatprep.subr.bf16.mxu1 %v5076_v0  ;;  %v1717_v60 = vrot.slane %v5611_v58, %v1716_v59 }
 0xc8f   :  { %v5570_v56 = vadd.f32 %v1657_v16, %v1652_v34  ;;  %v1650_v26 = vadd.f32 %v1644_v24, %v1318_v2  ;;  %v4384_v29 = vpop.f32.mrb[47].mxu1 }
 0xc91   :  { %v1653_v9 = vadd.f32 %v1650_v26, %v5192_v36  ;;  %v1664_v23 = vsel %vm170_vm2, %v5570_v56, 0.0 }
 0xc92   :  { %1665 = vadd.xlane.f32.xlu0 %v1664_v23 }
 0xc93   :  { %v5575_v35 = vadd.f32 %v1657_v16, %v1653_v9  ;;  %v1703_v16 = vrot.slane %v5611_v58, %v1702_v41 }
 0xc95   :  { %v1667_v30 = vsel %vm177_vm3, %v5575_v35, 0.0 }
 0xc96   :  { %1668 = vadd.xlane.f32.xlu0 %v1667_v30 }
 0xd1b   :  { %v1663_v31 = vpop.xlane.xlu1 %1662 }
 0xd1c   :  { %v1670_v32 = vmul.f32 0.03125, %v1663_v31  ;;  %v155_v31 = vld [vmem:[%s6212_s3 + $0x10] sm:$0xff] }
 0xd1e   :  { %v1673_v33 = vsub.f32 %v5565_v19, %v1670_v32  ;;  %v156_v32 = vld [vmem:[%s6212_s3 + $0x18] sm:$0xff] }
 0xd1f   :  { %v1666_v37 = vpop.xlane.xlu0 %1665 }
 0xd20   :  { %v1671_v39 = vmul.f32 0.03125, %v1666_v37  ;;  %v1676_v42 = vmul.f32 %v1673_v33, %v1673_v33  ;;  %v157_v37 = vld [vmem:[%s6212_s3 + $0x20] sm:$0xff] }
 0xd22   :  { %v1674_v43 = vsub.f32 %v5570_v56, %v1671_v39  ;;  %v1679_v36 = vsel %vm170_vm2, %v1676_v42, 0.0  ;;  %v158_v39 = vld [vmem:[%s6212_s3 + $0x28] sm:$0xff] }
 0xd23   :  { %1680 = vadd.xlane.f32.xlu1 %v1679_v36  ;;  %v1669_v44 = vpop.xlane.xlu0 %1668  ;;  %v4749_v42 = vpack.c.bf16 %v158_v39, %v157_v37  ;;  %v160_v36 = vld [vmem:[%s6212_s3 + $0x38] sm:$0xff] }
 0xd24   :  { %v1672_v47 = vmul.f32 0.03125, %v1669_v44  ;;  %v1677_v5 = vmul.f32 %v1674_v43, %v1674_v43 }
 0xd26   :  { %v1675_v8 = vsub.f32 %v5575_v35, %v1672_v47  ;;  %v1682_v40 = vsel %vm170_vm2, %v1677_v5, 0.0  ;;  %v161_v47 = vld [vmem:[%s6212_s3 + $0x40] sm:$0xff]  ;;  %v162_v5 = vld [vmem:[%s6212_s3 + $0x48] sm:$0xff] }
 0xd27   :  { %1683 = vadd.xlane.f32.xlu0 %v1682_v40  ;;  %v163_v40 = vld [vmem:[%s6212_s3 + $0x50] sm:$0xff] }
 0xd28   :  { %v1678_v6 = vmul.f32 %v1675_v8, %v1675_v8 }
 0xd2a   :  { %v1685_v57 = vsel %vm177_vm3, %v1678_v6, 0.0  ;;  %v164_v6 = vld [vmem:[%s6212_s3 + $0x58] sm:$0xff] }
 0xd2b   :  { %1686 = vadd.xlane.f32.xlu1 %v1685_v57  ;;  %v4758_v57 = vpack.c.bf16 %v164_v6, %v163_v40  ;;  %v1836_v40 = vsub.s32 7, %v5166_v10 }
 0xd2d   :  { %v1837_v6 = vrot.slane %v5611_v58, %v1836_v40 }
 0xdb0   :  { %v1681_v27 = vpop.xlane.xlu1 %1680 }
 0xdb1   :  { %v1688_v63 = vmul.f32 0.03125, %v1681_v27 }
 0xdb3   :  { %v1691_v2 = vadd.f32 1e-05, %v1688_v63 }
 0xdb4   :  { %v1684_v4 = vpop.xlane.xlu0 %1683 }
 0xdb5   :  { %4989 = vrsqrt.f32 %v1691_v2  ;;  %v1689_v53 = vmul.f32 0.03125, %v1684_v4 }
 0xdb7   :  { %v1692_v13 = vadd.f32 1e-05, %v1689_v53 }
 0xdb8   :  { %v1687_v14 = vpop.xlane.xlu1 %1686 }
 0xdb9   :  { %4991 = vrsqrt.f32 %v1692_v13  ;;  %v1690_v15 = vmul.f32 0.03125, %v1687_v14 }
 0xdbb   :  { %v1693_v45 = vadd.f32 1e-05, %v1690_v15 }
 0xdbd   :  { %4993 = vrsqrt.f32 %v1693_v45 }
 0xdbf   :  { %v4990_v1 = vpop.eup %4989 }
 0xdc0   :  { %v1697_v18 = vmul.f32 %v4990_v1, %v1673_v33  ;;  %v4746_v33 = vpack.c.bf16 %v156_v32, %v155_v31 }
 0xdc2   :  { %v1704_v20 = vmul.f32 %v1703_v16, %v1697_v18  ;;  %4747 = vmatpush3.bf16.msra.mxu1 %v4746_v33 }
 0xdc3   :  { %v4992_v54 = vpop.eup %4991  ;;  %4748 = vmatprep.subr.bf16.mxu1 %v5076_v0 }
 0xdc4   :  { %v1711_v34 = vadd.f32 %v1710_v17, %v1704_v20  ;;  %v1698_v21 = vmul.f32 %v4992_v54, %v1674_v43  ;;  %v159_v43 = vld [vmem:[%s6212_s3 + $0x30] sm:$0xff] }
 0xdc5   :  { %v4752_v44 = vpack.c.bf16 %v160_v36, %v159_v43 }
 0xdc6   :  { %4394 = vmatmul.mubr.msk.f32.vlgmr.msra.gmra.mrb[36].mxu0 %vm170_vm2, %v1711_v34  ;;  %v1705_v24 = vmul.f32 %v1703_v16, %v1698_v21  ;;  %4750 = vmatpush3.bf16.msra.mxu1 %v4749_v42 }
 0xdc7   :  { %v4994_v26 = vpop.eup %4993  ;;  %4396 = vmatprep.mubr.msk.f32.mxu0 %vm5077_vm0, %v5078_v3  ;;  %4751 = vmatprep.subr.bf16.mxu1 %v5076_v0 }
 0xdc8   :  { %v1712_v29 = vadd.f32 %v1710_v17, %v1705_v24  ;;  %v1699_v9 = vmul.f32 %v4994_v26, %v1675_v8  ;;  %v4755_v8 = vpack.c.bf16 %v162_v5, %v161_v47 }
 0xdca   :  { %4397 = vmatmul.mubr.msk.f32.gmra.mrb[38].mxu0 %vm170_vm2, %v1712_v29  ;;  %v1706_v23 = vmul.f32 %v1703_v16, %v1699_v9  ;;  %4753 = vmatpush3.bf16.msra.mxu1 %v4752_v44 }
 0xdcb   :  { %4399 = vmatprep.mubr.msk.f32.mxu0 %vm5077_vm0, %v5078_v3  ;;  %4754 = vmatprep.subr.bf16.mxu1 %v5076_v0 }
 0xdcc   :  { %v1713_v30 = vadd.f32 %v1710_v17, %v1706_v23 }
 0xdce   :  { %4400 = vmatmul.mubr.msk.f32.gmra.mrb[40].mxu0 %vm170_vm2, %v1713_v30  ;;  %4756 = vmatpush3.bf16.msra.mxu1 %v4755_v8 }
 0xdcf   :  { %4451 = vmatprep.mubr.msk.f32.mxu0 %vm5077_vm0, %v5078_v3  ;;  %4757 = vmatprep.subr.bf16.mxu1 %v5076_v0 }
 0xdd2   :  { %4759 = vmatpush3.bf16.msra.mxu1 %v4758_v57 }
 0xdd3   :  { %4760 = vmatprep.subr.bf16.mxu1 %v5076_v0 }
 0xdd6   :  { %4762 = vmatpush3.bf16.msra.mxu1 %v4761_v25 }
 0xdd7   :  { %4763 = vmatprep.subr.bf16.mxu1 %v5076_v0 }
 0xdda   :  { %4765 = vmatpush3.bf16.msra.mxu1 %v4764_v52 }
 0xddb   :  { %4779 = vmatprep.subr.bf16.mxu1 %v5076_v0 }
 0xe99   :  { %v1793_v62 = vpop.f32.mrb[36].mxu0 }
 0xe9a   :  { %v1794_v27 = vadd.f32 %v1793_v62, %v1717_v60  ;;  %v4395_v63 = vpop.f32.mrb[37].mxu0 }
 0xe9c   :  { %v1810_v2 = vmul.f32 0.044715, %v1794_v27  ;;  %v1807_v32 = vmul.f32 0.5, %v1794_v27 }
 0xe9d   :  { %v1798_v4 = vpop.f32.mrb[38].mxu0 }
 0xe9e   :  { %v1813_v53 = vmul.f32 %v1810_v2, %v1794_v27  ;;  %v1799_v13 = vadd.f32 %v1798_v4, %v1717_v60  ;;  %v4398_v14 = vpop.f32.mrb[39].mxu0 }
 0xea0   :  { %v1816_v15 = vmul.f32 %v1813_v53, %v1794_v27  ;;  %v1811_v45 = vmul.f32 0.044715, %v1799_v13  ;;  %v1808_v42 = vmul.f32 0.5, %v1799_v13 }
 0xea1   :  { %v1803_v16 = vpop.f32.mrb[40].mxu0 }
 0xea2   :  { %v1819_v1 = vadd.f32 %v1816_v15, %v1794_v27  ;;  %v1814_v17 = vmul.f32 %v1811_v45, %v1799_v13  ;;  %v1804_v18 = vadd.f32 %v1803_v16, %v1717_v60  ;;  %v4401_v20 = vpop.f32.mrb[41].mxu0 }
 0xea4   :  { %v1822_v54 = vmul.f32 0.7978846, %v1819_v1  ;;  %v1812_v34 = vmul.f32 0.044715, %v1804_v18  ;;  %v1817_v21 = vmul.f32 %v1814_v17, %v1799_v13  ;;  %v1809_v47 = vmul.f32 0.5, %v1804_v18 }
 0xea6   :  { %4995 = vtanh.f32 %v1822_v54  ;;  %v1815_v24 = vmul.f32 %v1812_v34, %v1804_v18  ;;  %v1820_v26 = vadd.f32 %v1817_v21, %v1799_v13 }
 0xea8   :  { %v1823_v29 = vmul.f32 0.7978846, %v1820_v26  ;;  %v1818_v9 = vmul.f32 %v1815_v24, %v1804_v18  ;;  %v5715_v24 = vld [vmem:[%s6210_s2 + $0x40] sm:$0xff]  ;;  %v5720_v26 = vld [vmem:[%s6210_s2 + $0x50] sm:$0xff] }
 0xeaa   :  { %4997 = vtanh.f32 %v1823_v29  ;;  %v1821_v23 = vadd.f32 %v1818_v9, %v1804_v18  ;;  %v4767_v29 = vpack.c.bf16 %v5720_v26, %v5715_v24  ;;  %v5728_v9 = vld [vmem:[%s6210_s2 + $0x60] sm:$0xff] }
 0xeac   :  { %v1824_v30 = vmul.f32 0.7978846, %v1821_v23  ;;  %4768 = vmatpush3.bf16.msra.mxu0 %v4767_v29  ;;  %v5733_v23 = vld [vmem:[%s6210_s2 + $0x70] sm:$0xff] }
 0xead   :  { %4769 = vmatprep.subr.bf16.mxu0 %v5076_v0 }
 0xeae   :  { %4999 = vtanh.f32 %v1824_v30  ;;  %v4770_v30 = vpack.c.bf16 %v5733_v23, %v5728_v9 }
 0xeb0   :  { %v4996_v31 = vpop.eup %4995  ;;  %4771 = vmatpush3.bf16.msra.mxu0 %v4770_v30 }
 0xeb1   :  { %v1828_v33 = vadd.f32 1.0, %v4996_v31  ;;  %4772 = vmatprep.subr.bf16.mxu0 %v5076_v0 }
 0xeb3   :  { %v1831_v37 = vmul.f32 %v1828_v33, %v1807_v32 }
 0xeb4   :  { %v4998_v39 = vpop.eup %4997 }
 0xeb5   :  { %4435 = vmatmul.mubr.f32.vlgmr.msra.gmra.mrb[48].mxu1 %v1831_v37  ;;  %v1829_v43 = vadd.f32 1.0, %v4998_v39 }
 0xeb6   :  { %4437 = vmatprep.mubr.msk.f32.mxu1 %vm5077_vm0, %v5078_v3 }
 0xeb7   :  { %v1832_v36 = vmul.f32 %v1829_v43, %v1808_v42 }
 0xeb8   :  { %v5000_v44 = vpop.eup %4999 }
 0xeb9   :  { %4438 = vmatmul.mubr.f32.gmra.mrb[50].mxu1 %v1832_v36  ;;  %v1830_v5 = vadd.f32 1.0, %v5000_v44  ;;  %v5741_v44 = vld [vmem:[%s6211_s4 + $0x8] sm:$0xff] }
 0xeba   :  { %4440 = vmatprep.mubr.msk.f32.mxu1 %vm5077_vm0, %v5078_v3 }
 0xebb   :  { %v1833_v8 = vmul.f32 %v1830_v5, %v1809_v47  ;;  %v1991_v5 = vrot.slane %v5741_v44, %v5169_v11 }
 0xebd   :  { %4441 = vmatmul.mubr.f32.gmra.mrb[52].mxu1 %v1833_v8 }
 0xebe   :  { %4496 = vmatprep.mubr.msk.f32.mxu1 %vm5077_vm0, %v5078_v3 }
 0xf88   :  { %v1904_v57 = vpop.f32.mrb[48].mxu1 }
 0xf89   :  { %v1905_v38 = vadd.f32 %v1904_v57, %v1837_v6  ;;  %v4436_v48 = vpop.f32.mrb[49].mxu1 }
 0xf8b   :  { %v5692_v25 = vadd.f32 %v1905_v38, %v5565_v19 }
 0xf8c   :  { %v1909_v49 = vpop.f32.mrb[50].mxu1 }
 0xf8d   :  { %v1910_v50 = vadd.f32 %v1909_v49, %v1837_v6  ;;  %v4439_v52 = vpop.f32.mrb[51].mxu1  ;;  %v1949_v60 = vsel %vm170_vm2, %v5692_v25, 0.0 }
 0xf8e   :  { %1950 = vadd.xlane.f32.xlu0 %v1949_v60 }
 0xf8f   :  { %v5697_v62 = vadd.f32 %v1910_v50, %v5570_v56 }
 0xf90   :  { %v1914_v27 = vpop.f32.mrb[52].mxu1 }
 0xf91   :  { %v1915_v63 = vadd.f32 %v1914_v27, %v1837_v6  ;;  %v4442_v2 = vpop.f32.mrb[53].mxu1  ;;  %v1952_v58 = vsel %vm170_vm2, %v5697_v62, 0.0  ;;  %v1998_v6 = vrot.slane %v5741_v44, %v5234_v12 }
 0xf92   :  { %1953 = vadd.xlane.f32.xlu1 %v1952_v58 }
 0xf93   :  { %v5702_v19 = vadd.f32 %v1915_v63, %v5575_v35 }
 0xf95   :  { %v1955_v4 = vsel %vm177_vm3, %v5702_v19, 0.0 }
 0xf96   :  { %1956 = vadd.xlane.f32.xlu0 %v1955_v4  ;;  %v2005_v4 = vrot.slane %v5741_v44, %v5250_v28 }
0x101b   :  { %v1951_v53 = vpop.xlane.xlu0 %1950 }
0x101c   :  { %v1958_v13 = vmul.f32 0.03125, %v1951_v53 }
0x101e   :  { %v1961_v14 = vsub.f32 %v5692_v25, %v1958_v13 }
0x101f   :  { %v1954_v56 = vpop.xlane.xlu1 %1953 }
0x1020   :  { %v1959_v15 = vmul.f32 0.03125, %v1954_v56  ;;  %v1964_v45 = vmul.f32 %v1961_v14, %v1961_v14 }
0x1022   :  { %v1962_v16 = vsub.f32 %v5697_v62, %v1959_v15  ;;  %v1967_v1 = vsel %vm170_vm2, %v1964_v45, 0.0 }
0x1023   :  { %1968 = vadd.xlane.f32.xlu1 %v1967_v1  ;;  %v1957_v17 = vpop.xlane.xlu0 %1956 }
0x1024   :  { %v1960_v18 = vmul.f32 0.03125, %v1957_v17  ;;  %v1965_v35 = vmul.f32 %v1962_v16, %v1962_v16 }
0x1026   :  { %v1963_v20 = vsub.f32 %v5702_v19, %v1960_v18  ;;  %v1970_v54 = vsel %vm170_vm2, %v1965_v35, 0.0 }
0x1027   :  { %1971 = vadd.xlane.f32.xlu0 %v1970_v54 }
0x1028   :  { %v1966_v34 = vmul.f32 %v1963_v20, %v1963_v20 }
0x102a   :  { %v1973_v21 = vsel %vm177_vm3, %v1966_v34, 0.0 }
0x102b   :  { %1974 = vadd.xlane.f32.xlu1 %v1973_v21 }
0x10b0   :  { %v1969_v31 = vpop.xlane.xlu1 %1968 }
0x10b1   :  { %v1976_v32 = vmul.f32 0.03125, %v1969_v31 }
0x10b3   :  { %v1979_v33 = vadd.f32 1e-05, %v1976_v32 }
0x10b4   :  { %v1972_v37 = vpop.xlane.xlu0 %1971 }
0x10b5   :  { %5001 = vrsqrt.f32 %v1979_v33  ;;  %v1977_v39 = vmul.f32 0.03125, %v1972_v37 }
0x10b7   :  { %v1980_v42 = vadd.f32 1e-05, %v1977_v39 }
0x10b8   :  { %v1975_v43 = vpop.xlane.xlu1 %1974 }
0x10b9   :  { %5003 = vrsqrt.f32 %v1980_v42  ;;  %v1978_v36 = vmul.f32 0.03125, %v1975_v43 }
0x10bb   :  { %v1981_v47 = vadd.f32 1e-05, %v1978_v36 }
0x10bd   :  { %5005 = vrsqrt.f32 %v1981_v47 }
0x10bf   :  { %v5002_v8 = vpop.eup %5001 }
0x10c0   :  { %v1985_v57 = vmul.f32 %v5002_v8, %v1961_v14 }
0x10c2   :  { %v1992_v38 = vmul.f32 %v1991_v5, %v1985_v57 }
0x10c3   :  { %v5004_v48 = vpop.eup %5003 }
0x10c4   :  { %v1999_v49 = vadd.f32 %v1998_v6, %v1992_v38  ;;  %v1986_v50 = vmul.f32 %v5004_v48, %v1962_v16 }
0x10c6   :  { %4452 = vmatmul.mubr.msk.f32.vlgmr.msra.gmra.mrb[42].mxu0 %vm170_vm2, %v1999_v49  ;;  %v1993_v52 = vmul.f32 %v1991_v5, %v1986_v50 }
0x10c7   :  { %v5006_v60 = vpop.eup %5005  ;;  %4454 = vmatprep.mubr.msk.f32.mxu0 %vm5077_vm0, %v5078_v3 }
0x10c8   :  { %v2000_v27 = vadd.f32 %v1998_v6, %v1993_v52  ;;  %v1987_v63 = vmul.f32 %v5006_v60, %v1963_v20 }
0x10ca   :  { %4455 = vmatmul.mubr.msk.f32.gmra.mrb[44].mxu0 %vm170_vm2, %v2000_v27  ;;  %v1994_v11 = vmul.f32 %v1991_v5, %v1987_v63 }
0x10cb   :  { %4457 = vmatprep.mubr.msk.f32.mxu0 %vm5077_vm0, %v5078_v3 }
0x10cc   :  { %v2001_v2 = vadd.f32 %v1998_v6, %v1994_v11 }
0x10ce   :  { %4458 = vmatmul.mubr.msk.f32.gmra.mrb[46].mxu0 %vm170_vm2, %v2001_v2 }
0x10cf   :  { %4466 = vmatprep.mubr.msk.f32.mxu0 %vm5077_vm0, %v5078_v3 }
0x1199   :  { %v2081_v58 = vpop.f32.mrb[42].mxu0 }
0x119a   :  { %v4453_v53 = vpop.f32.mrb[43].mxu0  ;;  %v5758_v14 = vadd.f32 %v2081_v58, %v2005_v4 }
0x119d   :  { %v2086_v13 = vpop.f32.mrb[44].mxu0 }
0x119e   :  { %v5760_v56 = vadd.f32 %v2086_v13, %v2005_v4  ;;  %v4456_v15 = vpop.f32.mrb[45].mxu0 }
0x11a0   :  { %v5764_v45 = vpack.i.bf16 %v5760_v56, %v5758_v14 }
0x11a1   :  { %v2091_v16 = vpop.f32.mrb[46].mxu0 }
0x11a2   :  { %v5766_v1 = vadd.f32 %v2091_v16, %v2005_v4  ;;  %4896 = vrot.lane.b32.xlu0 %v5764_v45, %s5080_s20  ;;  %v4459_v17 = vpop.f32.mrb[47].mxu0 }
0x11a4   :  { %2102 = vrot.lane.b32.xlu1 %v5766_v1, %s5080_s20 }
0x11a6   :  { %2338 = vrot.lane.b32.xlu0 %v5766_v1, %s5081_s21 }
0x11a8   :  { %4901 = vrot.lane.b32.xlu1 %v5764_v45, %s5081_s21 }
0x11aa   :  { %2330 = vrot.lane.b32.xlu0 %v5760_v56, %s5082_s22 }
0x11ac   :  { %2328 = vrot.lane.b32.xlu1 %v5758_v14, %s5082_s22 }
0x11b0   :  { %2332 = vrot.lane.b32.xlu1 %v5766_v1, %s5082_s22 }
0x1214   :  { %v4897_v18 = vpop.permute.xlu0 %4896 }
0x1215   :  { %v4899_v35 = vunpack.i.h.bf16 %v4897_v18  ;;  %v4898_v20 = vunpack.i.l.bf16 %v4897_v18 }
0x1216   :  { %v2103_v54 = vpop.permute.xlu1 %2102 }
0x1217   :  { %v4773_v34 = vpack.c.bf16 %v4899_v35, %v4898_v20 }
0x1218   :  { %v2339_v32 = vpop.permute.xlu0 %2338 }
0x1219   :  { %4775 = vmatpush3.bf16.xpose.msk.msra.mxu0 %vm5283_vm5, %v4773_v34 }
0x121a   :  { %v4902_v21 = vpop.permute.xlu1 %4901  ;;  %4464 = vmatprep.subr.mxu0 %v5078_v3 }
0x121b   :  { %v4904_v29 = vunpack.i.h.bf16 %v4902_v21  ;;  %v4903_v30 = vunpack.i.l.bf16 %v4902_v21 }
0x121c   :  { %v2331_v37 = vpop.permute.xlu0 %2330 }
0x121d   :  { %v4780_v31 = vpack.c.bf16 %v4904_v29, %v4903_v30 }
0x121e   :  { %v2329_v33 = vpop.permute.xlu1 %2328 }
0x121f   :  { %4782 = vmatpush3.bf16.xpose.msk.msra.mxu1 %vm5283_vm5, %v4780_v31 }
0x1220   :  { %4494 = vmatprep.subr.mxu1 %v5078_v3 }
0x1221   :  { %4465 = vmatpush3.xpose.msk.msra.mxu0 %vm337_vm4, %v2103_v54 }
0x1222   :  { %4776 = vmatprep.subr.bf16.mxu0 %v5076_v0  ;;  %v2333_v39 = vpop.permute.xlu1 %2332 }
0x1224   :  { %4467 = vmatmul.mubr.msk.f32.vlgmr.msra.gmra.mrb[48].mxu0 %vm337_vm4, %v5758_v14 }
0x1225   :  { %4469 = vmatprep.mubr.msk.f32.mxu0 %vm5077_vm0, %v5078_v3 }
0x1227   :  { %4495 = vmatpush3.xpose.msk.msra.mxu1 %vm337_vm4, %v2339_v32 }
0x1228   :  { %4470 = vmatmul.mubr.msk.f32.gmra.mrb[50].mxu0 %vm337_vm4, %v5760_v56  ;;  %4520 = vmatprep.subr.mxu1 %v5078_v3 }
0x1229   :  { %4472 = vmatprep.mubr.msk.f32.mxu0 %vm5077_vm0, %v5078_v3 }
0x122a   :  { %4497 = vmatmul.mubr.msk.f32.vlgmr.msra.gmra.mrb[54].mxu1 %vm337_vm4, %v2329_v33 }
0x122b   :  { %4499 = vmatprep.mubr.msk.f32.mxu1 %vm5077_vm0, %v5078_v3 }
0x122c   :  { %4473 = vmatmul.mubr.msk.f32.gmra.mrb[52].mxu0 %vm337_vm4, %v5766_v1 }
0x122d   :  { %4481 = vmatprep.mubr.msk.f32.mxu0 %vm5077_vm0, %v5078_v3 }
0x122e   :  { %4500 = vmatmul.mubr.msk.f32.gmra.mrb[56].mxu1 %vm337_vm4, %v2331_v37 }
0x122f   :  { %4502 = vmatprep.mubr.msk.f32.mxu1 %vm5077_vm0, %v5078_v3 }
0x1232   :  { %4503 = vmatmul.mubr.msk.f32.gmra.mrb[58].mxu1 %vm337_vm4, %v2333_v39 }
0x1233   :  { %4522 = vmatprep.mubr.msk.f32.mxu1 %vm5077_vm0, %v5078_v3 }
0x12f7   :  { %v2182_v42 = vpop.f32.mrb[48].mxu0 }
0x12f8   :  { %v2183_v43 = vadd.f32 %v2182_v42, %v5318_v55  ;;  %v4468_v36 = vpop.f32.mrb[49].mxu0 }
0x12fa   :  { %v2196_v47 = vsel %vm430_vm6, %v2183_v43, -inf }
0x12fb   :  { %2197 = vmax.xlane.f32.xlu0 %v2196_v47  ;;  %v2187_v5 = vpop.f32.mrb[50].mxu0 }
0x12fc   :  { %v2188_v8 = vadd.f32 %v2187_v5, %v5321_v61  ;;  %v4471_v6 = vpop.f32.mrb[51].mxu0 }
0x12fd   :  { %v2418_v57 = vpop.f32.mrb[54].mxu1 }
0x12fe   :  { %v4498_v38 = vpop.f32.mrb[55].mxu1  ;;  %v2199_v48 = vsel %vm430_vm6, %v2188_v8, -inf  ;;  %v2419_v27 = vadd.f32 %v2418_v57, %v5318_v55 }
0x12ff   :  { %2200 = vmax.xlane.f32.xlu1 %v2199_v48  ;;  %v2192_v49 = vpop.f32.mrb[52].mxu0 }
0x1300   :  { %v2193_v50 = vadd.f32 %v2192_v49, %v5325_v7  ;;  %v4474_v52 = vpop.f32.mrb[53].mxu0  ;;  %v2432_v15 = vsel %vm430_vm6, %v2419_v27, -inf }
0x1301   :  { %v2423_v60 = vpop.f32.mrb[56].mxu1 }
0x1302   :  { %v2424_v63 = vadd.f32 %v2423_v60, %v5321_v61  ;;  %v4501_v11 = vpop.f32.mrb[57].mxu1  ;;  %v2202_v2 = vsel %vm437_vm7, %v2193_v50, -inf }
0x1303   :  { %2203 = vmax.xlane.f32.xlu0 %v2202_v2 }
0x1304   :  { %v2435_v58 = vsel %vm430_vm6, %v2424_v63, -inf }
0x1305   :  { %v2428_v4 = vpop.f32.mrb[58].mxu1  ;;  %2436 = vmax.xlane.f32.xlu1 %v2435_v58 }
0x1306   :  { %v2429_v53 = vadd.f32 %v2428_v4, %v5325_v7  ;;  %v4504_v13 = vpop.f32.mrb[59].mxu1 }
0x1307   :  { %2433 = vmax.xlane.f32.xlu0 %v2432_v15 }
0x1308   :  { %v2438_v16 = vsel %vm437_vm7, %v2429_v53, -inf }
0x130b   :  { %2439 = vmax.xlane.f32.xlu0 %v2438_v16 }
0x1316   :  { %2233 = vrot.lane.b32.xlu1 %v5766_v1, %s5084_s24 }
0x1321   :  { %4906 = vrot.lane.b32.xlu0 %v5764_v45, %s5084_s24 }
0x1388   :  { %v2198_v17 = vpop.xlane.xlu0 %2197 }
0x1389   :  { %v2205_v18 = vsub.f32 %v2183_v43, %v2198_v17 }
0x138b   :  { %v2208_v35 = vmul.f32 1.442695, %v2205_v18 }
0x138c   :  { %v2201_v20 = vpop.xlane.xlu1 %2200 }
0x138d   :  { %5007 = vpow2.f32 %v2208_v35  ;;  %v2206_v29 = vsub.f32 %v2188_v8, %v2201_v20 }
0x138f   :  { %v2210_v42 = vmul.f32 1.442695, %v2206_v29 }
0x1390   :  { %v2204_v54 = vpop.xlane.xlu0 %2203 }
0x1391   :  { %v2207_v34 = vsub.f32 %v2193_v50, %v2204_v54 }
0x1392   :  { %v2437_v21 = vpop.xlane.xlu1 %2436 }
0x1393   :  { %v2442_v30 = vsub.f32 %v2424_v63, %v2437_v21  ;;  %v2212_v31 = vmul.f32 1.442695, %v2207_v34 }
0x1394   :  { %v2434_v32 = vpop.xlane.xlu0 %2433 }
0x1395   :  { %v2446_v33 = vmul.f32 1.442695, %v2442_v30  ;;  %v2441_v37 = vsub.f32 %v2419_v27, %v2434_v32 }
0x1396   :  { %v2234_v27 = vpop.permute.xlu1 %2233 }
0x1397   :  { %v5008_v39 = vpop.eup %5007  ;;  %5009 = vpow2.f32 %v2446_v33  ;;  %v2444_v36 = vmul.f32 1.442695, %v2441_v37 }
0x1398   :  { %5011 = vpow2.f32 %v2212_v31  ;;  %v2440_v47 = vpop.xlane.xlu0 %2439  ;;  %v2214_v43 = vsel %vm430_vm6, %v5008_v39, 0.0 }
0x1399   :  { %5013 = vpow2.f32 %v2444_v36  ;;  %v2443_v5 = vsub.f32 %v2429_v53, %v2440_v47  ;;  %2215 = vadd.xlane.f32.xlu1 %v2214_v43 }
0x139a   :  { %5015 = vpow2.f32 %v2210_v42 }
0x139b   :  { %v2448_v6 = vmul.f32 1.442695, %v2443_v5 }
0x139c   :  { %v4907_v57 = vpop.permute.xlu0 %4906 }
0x139d   :  { %5017 = vpow2.f32 %v2448_v6  ;;  %v4909_v8 = vunpack.i.h.bf16 %v4907_v57  ;;  %v4908_v38 = vunpack.i.l.bf16 %v4907_v57 }
0x139f   :  { %v4777_v48 = vpack.c.bf16 %v4909_v8, %v4908_v38 }
0x13a1   :  { %v5830_v49 = vpop.eup %5009  ;;  %4778 = vmatpush3.bf16.msra.mxu0 %v4777_v48 }
0x13a2   :  { %v5012_v50 = vpop.eup %5011  ;;  %v2453_v52 = vsel %vm430_vm6, %v5830_v49, 0.0  ;;  %4479 = vmatprep.subr.mxu0 %v5078_v3 }
0x13a3   :  { %v5014_v60 = vpop.eup %5013  ;;  %2454 = vadd.xlane.f32.xlu1 %v2453_v52  ;;  %v2220_v2 = vsel %vm437_vm7, %v5012_v50, 0.0 }
0x13a4   :  { %v2450_v63 = vsel %vm430_vm6, %v5014_v60, 0.0  ;;  %v5016_v11 = vpop.eup %5015 }
0x13a5   :  { %2451 = vadd.xlane.f32.xlu0 %v2450_v63  ;;  %4480 = vmatpush3.msk.msra.mxu0 %vm482_vm8, %v2234_v27  ;;  %v2217_v4 = vsel %vm430_vm6, %v5016_v11, 0.0 }
0x13a6   :  { %4783 = vmatprep.subr.bf16.mxu0 %v5076_v0 }
0x13a7   :  { %v5018_v58 = vpop.eup %5017  ;;  %2221 = vadd.xlane.f32.xlu1 %v2220_v2 }
0x13a8   :  { %v2456_v53 = vsel %vm437_vm7, %v5018_v58, 0.0 }
0x13a9   :  { %2218 = vadd.xlane.f32.xlu0 %v2217_v4 }
0x13ab   :  { %2457 = vadd.xlane.f32.xlu1 %v2456_v53 }
0x13bc   :  { %2469 = vrot.lane.b32.xlu1 %v5766_v1, %s5085_s25 }
0x13bf   :  { %4911 = vrot.lane.b32.xlu0 %v5764_v45, %s5085_s25 }
0x13c0   :  { %4916 = vrot.lane.b32.xlu1 %v5764_v45, %s5087_s27 }
0x13c3   :  { %2565 = vrot.lane.b32.xlu0 %v5720_v26, %s5086_s26 }
0x13c4   :  { %2750 = vrot.lane.b32.xlu1 %v5758_v14, %s5088_s0 }
0x13c7   :  { %2760 = vrot.lane.b32.xlu0 %v5766_v1, %s5087_s27 }
0x13c8   :  { %2754 = vrot.lane.b32.xlu1 %v5766_v1, %s5088_s0 }
0x13cb   :  { %2752 = vrot.lane.b32.xlu0 %v5760_v56, %s5088_s0 }
0x1426   :  { %v2216_v13 = vpop.xlane.xlu1 %2215 }
0x1427   :  { %5019 = vrcp.f32 %v2216_v13 }
0x1430   :  { %v2455_v15 = vpop.xlane.xlu1 %2454 }
0x1431   :  { %v5020_v16 = vpop.eup %5019 }
0x1432   :  { %v2226_v17 = vmul.f32 %v5020_v16, %v5008_v39  ;;  %v2452_v18 = vpop.xlane.xlu0 %2451 }
0x1434   :  { %4482 = vmatmul.mubr.msk.f32.vlgmr.msra.gmra.mrb[54].mxu0 %vm430_vm6, %v2226_v17  ;;  %v2222_v26 = vpop.xlane.xlu1 %2221 }
0x1435   :  { %4484 = vmatprep.mubr.msk.f32.mxu0 %vm5077_vm0, %v5078_v3 }
0x1436   :  { %v2219_v35 = vpop.xlane.xlu0 %2218 }
0x1437   :  { %5021 = vrcp.f32 %v2219_v35 }
0x1438   :  { %5023 = vrcp.f32 %v2222_v26  ;;  %v2458_v21 = vpop.xlane.xlu1 %2457 }
0x1439   :  { %5025 = vrcp.f32 %v2452_v18 }
0x143a   :  { %v4912_v20 = vpop.permute.xlu0 %4911  ;;  %5027 = vrcp.f32 %v2455_v15 }
0x143b   :  { %v4914_v54 = vunpack.i.h.bf16 %v4912_v20  ;;  %v4913_v34 = vunpack.i.l.bf16 %v4912_v20  ;;  %5029 = vrcp.f32 %v2458_v21 }
0x143c   :  { %v2470_v32 = vpop.permute.xlu1 %2469 }
0x143d   :  { %v4784_v29 = vpack.c.bf16 %v4914_v54, %v4913_v34 }
0x143e   :  { %v2566_v30 = vpop.permute.xlu0 %2565 }
0x143f   :  { %4785 = vmatpush3.bf16.msra.mxu0 %v4784_v29  ;;  %4521 = vmatpush3.msra.mxu1 %v2566_v30 }
0x1440   :  { %4509 = vmatprep.subr.mxu0 %v5078_v3  ;;  %4786 = vmatprep.subr.bf16.mxu1 %v5076_v0  ;;  %v4917_v48 = vpop.permute.xlu1 %4916 }
0x1441   :  { %v5022_v31 = vpop.eup %5021  ;;  %v4918_v52 = vunpack.i.l.bf16 %v4917_v48 }
0x1442   :  { %v2227_v33 = vmul.f32 %v5022_v31, %v5016_v11  ;;  %v5024_v37 = vpop.eup %5023  ;;  %v2761_v13 = vpop.permute.xlu0 %2760 }
0x1443   :  { %4510 = vmatpush3.msk.msra.mxu0 %vm482_vm8, %v2470_v32  ;;  %v2228_v39 = vmul.f32 %v5024_v37, %v5012_v50  ;;  %v5026_v42 = vpop.eup %5025 }
0x1444   :  { %4485 = vmatmul.mubr.msk.f32.gmra.mrb[56].mxu0 %vm430_vm6, %v2227_v33  ;;  %4531 = vmatprep.subr.mxu0 %v5078_v3  ;;  %v2462_v36 = vmul.f32 %v5026_v42, %v5014_v60  ;;  %v5028_v47 = vpop.eup %5027  ;;  %v2751_v16 = vpop.permute.xlu1 %2750 }
0x1445   :  { %4487 = vmatprep.mubr.msk.f32.mxu0 %vm5077_vm0, %v5078_v3  ;;  %v2463_v43 = vmul.f32 %v5028_v47, %v5830_v49  ;;  %v5030_v5 = vpop.eup %5029  ;;  %v4919_v49 = vunpack.i.h.bf16 %v4917_v48 }
0x1446   :  { %v2464_v6 = vmul.f32 %v5030_v5, %v5018_v58  ;;  %v2753_v17 = vpop.permute.xlu0 %2752 }
0x1447   :  { %v4787_v63 = vpack.c.bf16 %v4919_v49, %v4918_v52 }
0x1448   :  { %4488 = vmatmul.mubr.msk.f32.gmra.mrb[58].mxu0 %vm430_vm6, %v2228_v39  ;;  %v2755_v18 = vpop.permute.xlu1 %2754 }
0x1449   :  { %4511 = vmatprep.mubr.msk.f32.mxu0 %vm5077_vm0, %v5078_v3 }
0x144c   :  { %4512 = vmatmul.mubr.msk.f32.vlgmr.msra.gmra.mrb[60].mxu0 %vm430_vm6, %v2462_v36 }
0x144d   :  { %4514 = vmatprep.mubr.msk.f32.mxu0 %vm5077_vm0, %v5078_v3 }
0x1450   :  { %4515 = vmatmul.mubr.msk.f32.gmra.mrb[62].mxu0 %vm430_vm6, %v2463_v43 }
0x1451   :  { %4517 = vmatprep.mubr.msk.f32.mxu0 %vm5077_vm0, %v5078_v3 }
0x1454   :  { %4518 = vmatmul.mubr.msk.f32.gmra.mrb[64].mxu0 %vm430_vm6, %v2464_v6 }
0x1455   :  { %4533 = vmatprep.mubr.msk.f32.mxu0 %vm5077_vm0, %v5078_v3 }
0x1507   :  { %v5880_v57 = vpop.f32.mrb[54].mxu0 }
0x1508   :  { %v4483_v8 = vpop.f32.mrb[55].mxu0 }
0x1517   :  { %v5882_v38 = vpop.f32.mrb[56].mxu0 }
0x1518   :  { %v4486_v50 = vpop.f32.mrb[57].mxu0 }
0x151b   :  { %v5884_v60 = vpop.f32.mrb[58].mxu0 }
0x151c   :  { %v4489_v27 = vpop.f32.mrb[59].mxu0 }
0x151f   :  { %v2550_v11 = vpop.f32.mrb[60].mxu0 }
0x1520   :  { %v4513_v2 = vpop.f32.mrb[61].mxu0  ;;  %4523 = vmatmul.mubr.msk.f32.vlgmr.msra.gmra.mrb[60].mxu1 %vm337_vm4, %v2550_v11 }
0x1521   :  { %4789 = vmatpush3.bf16.xpose.msk.msra.mxu1 %vm5283_vm5, %v4787_v63  ;;  %4525 = vmatprep.mubr.msk.f32.mxu1 %vm5077_vm0, %v5078_v3 }
0x1522   :  { %4546 = vmatprep.subr.mxu1 %v5078_v3 }
0x1523   :  { %v2555_v58 = vpop.f32.mrb[62].mxu0 }
0x1524   :  { %v4516_v4 = vpop.f32.mrb[63].mxu0  ;;  %4526 = vmatmul.mubr.msk.f32.gmra.mrb[62].mxu1 %vm337_vm4, %v2555_v58 }
0x1525   :  { %4528 = vmatprep.mubr.msk.f32.mxu1 %vm5077_vm0, %v5078_v3 }
0x1527   :  { %v2560_v53 = vpop.f32.mrb[64].mxu0 }
0x1528   :  { %v4519_v15 = vpop.f32.mrb[65].mxu0  ;;  %4529 = vmatmul.mubr.msk.f32.gmra.mrb[64].mxu1 %vm337_vm4, %v2560_v53 }
0x1529   :  { %4547 = vmatpush3.xpose.msk.msra.mxu1 %vm337_vm4, %v2761_v13  ;;  %4548 = vmatprep.mubr.msk.f32.mxu1 %vm5077_vm0, %v5078_v3 }
0x152a   :  { %4572 = vmatprep.subr.mxu1 %v5078_v3 }
0x152c   :  { %4549 = vmatmul.mubr.msk.f32.vlgmr.msra.gmra.mrb[66].mxu1 %vm337_vm4, %v2751_v16 }
0x152d   :  { %4551 = vmatprep.mubr.msk.f32.mxu1 %vm5077_vm0, %v5078_v3 }
0x1530   :  { %4552 = vmatmul.mubr.msk.f32.gmra.mrb[68].mxu1 %vm337_vm4, %v2753_v17 }
0x1531   :  { %4554 = vmatprep.mubr.msk.f32.mxu1 %vm5077_vm0, %v5078_v3 }
0x1534   :  { %4555 = vmatmul.mubr.msk.f32.gmra.mrb[70].mxu1 %vm337_vm4, %v2755_v18 }
0x1535   :  { %4574 = vmatprep.mubr.msk.f32.mxu1 %vm5077_vm0, %v5078_v3 }
0x15f3   :  { %v5909_v26 = vpop.f32.mrb[60].mxu1 }
0x15f4   :  { %v4524_v35 = vpop.f32.mrb[61].mxu1 }
0x15f7   :  { %v5911_v20 = vpop.f32.mrb[62].mxu1 }
0x15f8   :  { %v4527_v54 = vpop.f32.mrb[63].mxu1 }
0x15fb   :  { %v5913_v34 = vpop.f32.mrb[64].mxu1 }
0x15fc   :  { %v4530_v21 = vpop.f32.mrb[65].mxu1 }
0x15ff   :  { %v2840_v29 = vpop.f32.mrb[66].mxu1 }
0x1600   :  { %v2841_v30 = vadd.f32 %v2840_v29, %v5318_v55  ;;  %v4550_v31 = vpop.f32.mrb[67].mxu1 }
0x1602   :  { %v2854_v32 = vsel %vm430_vm6, %v2841_v30, -inf }
0x1603   :  { %2855 = vmax.xlane.f32.xlu0 %v2854_v32  ;;  %v2845_v33 = vpop.f32.mrb[68].mxu1 }
0x1604   :  { %v2846_v37 = vadd.f32 %v2845_v33, %v5321_v61  ;;  %v4553_v39 = vpop.f32.mrb[69].mxu1 }
0x1606   :  { %v2857_v42 = vsel %vm430_vm6, %v2846_v37, -inf }
0x1607   :  { %2858 = vmax.xlane.f32.xlu1 %v2857_v42  ;;  %v2850_v36 = vpop.f32.mrb[70].mxu1 }
0x1608   :  { %v2851_v47 = vadd.f32 %v2850_v36, %v5325_v7  ;;  %v4556_v43 = vpop.f32.mrb[71].mxu1 }
0x160a   :  { %v2860_v5 = vsel %vm437_vm7, %v2851_v47, -inf }
0x160b   :  { %2861 = vmax.xlane.f32.xlu0 %v2860_v5 }
0x1618   :  { %2658 = vrot.lane.b32.xlu1 %v5715_v24, %s5086_s26 }
0x161c   :  { %2891 = vrot.lane.b32.xlu1 %v5766_v1, %s5089_s28 }
0x1620   :  { %4926 = vrot.lane.b32.xlu1 %v5764_v45, %s5090_s29 }
0x1690   :  { %v2856_v6 = vpop.xlane.xlu0 %2855 }
0x1691   :  { %v2863_v8 = vsub.f32 %v2841_v30, %v2856_v6 }
0x1693   :  { %v2866_v48 = vmul.f32 1.442695, %v2863_v8 }
0x1694   :  { %v2859_v50 = vpop.xlane.xlu1 %2858 }
0x1695   :  { %5031 = vpow2.f32 %v2866_v48  ;;  %v2864_v49 = vsub.f32 %v2846_v37, %v2859_v50 }
0x1697   :  { %v2868_v52 = vmul.f32 1.442695, %v2864_v49 }
0x1698   :  { %v2659_v27 = vpop.permute.xlu1 %2658 }
0x1699   :  { %5033 = vpow2.f32 %v2868_v52  ;;  %4532 = vmatpush3.msra.mxu0 %v2659_v27 }
0x169a   :  { %4534 = vmatmul.mubr.msk.f32.vlgmr.msra.gmra.mrb[66].mxu0 %vm337_vm4, %v5880_v57  ;;  %4790 = vmatprep.subr.bf16.mxu0 %v5076_v0 }
0x169b   :  { %4536 = vmatprep.mubr.msk.f32.mxu0 %vm5077_vm0, %v5078_v3 }
0x169e   :  { %4537 = vmatmul.mubr.msk.f32.gmra.mrb[68].mxu0 %vm337_vm4, %v5882_v38  ;;  %v2862_v38 = vpop.xlane.xlu0 %2861 }
0x169f   :  { %v5032_v24 = vpop.eup %5031  ;;  %4539 = vmatprep.mubr.msk.f32.mxu0 %vm5077_vm0, %v5078_v3  ;;  %v2865_v2 = vsub.f32 %v2851_v47, %v2862_v38 }
0x16a0   :  { %v2872_v63 = vsel %vm430_vm6, %v5032_v24, 0.0 }
0x16a1   :  { %2873 = vadd.xlane.f32.xlu0 %v2872_v63  ;;  %v2870_v58 = vmul.f32 1.442695, %v2865_v2 }
0x16a2   :  { %4540 = vmatmul.mubr.msk.f32.gmra.mrb[70].mxu0 %vm337_vm4, %v5884_v60 }
0x16a3   :  { %v5034_v11 = vpop.eup %5033  ;;  %4563 = vmatprep.mubr.msk.f32.mxu0 %vm5077_vm0, %v5078_v3  ;;  %5035 = vpow2.f32 %v2870_v58 }
0x16a4   :  { %v2875_v57 = vsel %vm430_vm6, %v5034_v11, 0.0 }
0x16a5   :  { %2876 = vadd.xlane.f32.xlu1 %v2875_v57 }
0x16ad   :  { %v5036_v60 = vpop.eup %5035 }
0x16ae   :  { %v2878_v4 = vsel %vm437_vm7, %v5036_v60, 0.0 }
0x16b6   :  { %3082 = vrot.lane.b32.xlu1 %v5758_v14, %s5091_s30  ;;  %v2892_v14 = vpop.permute.xlu1 %2891 }
0x16b7   :  { %4921 = vrot.lane.b32.xlu0 %v5764_v45, %s5089_s28 }
0x16ba   :  { %3086 = vrot.lane.b32.xlu1 %v5766_v1, %s5091_s30  ;;  %v4927_v53 = vpop.permute.xlu1 %4926 }
0x16bb   :  { %v4929_v29 = vunpack.i.h.bf16 %v4927_v53  ;;  %v4928_v30 = vunpack.i.l.bf16 %v4927_v53 }
0x16bd   :  { %v4794_v32 = vpack.c.bf16 %v4929_v29, %v4928_v30 }
0x16d6   :  { %2879 = vadd.xlane.f32.xlu0 %v2878_v4 }
0x16ec   :  { %3092 = vrot.lane.b32.xlu0 %v5766_v1, %s5090_s29 }
0x16f0   :  { %3084 = vrot.lane.b32.xlu0 %v5760_v56, %s5091_s30 }
0x172e   :  { %v2874_v13 = vpop.xlane.xlu0 %2873 }
0x172f   :  { %5037 = vrcp.f32 %v2874_v13 }
0x1732   :  { %v2877_v15 = vpop.xlane.xlu1 %2876  ;;  %v4922_v16 = vpop.permute.xlu0 %4921 }
0x1733   :  { %5039 = vrcp.f32 %v2877_v15  ;;  %v4924_v17 = vunpack.i.h.bf16 %v4922_v16  ;;  %v4923_v18 = vunpack.i.l.bf16 %v4922_v16 }
0x1735   :  { %v4791_v35 = vpack.c.bf16 %v4924_v17, %v4923_v18 }
0x1736   :  { %v3083_v8 = vpop.permute.xlu1 %3082 }
0x1737   :  { %4792 = vmatpush3.bf16.msra.mxu0 %v4791_v35 }
0x1738   :  { %4561 = vmatprep.subr.mxu0 %v5078_v3 }
0x1739   :  { %v5038_v54 = vpop.eup %5037 }
0x173a   :  { %v2884_v21 = vmul.f32 %v5038_v54, %v5032_v24 }
0x173b   :  { %4562 = vmatpush3.msk.msra.mxu0 %vm482_vm8, %v2892_v14 }
0x173c   :  { %4564 = vmatmul.mubr.msk.f32.vlgmr.msra.gmra.mrb[72].mxu0 %vm430_vm6, %v2884_v21  ;;  %4793 = vmatprep.subr.bf16.mxu0 %v5076_v0 }
0x173d   :  { %v5040_v56 = vpop.eup %5039  ;;  %4566 = vmatprep.mubr.msk.f32.mxu0 %vm5077_vm0, %v5078_v3 }
0x173e   :  { %v2885_v31 = vmul.f32 %v5040_v56, %v5034_v11 }
0x1740   :  { %4567 = vmatmul.mubr.msk.f32.gmra.mrb[74].mxu0 %vm430_vm6, %v2885_v31 }
0x1741   :  { %4569 = vmatprep.mubr.msk.f32.mxu0 %vm5077_vm0, %v5078_v3 }
0x1742   :  { %4796 = vmatpush3.bf16.xpose.msk.msra.mxu0 %vm5283_vm5, %v4794_v32 }
0x1743   :  { %4587 = vmatprep.subr.mxu0 %v5078_v3 }
0x1763   :  { %v2880_v33 = vpop.xlane.xlu0 %2879 }
0x1764   :  { %5041 = vrcp.f32 %v2880_v33 }
0x1767   :  { %v3093_v37 = vpop.permute.xlu0 %3092 }
0x1768   :  { %4588 = vmatpush3.xpose.msk.msra.mxu0 %vm337_vm4, %v3093_v37 }
0x1769   :  { %4613 = vmatprep.subr.mxu0 %v5078_v3 }
0x176b   :  { %v3085_v49 = vpop.permute.xlu0 %3084 }
0x176d   :  { %v2736_v39 = vpop.f32.mrb[66].mxu0 }
0x176e   :  { %v5042_v42 = vpop.eup %5041  ;;  %v5968_v36 = vadd.f32 %v2736_v39, %v5909_v26  ;;  %v4535_v47 = vpop.f32.mrb[67].mxu0 }
0x176f   :  { %v2886_v43 = vmul.f32 %v5042_v42, %v5036_v60 }
0x1771   :  { %v2741_v5 = vpop.f32.mrb[68].mxu0  ;;  %4570 = vmatmul.mubr.msk.f32.gmra.mrb[76].mxu0 %vm430_vm6, %v2886_v43 }
0x1772   :  { %v5972_v46 = vadd.f32 %v2741_v5, %v5911_v20  ;;  %v4538_v6 = vpop.f32.mrb[69].mxu0  ;;  %4589 = vmatprep.mubr.msk.f32.mxu0 %vm5077_vm0, %v5078_v3  ;;  %v3087_v20 = vpop.permute.xlu1 %3086 }
0x1775   :  { %v2746_v48 = vpop.f32.mrb[70].mxu0  ;;  %4590 = vmatmul.mubr.msk.f32.vlgmr.msra.gmra.mrb[78].mxu0 %vm337_vm4, %v3083_v8 }
0x1776   :  { %v5978_v50 = vadd.f32 %v2746_v48, %v5913_v34  ;;  %v4541_v26 = vpop.f32.mrb[71].mxu0  ;;  %4592 = vmatprep.mubr.msk.f32.mxu0 %vm5077_vm0, %v5078_v3 }
0x1779   :  { %4593 = vmatmul.mubr.msk.f32.gmra.mrb[80].mxu0 %vm337_vm4, %v3085_v49 }
0x177a   :  { %4595 = vmatprep.mubr.msk.f32.mxu0 %vm5077_vm0, %v5078_v3 }
0x177d   :  { %4596 = vmatmul.mubr.msk.f32.gmra.mrb[82].mxu0 %vm337_vm4, %v3087_v20 }
0x177e   :  { %4615 = vmatprep.mubr.msk.f32.mxu0 %vm5077_vm0, %v5078_v3 }
0x180f   :  { %v2972_v52 = vpop.f32.mrb[72].mxu0 }
0x1810   :  { %v4565_v27 = vpop.f32.mrb[73].mxu0 }
0x1813   :  { %v2977_v34 = vpop.f32.mrb[74].mxu0 }
0x1814   :  { %v4568_v24 = vpop.f32.mrb[75].mxu0 }
0x1844   :  { %v2982_v63 = vpop.f32.mrb[76].mxu0 }
0x1845   :  { %v4571_v11 = vpop.f32.mrb[77].mxu0 }
0x1848   :  { %v3172_v57 = vpop.f32.mrb[78].mxu0 }
0x1849   :  { %v3173_v38 = vadd.f32 %v3172_v57, %v5318_v55  ;;  %v4591_v2 = vpop.f32.mrb[79].mxu0 }
0x184b   :  { %v3186_v58 = vsel %vm430_vm6, %v3173_v38, -inf }
0x184c   :  { %3187 = vmax.xlane.f32.xlu0 %v3186_v58  ;;  %v3177_v60 = vpop.f32.mrb[80].mxu0 }
0x184d   :  { %v3178_v4 = vadd.f32 %v3177_v60, %v5321_v61  ;;  %v4594_v14 = vpop.f32.mrb[81].mxu0 }
0x184f   :  { %v3189_v53 = vsel %vm430_vm6, %v3178_v4, -inf }
0x1850   :  { %3190 = vmax.xlane.f32.xlu1 %v3189_v53  ;;  %v3182_v13 = vpop.f32.mrb[82].mxu0 }
0x1851   :  { %v3183_v15 = vadd.f32 %v3182_v13, %v5325_v7  ;;  %v4597_v16 = vpop.f32.mrb[83].mxu0 }
0x1852   :  { %v3420_v16 = vrot.slane %v5741_v44, %v5560_v22 }
0x1853   :  { %v3192_v17 = vsel %vm437_vm7, %v3183_v15, -inf }
0x1854   :  { %3193 = vmax.xlane.f32.xlu0 %v3192_v17 }
0x1861   :  { %2987 = vrot.lane.b32.xlu1 %v5728_v9, %s5086_s26 }
0x18d9   :  { %v3188_v55 = vpop.xlane.xlu0 %3187 }
0x18da   :  { %v3195_v18 = vsub.f32 %v3173_v38, %v3188_v55 }
0x18dc   :  { %v3198_v35 = vmul.f32 1.442695, %v3195_v18 }
0x18dd   :  { %v3191_v54 = vpop.xlane.xlu1 %3190 }
0x18de   :  { %5043 = vpow2.f32 %v3198_v35  ;;  %v3196_v61 = vsub.f32 %v3178_v4, %v3191_v54 }
0x18e0   :  { %v3200_v21 = vmul.f32 1.442695, %v3196_v61 }
0x18e1   :  { %v2988_v29 = vpop.permute.xlu1 %2987  ;;  %v3194_v30 = vpop.xlane.xlu0 %3193 }
0x18e2   :  { %5045 = vpow2.f32 %v3200_v21  ;;  %v3197_v56 = vsub.f32 %v3183_v15, %v3194_v30  ;;  %4573 = vmatpush3.msra.mxu1 %v2988_v29 }
0x18e3   :  { %4575 = vmatmul.mubr.msk.f32.vlgmr.msra.gmra.mrb[72].mxu1 %vm337_vm4, %v2972_v52  ;;  %4797 = vmatprep.subr.bf16.mxu1 %v5076_v0 }
0x18e4   :  { %v3202_v7 = vmul.f32 1.442695, %v3197_v56  ;;  %4577 = vmatprep.mubr.msk.f32.mxu1 %vm5077_vm0, %v5078_v3 }
0x18e6   :  { %5047 = vpow2.f32 %v3202_v7 }
0x18e7   :  { %4578 = vmatmul.mubr.msk.f32.gmra.mrb[74].mxu1 %vm337_vm4, %v2977_v34 }
0x18e8   :  { %v5044_v9 = vpop.eup %5043  ;;  %4580 = vmatprep.mubr.msk.f32.mxu1 %vm5077_vm0, %v5078_v3 }
0x18e9   :  { %v3204_v31 = vsel %vm430_vm6, %v5044_v9, 0.0 }
0x18ea   :  { %3205 = vadd.xlane.f32.xlu0 %v3204_v31 }
0x18eb   :  { %4581 = vmatmul.mubr.msk.f32.gmra.mrb[76].mxu1 %vm337_vm4, %v2982_v63 }
0x18ec   :  { %v5046_v32 = vpop.eup %5045  ;;  %4604 = vmatprep.mubr.msk.f32.mxu1 %vm5077_vm0, %v5078_v3 }
0x18ed   :  { %v3207_v33 = vsel %vm430_vm6, %v5046_v32, 0.0 }
0x18ee   :  { %3208 = vadd.xlane.f32.xlu1 %v3207_v33 }
0x18f0   :  { %v5048_v37 = vpop.eup %5047 }
0x18f1   :  { %v3210_v39 = vsel %vm437_vm7, %v5048_v37, 0.0 }
0x18f2   :  { %3211 = vadd.xlane.f32.xlu0 %v3210_v39 }
0x18ff   :  { %3223 = vrot.lane.b32.xlu1 %v5766_v1, %s5092_s6 }
0x1903   :  { %3319 = vrot.lane.b32.xlu1 %v5733_v23, %s5086_s26 }
0x1908   :  { %4931 = vrot.lane.b32.xlu0 %v5764_v45, %s5092_s6 }
0x1977   :  { %v3206_v42 = vpop.xlane.xlu0 %3205 }
0x1978   :  { %5049 = vrcp.f32 %v3206_v42 }
0x197b   :  { %v3209_v47 = vpop.xlane.xlu1 %3208 }
0x197c   :  { %5051 = vrcp.f32 %v3209_v47 }
0x197f   :  { %v3224_v43 = vpop.permute.xlu1 %3223  ;;  %v3212_v5 = vpop.xlane.xlu0 %3211 }
0x1980   :  { %5053 = vrcp.f32 %v3212_v5 }
0x1982   :  { %v5050_v49 = vpop.eup %5049 }
0x1983   :  { %v4932_v6 = vpop.permute.xlu0 %4931  ;;  %v3320_v8 = vpop.permute.xlu1 %3319  ;;  %v3216_v23 = vmul.f32 %v5050_v49, %v5044_v9 }
0x1984   :  { %v4934_v48 = vunpack.i.h.bf16 %v4932_v6  ;;  %v4933_v26 = vunpack.i.l.bf16 %v4932_v6  ;;  %4614 = vmatpush3.msra.mxu0 %v3320_v8 }
0x1985   :  { %4806 = vmatprep.subr.bf16.mxu0 %v5076_v0 }
0x1986   :  { %v4798_v1 = vpack.c.bf16 %v4934_v48, %v4933_v26  ;;  %v5052_v45 = vpop.eup %5051 }
0x1987   :  { %v3217_v20 = vmul.f32 %v5052_v45, %v5046_v32  ;;  %v3902_v45 = vld [vmem:[%s6210_s2 + $0x58] sm:$0xff] }
0x1988   :  { %4799 = vmatpush3.bf16.msra.mxu1 %v4798_v1 }
0x1989   :  { %4602 = vmatprep.subr.mxu1 %v5078_v3 }
0x198a   :  { %v5054_v52 = vpop.eup %5053 }
0x198b   :  { %v3218_v27 = vmul.f32 %v5054_v52, %v5048_v37  ;;  %v3904_v52 = vld [vmem:[%s6210_s2 + $0x68] sm:$0xff] }
0x198c   :  { %4603 = vmatpush3.msk.msra.mxu1 %vm482_vm8, %v3224_v43 }
0x198d   :  { %4605 = vmatmul.mubr.msk.f32.vlgmr.msra.gmra.mrb[78].mxu1 %vm430_vm6, %v3216_v23  ;;  %4800 = vmatprep.subr.bf16.mxu1 %v5076_v0  ;;  %v3900_v23 = vld [vmem:[%s6210_s2 + $0x48] sm:$0xff] }
0x198e   :  { %4607 = vmatprep.mubr.msk.f32.mxu1 %vm5077_vm0, %v5078_v3 }
0x1991   :  { %4608 = vmatmul.mubr.msk.f32.gmra.mrb[80].mxu1 %vm430_vm6, %v3217_v20  ;;  %v4801_v20 = vpack.c.bf16 %v3902_v45, %v3900_v23 }
0x1992   :  { %4610 = vmatprep.mubr.msk.f32.mxu1 %vm5077_vm0, %v5078_v3 }
0x1993   :  { %4802 = vmatpush3.bf16.msra.mxu1 %v4801_v20 }
0x1994   :  { %4803 = vmatprep.subr.bf16.mxu1 %v5076_v0 }
0x1995   :  { %4611 = vmatmul.mubr.msk.f32.gmra.mrb[82].mxu1 %vm430_vm6, %v3218_v27  ;;  %v3906_v27 = vld [vmem:[%s6210_s2 + $0x78] sm:$0xff] }
0x1996   :  { %4632 = vmatprep.mubr.msk.f32.mxu1 %vm5077_vm0, %v5078_v3 }
0x19b6   :  { %v3065_v34 = vpop.f32.mrb[72].mxu1 }
0x19b7   :  { %v3079_v24 = vadd.f32 %v3065_v34, %v5968_v36  ;;  %v4576_v63 = vpop.f32.mrb[73].mxu1  ;;  %v4804_v34 = vpack.c.bf16 %v3906_v27, %v3904_v52 }
0x19b8   :  { %v3908_v63 = vld [vmem:[%s6212_s3 + $0x88] sm:$0xff] }
0x19b9   :  { %4805 = vmatpush3.bf16.msra.mxu1 %v4804_v34 }
0x19ba   :  { %v3070_v11 = vpop.f32.mrb[74].mxu1  ;;  %4830 = vmatprep.subr.bf16.mxu1 %v5076_v0 }
0x19bb   :  { %v3080_v57 = vadd.f32 %v3070_v11, %v5972_v46  ;;  %v4579_v38 = vpop.f32.mrb[75].mxu1 }
0x19be   :  { %v3075_v2 = vpop.f32.mrb[76].mxu1 }
0x19bf   :  { %v3081_v58 = vadd.f32 %v3075_v2, %v5978_v50  ;;  %v4582_v60 = vpop.f32.mrb[77].mxu1 }
0x1a60   :  { %v3304_v4 = vpop.f32.mrb[78].mxu1 }
0x1a61   :  { %v4606_v14 = vpop.f32.mrb[79].mxu1  ;;  %4616 = vmatmul.mubr.msk.f32.vlgmr.msra.gmra.mrb[84].mxu0 %vm337_vm4, %v3304_v4 }
0x1a62   :  { %4618 = vmatprep.mubr.msk.f32.mxu0 %vm5077_vm0, %v5078_v3 }
0x1a64   :  { %v3309_v53 = vpop.f32.mrb[80].mxu1 }
0x1a65   :  { %v4609_v13 = vpop.f32.mrb[81].mxu1  ;;  %4619 = vmatmul.mubr.msk.f32.gmra.mrb[86].mxu0 %vm337_vm4, %v3309_v53 }
0x1a66   :  { %4621 = vmatprep.mubr.msk.f32.mxu0 %vm5077_vm0, %v5078_v3 }
0x1a68   :  { %v3314_v36 = vpop.f32.mrb[82].mxu1 }
0x1a69   :  { %v4612_v46 = vpop.f32.mrb[83].mxu1  ;;  %4622 = vmatmul.mubr.msk.f32.gmra.mrb[88].mxu0 %vm337_vm4, %v3314_v36  ;;  %v6087_v36 = vld [vmem:[%s6211_s4 + $0x8] sm:$0xff] }
0x1a6a   :  { %4673 = vmatprep.mubr.msk.f32.mxu0 %vm5077_vm0, %v5078_v3  ;;  %v3466_v46 = vrot.slane %v6087_v36, %v1702_v41  ;;  %v3480_v45 = vrot.slane %v6087_v36, %v1716_v59 }
0x1b34   :  { %v3397_v50 = vpop.f32.mrb[84].mxu0 }
0x1b35   :  { %v3411_v15 = vadd.f32 %v3397_v50, %v3079_v24  ;;  %v4617_v17 = vpop.f32.mrb[85].mxu0  ;;  %v3907_v24 = vld [vmem:[%s6212_s3 + $0x80] sm:$0xff] }
0x1b36   :  { %v4807_v11 = vpack.c.bf16 %v3908_v63, %v3907_v24 }
0x1b37   :  { %v3414_v55 = vadd.f32 %v3411_v15, %v5692_v25  ;;  %v3473_v15 = vrot.slane %v6087_v36, %v1709_v51 }
0x1b38   :  { %v3402_v18 = vpop.f32.mrb[86].mxu0  ;;  %4808 = vmatpush3.bf16.msra.mxu0 %v4807_v11 }
0x1b39   :  { %v6043_v35 = vadd.f32 %v3420_v16, %v3414_v55  ;;  %v3412_v54 = vadd.f32 %v3402_v18, %v3080_v57  ;;  %v4620_v61 = vpop.f32.mrb[87].mxu0  ;;  %4809 = vmatprep.subr.bf16.mxu0 %v5076_v0 }
0x1b3b   :  { %v3415_v21 = vadd.f32 %v3412_v54, %v5697_v62  ;;  %v3424_v29 = vsel %vm170_vm2, %v6043_v35, 0.0 }
0x1b3c   :  { %3425 = vadd.xlane.f32.xlu0 %v3424_v29  ;;  %v3407_v30 = vpop.f32.mrb[88].mxu0 }
0x1b3d   :  { %v6048_v56 = vadd.f32 %v3420_v16, %v3415_v21  ;;  %v3413_v7 = vadd.f32 %v3407_v30, %v3081_v58  ;;  %v4623_v9 = vpop.f32.mrb[89].mxu0 }
0x1b3e   :  { %v3910_v9 = vld [vmem:[%s6212_s3 + $0x98] sm:$0xff] }
0x1b3f   :  { %v3416_v44 = vadd.f32 %v3413_v7, %v5702_v19  ;;  %v3427_v25 = vsel %vm170_vm2, %v6048_v56, 0.0  ;;  %v3909_v7 = vld [vmem:[%s6212_s3 + $0x90] sm:$0xff] }
0x1b40   :  { %3428 = vadd.xlane.f32.xlu1 %v3427_v25  ;;  %v3911_v25 = vld [vmem:[%s6212_s3 + $0xa0] sm:$0xff] }
0x1b41   :  { %v6053_v31 = vadd.f32 %v3420_v16, %v3416_v44  ;;  %v4810_v44 = vpack.c.bf16 %v3910_v9, %v3909_v7 }
0x1b43   :  { %v3430_v62 = vsel %vm177_vm3, %v6053_v31, 0.0  ;;  %4811 = vmatpush3.bf16.msra.mxu0 %v4810_v44 }
0x1b44   :  { %3431 = vadd.xlane.f32.xlu0 %v3430_v62  ;;  %4812 = vmatprep.subr.bf16.mxu0 %v5076_v0  ;;  %v3912_v62 = vld [vmem:[%s6212_s3 + $0xa8] sm:$0xff] }
0x1bc9   :  { %v3426_v32 = vpop.xlane.xlu0 %3425 }
0x1bca   :  { %v3433_v33 = vmul.f32 0.03125, %v3426_v32  ;;  %v4813_v32 = vpack.c.bf16 %v3912_v62, %v3911_v25 }
0x1bcc   :  { %v3436_v37 = vsub.f32 %v6043_v35, %v3433_v33  ;;  %4814 = vmatpush3.bf16.msra.mxu0 %v4813_v32  ;;  %v3913_v33 = vld [vmem:[%s6212_s3 + $0xb0] sm:$0xff]  ;;  %v3600_v32 = vrot.slane %v6087_v36, %v1836_v40 }
0x1bcd   :  { %v3429_v39 = vpop.xlane.xlu1 %3428  ;;  %4815 = vmatprep.subr.bf16.mxu0 %v5076_v0 }
0x1bce   :  { %v3434_v42 = vmul.f32 0.03125, %v3429_v39  ;;  %v3439_v47 = vmul.f32 %v3436_v37, %v3436_v37 }
0x1bd0   :  { %v3437_v43 = vsub.f32 %v6048_v56, %v3434_v42  ;;  %v3442_v19 = vsel %vm170_vm2, %v3439_v47, 0.0  ;;  %v3915_v42 = vld [vmem:[%s6212_s3 + $0xc0] sm:$0xff]  ;;  %v3916_v47 = vld [vmem:[%s6212_s3 + $0xc8] sm:$0xff] }
0x1bd1   :  { %3443 = vadd.xlane.f32.xlu0 %v3442_v19  ;;  %v3432_v5 = vpop.xlane.xlu0 %3431  ;;  %v3917_v19 = vld [vmem:[%s6212_s3 + $0xd0] sm:$0xff] }
0x1bd2   :  { %v3435_v6 = vmul.f32 0.03125, %v3432_v5  ;;  %v3440_v8 = vmul.f32 %v3437_v43, %v3437_v43  ;;  %v3918_v5 = vld [vmem:[%s6212_s3 + $0xd8] sm:$0xff] }
0x1bd4   :  { %v3438_v48 = vsub.f32 %v6053_v31, %v3435_v6  ;;  %v3445_v26 = vsel %vm170_vm2, %v3440_v8, 0.0  ;;  %v4822_v6 = vpack.c.bf16 %v3918_v5, %v3917_v19  ;;  %v3919_v8 = vld [vmem:[%s6212_s3 + $0xe0] sm:$0xff] }
0x1bd5   :  { %3446 = vadd.xlane.f32.xlu1 %v3445_v26 }
0x1bd6   :  { %v3441_v1 = vmul.f32 %v3438_v48, %v3438_v48 }
0x1bd8   :  { %v3448_v49 = vsel %vm177_vm3, %v3441_v1, 0.0  ;;  %v3921_v1 = vld [vmem:[%s6212_s3 + $0xf0] sm:$0xff] }
0x1bd9   :  { %3449 = vadd.xlane.f32.xlu0 %v3448_v49  ;;  %v3922_v49 = vld [vmem:[%s6212_s3 + $0xf8] sm:$0xff] }
0x1bda   :  { %v4828_v23 = vpack.c.bf16 %v3922_v49, %v3921_v1 }
0x1c5e   :  { %v3444_v57 = vpop.xlane.xlu0 %3443 }
0x1c5f   :  { %v3451_v38 = vmul.f32 0.03125, %v3444_v57 }
0x1c61   :  { %v3454_v2 = vadd.f32 1e-05, %v3451_v38 }
0x1c62   :  { %v3447_v58 = vpop.xlane.xlu1 %3446 }
0x1c63   :  { %5055 = vrsqrt.f32 %v3454_v2  ;;  %v3452_v60 = vmul.f32 0.03125, %v3447_v58 }
0x1c65   :  { %v3455_v4 = vadd.f32 1e-05, %v3452_v60 }
0x1c66   :  { %v3450_v14 = vpop.xlane.xlu0 %3449 }
0x1c67   :  { %5057 = vrsqrt.f32 %v3455_v4  ;;  %v3453_v53 = vmul.f32 0.03125, %v3450_v14 }
0x1c69   :  { %v3456_v13 = vadd.f32 1e-05, %v3453_v53 }
0x1c6b   :  { %5059 = vrsqrt.f32 %v3456_v13 }
0x1c6d   :  { %v5056_v50 = vpop.eup %5055 }
0x1c6e   :  { %v3460_v16 = vmul.f32 %v5056_v50, %v3436_v37  ;;  %v3914_v37 = vld [vmem:[%s6212_s3 + $0xb8] sm:$0xff] }
0x1c6f   :  { %v4816_v39 = vpack.c.bf16 %v3914_v37, %v3913_v33 }
0x1c70   :  { %v3467_v17 = vmul.f32 %v3466_v46, %v3460_v16 }
0x1c71   :  { %v5058_v55 = vpop.eup %5057  ;;  %4817 = vmatpush3.bf16.msra.mxu0 %v4816_v39 }
0x1c72   :  { %v3474_v18 = vadd.f32 %v3473_v15, %v3467_v17  ;;  %v3461_v54 = vmul.f32 %v5058_v55, %v3437_v43  ;;  %4818 = vmatprep.subr.bf16.mxu0 %v5076_v0  ;;  %v4819_v43 = vpack.c.bf16 %v3916_v47, %v3915_v42 }
0x1c74   :  { %4633 = vmatmul.mubr.msk.f32.vlgmr.msra.gmra.mrb[84].mxu1 %vm170_vm2, %v3474_v18  ;;  %v3468_v61 = vmul.f32 %v3466_v46, %v3461_v54 }
0x1c75   :  { %v5060_v21 = vpop.eup %5059  ;;  %4635 = vmatprep.mubr.msk.f32.mxu1 %vm5077_vm0, %v5078_v3  ;;  %4820 = vmatpush3.bf16.msra.mxu0 %v4819_v43 }
0x1c76   :  { %v3475_v29 = vadd.f32 %v3473_v15, %v3468_v61  ;;  %v3462_v30 = vmul.f32 %v5060_v21, %v3438_v48  ;;  %4821 = vmatprep.subr.bf16.mxu0 %v5076_v0  ;;  %v3920_v48 = vld [vmem:[%s6212_s3 + $0xe8] sm:$0xff] }
0x1c77   :  { %v4825_v26 = vpack.c.bf16 %v3920_v48, %v3919_v8 }
0x1c78   :  { %4636 = vmatmul.mubr.msk.f32.gmra.mrb[86].mxu1 %vm170_vm2, %v3475_v29  ;;  %v3469_v41 = vmul.f32 %v3466_v46, %v3462_v30 }
0x1c79   :  { %4638 = vmatprep.mubr.msk.f32.mxu1 %vm5077_vm0, %v5078_v3  ;;  %4823 = vmatpush3.bf16.msra.mxu0 %v4822_v6 }
0x1c7a   :  { %v3476_v51 = vadd.f32 %v3473_v15, %v3469_v41  ;;  %4824 = vmatprep.subr.bf16.mxu0 %v5076_v0 }
0x1c7c   :  { %4639 = vmatmul.mubr.msk.f32.gmra.mrb[88].mxu1 %vm170_vm2, %v3476_v51 }
0x1c7d   :  { %4690 = vmatprep.mubr.msk.f32.mxu1 %vm5077_vm0, %v5078_v3  ;;  %4826 = vmatpush3.bf16.msra.mxu0 %v4825_v26 }
0x1c7e   :  { %4827 = vmatprep.subr.bf16.mxu0 %v5076_v0 }
0x1c81   :  { %4829 = vmatpush3.bf16.msra.mxu0 %v4828_v23 }
0x1d47   :  { %v3556_v20 = vpop.f32.mrb[84].mxu1 }
0x1d48   :  { %v3557_v52 = vadd.f32 %v3556_v20, %v3480_v45  ;;  %v4634_v27 = vpop.f32.mrb[85].mxu1 }
0x1d4a   :  { %v3573_v34 = vmul.f32 0.044715, %v3557_v52  ;;  %v3570_v61 = vmul.f32 0.5, %v3557_v52 }
0x1d4b   :  { %v3561_v24 = vpop.f32.mrb[86].mxu1 }
0x1d4c   :  { %v3576_v63 = vmul.f32 %v3573_v34, %v3557_v52  ;;  %v3562_v11 = vadd.f32 %v3561_v24, %v3480_v45  ;;  %v4637_v57 = vpop.f32.mrb[87].mxu1 }
0x1d4e   :  { %v3579_v38 = vmul.f32 %v3576_v63, %v3557_v52  ;;  %v3574_v2 = vmul.f32 0.044715, %v3562_v11  ;;  %v3571_v41 = vmul.f32 0.5, %v3562_v11 }
0x1d4f   :  { %v3566_v58 = vpop.f32.mrb[88].mxu1 }
0x1d50   :  { %v3582_v60 = vadd.f32 %v3579_v38, %v3557_v52  ;;  %v3577_v4 = vmul.f32 %v3574_v2, %v3562_v11  ;;  %v3567_v14 = vadd.f32 %v3566_v58, %v3480_v45  ;;  %v4640_v53 = vpop.f32.mrb[89].mxu1  ;;  %v26_v38 = vld [vmem:[%s6208_s1 + $0x18] sm:$0xff]  ;;  %v27_v2 = vld [vmem:[%s6208_s1 + $0x20] sm:$0xff] }
0x1d51   :  { %v4831_v58 = vpack.c.bf16 %v27_v2, %v26_v38 }
0x1d52   :  { %v3585_v13 = vmul.f32 0.7978846, %v3582_v60  ;;  %v3575_v46 = vmul.f32 0.044715, %v3567_v14  ;;  %v3580_v50 = vmul.f32 %v3577_v4, %v3562_v11  ;;  %v3572_v44 = vmul.f32 0.5, %v3567_v14  ;;  %v28_v60 = vld [vmem:[%s6208_s1 + $0x28] sm:$0xff] }
0x1d53   :  { %4832 = vmatpush3.bf16.msra.mxu1 %v4831_v58  ;;  %v29_v4 = vld [vmem:[%s6208_s1 + $0x30] sm:$0xff] }
0x1d54   :  { %5061 = vtanh.f32 %v3585_v13  ;;  %v3578_v59 = vmul.f32 %v3575_v46, %v3567_v14  ;;  %v3583_v15 = vadd.f32 %v3580_v50, %v3562_v11  ;;  %4833 = vmatprep.subr.bf16.mxu1 %v5076_v0 }
0x1d56   :  { %v3586_v16 = vmul.f32 0.7978846, %v3583_v15  ;;  %v3581_v17 = vmul.f32 %v3578_v59, %v3567_v14 }
0x1d58   :  { %5063 = vtanh.f32 %v3586_v16  ;;  %v3584_v55 = vadd.f32 %v3581_v17, %v3567_v14  ;;  %v4834_v14 = vpack.c.bf16 %v29_v4, %v28_v60 }
0x1d5a   :  { %v3587_v18 = vmul.f32 0.7978846, %v3584_v55  ;;  %4835 = vmatpush3.bf16.msra.mxu1 %v4834_v14  ;;  %v5075_v55 = vld [vmem:[%s6208_s1] sm:$0xff] }
0x1d5c   :  { %5065 = vtanh.f32 %v3587_v18  ;;  %v3726_v18 = vrot.slane %v5075_v55, %v5234_v12 }
0x1d5e   :  { %v5062_v54 = vpop.eup %5061 }
0x1d5f   :  { %v3591_v21 = vadd.f32 1.0, %v5062_v54 }
0x1d61   :  { %v3594_v29 = vmul.f32 %v3591_v21, %v3570_v61  ;;  %v3733_v61 = vrot.slane %v5075_v55, %v5250_v28 }
0x1d62   :  { %v5064_v30 = vpop.eup %5063 }
0x1d63   :  { %4674 = vmatmul.mubr.f32.vlgmr.msra.gmra.mrb[90].mxu0 %v3594_v29  ;;  %v3592_v51 = vadd.f32 1.0, %v5064_v30 }
0x1d64   :  { %4676 = vmatprep.mubr.msk.f32.mxu0 %vm5077_vm0, %v5078_v3 }
0x1d65   :  { %v3595_v7 = vmul.f32 %v3592_v51, %v3571_v41 }
0x1d66   :  { %v5066_v9 = vpop.eup %5065 }
0x1d67   :  { %4677 = vmatmul.mubr.f32.gmra.mrb[92].mxu0 %v3595_v7  ;;  %v3593_v25 = vadd.f32 1.0, %v5066_v9 }
0x1d68   :  { %4679 = vmatprep.mubr.msk.f32.mxu0 %vm5077_vm0, %v5078_v3 }
0x1d69   :  { %v3596_v62 = vmul.f32 %v3593_v25, %v3572_v44 }
0x1d6b   :  { %4680 = vmatmul.mubr.f32.gmra.mrb[94].mxu0 %v3596_v62  ;;  %v3740_v62 = vrot.slane %v5075_v55, %v5560_v22 }
0x1e36   :  { %v3667_v33 = vpop.f32.mrb[90].mxu0 }
0x1e37   :  { %v3668_v37 = vadd.f32 %v3667_v33, %v3600_v32  ;;  %v4675_v39 = vpop.f32.mrb[91].mxu0 }
0x1e39   :  { %v3681_v42 = vadd.f32 %v3668_v37, %v6043_v35 }
0x1e3a   :  { %v3672_v47 = vpop.f32.mrb[92].mxu0 }
0x1e3b   :  { %v3673_v43 = vadd.f32 %v3672_v47, %v3600_v32  ;;  %v4678_v19 = vpop.f32.mrb[93].mxu0  ;;  %v3684_v5 = vsel %vm170_vm2, %v3681_v42, 0.0 }
0x1e3c   :  { %3685 = vadd.xlane.f32.xlu1 %v3684_v5 }
0x1e3d   :  { %v3682_v6 = vadd.f32 %v3673_v43, %v6048_v56 }
0x1e3e   :  { %v3677_v8 = vpop.f32.mrb[94].mxu0 }
0x1e3f   :  { %v3678_v48 = vadd.f32 %v3677_v8, %v3600_v32  ;;  %v4681_v26 = vpop.f32.mrb[95].mxu0  ;;  %v3687_v10 = vsel %vm170_vm2, %v3682_v6, 0.0 }
0x1e40   :  { %3688 = vadd.xlane.f32.xlu0 %v3687_v10 }
0x1e41   :  { %v3683_v40 = vadd.f32 %v3678_v48, %v6053_v31 }
0x1e43   :  { %v3690_v36 = vsel %vm177_vm3, %v3683_v40, 0.0 }
0x1e44   :  { %3691 = vadd.xlane.f32.xlu1 %v3690_v36 }
0x1ec9   :  { %v3686_v35 = vpop.xlane.xlu1 %3685 }
0x1eca   :  { %v3693_v1 = vmul.f32 0.03125, %v3686_v35 }
0x1ecc   :  { %v3696_v49 = vsub.f32 %v3681_v42, %v3693_v1 }
0x1ecd   :  { %v3689_v23 = vpop.xlane.xlu0 %3688 }
0x1ece   :  { %v3694_v45 = vmul.f32 0.03125, %v3689_v23  ;;  %v3699_v20 = vmul.f32 %v3696_v49, %v3696_v49 }
0x1ed0   :  { %v3697_v52 = vsub.f32 %v3682_v6, %v3694_v45  ;;  %v3702_v56 = vsel %vm170_vm2, %v3699_v20, 0.0 }
0x1ed1   :  { %3703 = vadd.xlane.f32.xlu0 %v3702_v56  ;;  %v3692_v27 = vpop.xlane.xlu1 %3691 }
0x1ed2   :  { %v3695_v34 = vmul.f32 0.03125, %v3692_v27  ;;  %v3700_v24 = vmul.f32 %v3697_v52, %v3697_v52 }
0x1ed4   :  { %v3698_v63 = vsub.f32 %v3683_v40, %v3695_v34  ;;  %v3705_v11 = vsel %vm170_vm2, %v3700_v24, 0.0 }
0x1ed5   :  { %3706 = vadd.xlane.f32.xlu1 %v3705_v11 }
0x1ed6   :  { %v3701_v31 = vmul.f32 %v3698_v63, %v3698_v63 }
0x1ed8   :  { %v3708_v57 = vsel %vm177_vm3, %v3701_v31, 0.0 }
0x1ed9   :  { %3709 = vadd.xlane.f32.xlu0 %v3708_v57 }
0x1f5e   :  { %v3704_v53 = vpop.xlane.xlu0 %3703 }
0x1f5f   :  { %v3711_v13 = vmul.f32 0.03125, %v3704_v53 }
0x1f61   :  { %v3714_v46 = vadd.f32 1e-05, %v3711_v13 }
0x1f62   :  { %v3707_v50 = vpop.xlane.xlu1 %3706 }
0x1f63   :  { %5067 = vrsqrt.f32 %v3714_v46  ;;  %v3712_v59 = vmul.f32 0.03125, %v3707_v50 }
0x1f65   :  { %v3715_v15 = vadd.f32 1e-05, %v3712_v59 }
0x1f66   :  { %v3710_v16 = vpop.xlane.xlu0 %3709 }
0x1f67   :  { %5069 = vrsqrt.f32 %v3715_v15  ;;  %v3713_v0 = vmul.f32 0.03125, %v3710_v16 }
0x1f69   :  { %v3716_v17 = vadd.f32 1e-05, %v3713_v0 }
0x1f6b   :  { %5071 = vrsqrt.f32 %v3716_v17 }
0x1f6d   :  { %v5068_v54 = vpop.eup %5067 }
0x1f6e   :  { %v3720_v21 = vmul.f32 %v5068_v54, %v3696_v49 }
0x1f70   :  { %v3727_v29 = vmul.f32 %v3726_v18, %v3720_v21 }
0x1f71   :  { %v5070_v30 = vpop.eup %5069 }
0x1f72   :  { %v3734_v41 = vadd.f32 %v3733_v61, %v3727_v29  ;;  %v3721_v51 = vmul.f32 %v5070_v30, %v3697_v52 }
0x1f74   :  { %4691 = vmatmul.mubr.msk.f32.vlgmr.msra.gmra.mrb[90].mxu1 %vm170_vm2, %v3734_v41  ;;  %v3728_v7 = vmul.f32 %v3726_v18, %v3721_v51 }
0x1f75   :  { %v5072_v9 = vpop.eup %5071  ;;  %4693 = vmatprep.mubr.msk.f32.mxu1 %vm5077_vm0, %v5078_v3 }
0x1f76   :  { %v3735_v44 = vadd.f32 %v3733_v61, %v3728_v7  ;;  %v3722_v25 = vmul.f32 %v5072_v9, %v3698_v63 }
0x1f78   :  { %4694 = vmatmul.mubr.msk.f32.gmra.mrb[92].mxu1 %vm170_vm2, %v3735_v44  ;;  %v3729_v12 = vmul.f32 %v3726_v18, %v3722_v25 }
0x1f79   :  { %4696 = vmatprep.mubr.msk.f32.mxu1 %vm5077_vm0, %v5078_v3 }
0x1f7a   :  { %v3736_v28 = vadd.f32 %v3733_v61, %v3729_v12 }
0x1f7c   :  { %4697 = vmatmul.mubr.msk.f32.gmra.mrb[94].mxu1 %vm170_vm2, %v3736_v28 }
0x2047   :  { %v3816_v32 = vpop.f32.mrb[90].mxu1 }
0x2048   :  { %v3817_v33 = vadd.f32 %v3816_v32, %v3740_v62  ;;  %v4692_v37 = vpop.f32.mrb[91].mxu1 }
0x204a   :  { %3830 = vst.msk [vmem:[%s6213_s5] sm:$0xff] %vm55_vm1, %v3817_v33 }
0x204b   :  { %v3821_v39 = vpop.f32.mrb[92].mxu1 }
0x204c   :  { %v3822_v42 = vadd.f32 %v3821_v39, %v3740_v62  ;;  %v4695_v47 = vpop.f32.mrb[93].mxu1 }
0x204e   :  { %3831 = vst.msk [vmem:[%s6213_s5 + $0x8] sm:$0xff] %vm55_vm1, %v3822_v42 }
0x204f   :  { %v3826_v3 = vpop.f32.mrb[94].mxu1 }
0x2050   :  { %v3827_v43 = vadd.f32 %v3826_v3, %v3740_v62  ;;  %v4698_v22 = vpop.f32.mrb[95].mxu1 }
0x2052   :  { %3833 = vst.msk [vmem:[%s6213_s5 + $0x10] sm:$0x3] %vm3832_vm9, %v3827_v43 }

</bundles_post_ra>
